<compile_context>
chip_gen: v7x
topology: tpu7x:2x2x1
jax: 0.10.0
libtpu: 0.0.40
codegen_flags: <defaults>
</compile_context>

<pallas_src>
import functools

import jax
import jax.numpy as jnp
from jax.experimental import pallas as pl
from jax.experimental.pallas import tpu as pltpu

EPS = 1e-5
MXU_DTYPE = jnp.bfloat16  # MXU operand dtype; accumulation / BN math is f32.


# --------------------------- in-kernel helpers ------------------------------
def _bn_train(acc, gamma, beta):
    """Training-mode BatchNorm on a flat (rows, C) f32 tensor.

    Two-pass (mean, then centered biased variance) for numerical robustness;
    apply stage is the folded 2-op form `centered * scale + beta` with
    scale = gamma * rsqrt(var + eps).  gamma/beta are (1, C) f32.
    """
    rows = acc.shape[0]
    mean = jnp.sum(acc, axis=0, keepdims=True) * (1.0 / rows)
    centered = acc - mean
    var = jnp.sum(centered * centered, axis=0, keepdims=True) * (1.0 / rows)
    scale = jax.lax.rsqrt(var + EPS) * gamma
    return centered * scale + beta


# ------------------------------- kernel --------------------------------------
def _block_kernel(*refs, n, ho, wo, stride, project):
    """Fused BasicBlock: conv1(3x3,s)+BN1+ReLU, conv2(3x3,1)+BN2, shortcut
    (identity or 1x1(s)+BN), add, ReLU.

    Inputs: stride*stride phase-decimated views of the padded input (so every
    conv tap is a contiguous window), per-tap weights, BN params.
    """
    nph = stride * stride
    phase_refs = refs[:nph]
    rest = refs[nph:]
    if project:
        (w1_ref, g1_ref, b1_ref, w2_ref, g2_ref, b2_ref,
         wsc_ref, gsc_ref, bsc_ref, o_ref, out1p_ref) = rest
    else:
        (w1_ref, g1_ref, b1_ref, w2_ref, g2_ref, b2_ref,
         o_ref, out1p_ref) = rest

    cin = phase_refs[0].shape[-1]
    cout = o_ref.shape[-1]
    r = n * ho * wo
    f32 = jnp.float32

    # ---- conv1: in-VMEM im2col as 9 per-tap MXU matmuls, f32 accumulation ---
    # Tap (ky,kx) reads phase (ky%s, kx%s) at contiguous offset (ky//s, kx//s).
    acc1 = None
    for ky in range(3):
        for kx in range(3):
            ph = phase_refs[(ky % stride) * stride + (kx % stride)]
            oy, ox = ky // stride, kx // stride
            xt = ph[:, oy:oy + ho, ox:ox + wo, :].reshape(r, cin)
            d = jnp.dot(xt, w1_ref[ky * 3 + kx], preferred_element_type=f32)
            acc1 = d if acc1 is None else acc1 + d
    y1 = jnp.maximum(_bn_train(acc1, g1_ref[...], b1_ref[...]), 0.0)

    # ---- keep out1 resident in a padded VMEM scratch (no HBM round trip).
    # Zero only the 1-pixel halo border, then write the interior.
    z_row = jnp.zeros((n, 1, wo + 2, cout), out1p_ref.dtype)
    z_col = jnp.zeros((n, ho + 2, 1, cout), out1p_ref.dtype)
    out1p_ref[:, 0:1, :, :] = z_row
    out1p_ref[:, ho + 1:ho + 2, :, :] = z_row
    out1p_ref[:, :, 0:1, :] = z_col
    out1p_ref[:, :, wo + 1:wo + 2, :] = z_col
    out1p_ref[:, 1:ho + 1, 1:wo + 1, :] = (
        y1.reshape(n, ho, wo, cout).astype(out1p_ref.dtype))

    # ---- conv2 (stride 1): 9 per-tap matmuls straight off the resident
    # activation — no materialized im2col columns, no 9x scratch.
    acc2 = None
    for ky in range(3):
        for kx in range(3):
            xt = out1p_ref[:, ky:ky + ho, kx:kx + wo, :].reshape(r, cout)
            d = jnp.dot(xt, w2_ref[ky * 3 + kx], preferred_element_type=f32)
            acc2 = d if acc2 is None else acc2 + d
    y2 = _bn_train(acc2, g2_ref[...], b2_ref[...])

    # ---- shortcut, derived from the already-resident input phases -----------
    # x[:, i*s, j*s, :] == xpad[:, 1+i*s, 1+j*s, :] == phase(1%s,1%s) at (1//s).
    p, off = 1 % stride, 1 // stride
    xs = phase_refs[p * stride + p][:, off:off + ho, off:off + wo, :].reshape(r, cin)
    if project:
        accs = jnp.dot(xs, wsc_ref[...], preferred_element_type=f32)
        sc = _bn_train(accs, gsc_ref[...], bsc_ref[...])
    else:
        sc = xs.astype(f32)

    o_ref[...] = jnp.maximum(y2 + sc, 0.0).astype(o_ref.dtype)


# ------------------------------- wrapper --------------------------------------
def _vmem_limit(footprint_bytes):
    """Scoped-VMEM request derived from the actual kernel footprint, capped at
    75% of the queried per-generation VMEM capacity (v5e/v6e: 128 MiB,
    v7x: 64 MiB) so the same code never over-budgets a smaller chip."""
    try:
        cap = int(pltpu.get_tpu_info().vmem_capacity_bytes)
    except Exception:  # info query unavailable -> assume the smallest (v7x)
        cap = 64 * 1024 * 1024
    want = 2 * int(footprint_bytes) + (4 << 20)  # headroom + compiler scratch
    return int(min(max(want, 8 << 20), int(cap * 0.75)))


@functools.partial(jax.jit, static_argnames=("stride",))
def basic_block_forward(x_nhwc, params, *, stride):
    """x_nhwc: (N, H, W, Cin) f32.  Returns (N, Ho, Wo, Cout) f32."""
    n, h, w, cin = x_nhwc.shape
    cout = params["w1"].shape[-1]
    ho = (h + 2 - 3) // stride + 1
    wo = (w + 2 - 3) // stride + 1
    r = n * ho * wo
    project = (stride != 1) or (cin != cout)

    # Layout plumbing only (no FLOPs, no duplication): pad once, cast the MXU
    # operand to bf16, and phase-decimate for stride>1 so every in-kernel
    # conv-tap read is a contiguous window.  Total bytes == padded input.
    xpad = jnp.pad(x_nhwc.astype(MXU_DTYPE), ((0, 0), (1, 1), (1, 1), (0, 0)))
    phases = [xpad[:, p::stride, q::stride, :]
              for p in range(stride) for q in range(stride)]

    # Per-tap weight layout (9, K, Cout): static leading-dim index in-kernel.
    w1 = params["w1"].reshape(9, cin, cout).astype(MXU_DTYPE)
    w2 = params["w2"].reshape(9, cout, cout).astype(MXU_DTYPE)

    args = list(phases) + [w1, params["g1"], params["b1"],
                           w2, params["g2"], params["b2"]]
    if project:
        args += [params["wsc"].astype(MXU_DTYPE), params["gsc"], params["bsc"]]

    kernel = functools.partial(_block_kernel, n=n, ho=ho, wo=wo,
                               stride=stride, project=project)

    in_bytes = sum(int(a.size) * a.dtype.itemsize for a in args)
    out_bytes = r * cout * 4
    scratch_bytes = n * (ho + 2) * (wo + 2) * cout * 2
    flops = 2 * r * cout * (9 * cin + 9 * cout + (cin if project else 0))
    n_bn = 3 if project else 2

    # TODO(synk): pad Cout to a multiple of 128 (lane-dense output stores, full
    # MXU columns) once real ResNet channel counts are used; at Cout=8 here the
    # 16x output-byte inflation would outweigh the store-slot win.
    vmem = pl.BlockSpec(memory_space=pltpu.MemorySpace.VMEM)
    out_flat = pl.pallas_call(
        kernel,
        out_shape=jax.ShapeDtypeStruct((r, cout), jnp.float32),
        in_specs=[vmem] * len(args),
        out_specs=vmem,
        scratch_shapes=[
            pltpu.VMEM((n, ho + 2, wo + 2, cout), MXU_DTYPE),  # out1 + 1px halo
        ],
        compiler_params=pltpu.CompilerParams(
            vmem_limit_bytes=_vmem_limit(in_bytes + out_bytes + scratch_bytes)),
        cost_estimate=pl.CostEstimate(
            flops=flops,
            transcendentals=n_bn * cout,
            bytes_accessed=in_bytes + out_bytes),
    )(*args)
    return out_flat.reshape(n, ho, wo, cout)


# ------------------------- pure-JAX reference ---------------------------------
def _ref_bn(y, g, b):
    mean = jnp.mean(y, axis=(0, 1, 2), keepdims=True)
    var = jnp.mean((y - mean) ** 2, axis=(0, 1, 2), keepdims=True)
    return ((y - mean) * jax.lax.rsqrt(var + EPS) * g.reshape(1, 1, 1, -1)
            + b.reshape(1, 1, 1, -1))


def basic_block_ref(x, p, *, stride, conv_dtype=jnp.float32):
    """conv_dtype=bf16 matches the kernel's MXU operand precision (f32
    accumulation either way); conv_dtype=f32 is the exact PyTorch-f32 path."""
    def conv(inp, w, s, pad):
        return jax.lax.conv_general_dilated(
            inp.astype(conv_dtype), w.astype(conv_dtype),
            window_strides=(s, s), padding=pad,
            dimension_numbers=("NHWC", "HWIO", "NHWC"),
            preferred_element_type=jnp.float32)

    out = jax.nn.relu(_ref_bn(conv(x, p["w1"], stride, ((1, 1), (1, 1))),
                              p["g1"], p["b1"]))
    out = _ref_bn(conv(out, p["w2"], 1, ((1, 1), (1, 1))), p["g2"], p["b2"])
    cin, cout = x.shape[-1], p["w1"].shape[-1]
    if stride != 1 or cin != cout:
        sc = _ref_bn(conv(x, p["wsc"].reshape(1, 1, cin, cout), stride,
                          ((0, 0), (0, 0))), p["gsc"], p["bsc"])
    else:
        # Kernel derives the identity shortcut from the bf16 MXU operand copy.
        sc = x.astype(conv_dtype).astype(jnp.float32)
    return jax.nn.relu(out + sc)


# -------------------------------------------------------------------------------
if __name__ == "__main__":
    # Projection-shortcut config (stride 2, channel change): N=2, Cin=4, H=W=16, Cout=8.
    N, Cin, H, W = 2, 4, 16, 16
    Cout, stride = 8, 2

    key = jax.random.PRNGKey(0)
    kx, k1, k2, k3, k4, k5, kx2 = jax.random.split(key, 7)

    x_nchw = jax.random.normal(kx, (N, Cin, H, W), jnp.float32)
    x_nhwc = jnp.transpose(x_nchw, (0, 2, 3, 1))   # NCHW -> NHWC, done once

    params = {
        # conv weights in HWIO (= torch OIHW transposed)
        "w1": jax.random.normal(k1, (3, 3, Cin, Cout), jnp.float32) * 0.1,
        "w2": jax.random.normal(k2, (3, 3, Cout, Cout), jnp.float32) * 0.1,
        "wsc": jax.random.normal(k3, (Cin, Cout), jnp.float32) * 0.1,
        # BatchNorm affine params, PyTorch default init (gamma=1, beta=0), shape (1, C)
        "g1": jnp.ones((1, Cout), jnp.float32), "b1": jnp.zeros((1, Cout), jnp.float32),
        "g2": jnp.ones((1, Cout), jnp.float32), "b2": jnp.zeros((1, Cout), jnp.float32),
        "gsc": jnp.ones((1, Cout), jnp.float32), "bsc": jnp.zeros((1, Cout), jnp.float32),
    }

    out = jax.block_until_ready(basic_block_forward(x_nhwc, params, stride=stride))
    Ho = (H + 2 - 3) // stride + 1
    assert out.shape == (N, Ho, Ho, Cout)

    # Tight check vs a reference using the same MXU precision (bf16 operands,
    # f32 accumulation), plus a loose sanity check vs the full-f32 semantics.
    ref_mxu = basic_block_ref(x_nhwc, params, stride=stride, conv_dtype=jnp.bfloat16)
    ref_f32 = basic_block_ref(x_nhwc, params, stride=stride, conv_dtype=jnp.float32)
    assert jnp.allclose(out, ref_mxu, atol=5e-3, rtol=5e-3), "mismatch vs bf16-MXU reference"
    assert jnp.allclose(out, ref_f32, atol=1e-1, rtol=1e-1), "mismatch vs f32 reference"

    # Identity-shortcut config (stride 1, Cin == Cout).
    x_id = jnp.transpose(jax.random.normal(kx2, (N, Cout, H, W), jnp.float32), (0, 2, 3, 1))
    params_id = {
        "w1": jax.random.normal(k4, (3, 3, Cout, Cout), jnp.float32) * 0.1,
        "w2": jax.random.normal(k5, (3, 3, Cout, Cout), jnp.float32) * 0.1,
        "g1": jnp.ones((1, Cout), jnp.float32), "b1": jnp.zeros((1, Cout), jnp.float32),
        "g2": jnp.ones((1, Cout), jnp.float32), "b2": jnp.zeros((1, Cout), jnp.float32),
    }
    out_id = jax.block_until_ready(basic_block_forward(x_id, params_id, stride=1))
    ref_id = basic_block_ref(x_id, params_id, stride=1, conv_dtype=jnp.bfloat16)
    ref_id_f32 = basic_block_ref(x_id, params_id, stride=1, conv_dtype=jnp.float32)
    assert out_id.shape == (N, H, W, Cout)
    assert jnp.allclose(out_id, ref_id, atol=5e-3, rtol=5e-3), "identity path mismatch"
    assert jnp.allclose(out_id, ref_id_f32, atol=1e-1, rtol=1e-1), "identity f32 mismatch"

    print("KERNEL_OK")
</pallas_src>

<mosaic_0001>
module attributes {stable_mosaic.version = 11 : i64} {
  func.func @_block_kernel(%arg0: memref<2x9x9x4xbf16, #tpu.memory_space<vmem>>, %arg1: memref<2x9x9x4xbf16, #tpu.memory_space<vmem>>, %arg2: memref<2x9x9x4xbf16, #tpu.memory_space<vmem>>, %arg3: memref<2x9x9x4xbf16, #tpu.memory_space<vmem>>, %arg4: memref<9x4x8xbf16, #tpu.memory_space<vmem>>, %arg5: memref<1x8xf32, #tpu.memory_space<vmem>>, %arg6: memref<1x8xf32, #tpu.memory_space<vmem>>, %arg7: memref<9x8x8xbf16, #tpu.memory_space<vmem>>, %arg8: memref<1x8xf32, #tpu.memory_space<vmem>>, %arg9: memref<1x8xf32, #tpu.memory_space<vmem>>, %arg10: memref<4x8xbf16, #tpu.memory_space<vmem>>, %arg11: memref<1x8xf32, #tpu.memory_space<vmem>>, %arg12: memref<1x8xf32, #tpu.memory_space<vmem>>, %arg13: memref<128x8xf32, #tpu.memory_space<vmem>>, %arg14: memref<2x10x10x8xbf16, #tpu.memory_space<vmem>>) attributes {dimension_semantics = [], scalar_prefetch = 0 : i64, scratch_operands = 1 : i64, tpu.core_type = #tpu.core_type<tc>} {
    %c0 = arith.constant 0 : index
    %c0_0 = arith.constant 0 : index
    %c0_1 = arith.constant 0 : index
    %c0_2 = arith.constant 0 : index
    %0 = vector.load %arg0[%c0, %c0_0, %c0_1, %c0_2] : memref<2x9x9x4xbf16, #tpu.memory_space<vmem>>, vector<2x8x8x4xbf16>
    %1 = vector.shape_cast %0 : vector<2x8x8x4xbf16> to vector<128x4xbf16>
    %c0_3 = arith.constant 0 : index
    %c0_4 = arith.constant 0 : index
    %c0_5 = arith.constant 0 : index
    %2 = vector.load %arg4[%c0_3, %c0_4, %c0_5] : memref<9x4x8xbf16, #tpu.memory_space<vmem>>, vector<1x4x8xbf16>
    %3 = vector.shape_cast %2 : vector<1x4x8xbf16> to vector<4x8xbf16>
    %cst = arith.constant dense<0.000000e+00> : vector<128x8xf32>
    %4 = tpu.matmul %1, %3, %cst {dimension_numbers = #tpu.dot_dimension_numbers<[1], [0], [0], [1], [0, 0, 1, 1], [], []>} : vector<128x4xbf16>, vector<4x8xbf16>, vector<128x8xf32> -> vector<128x8xf32>
    %c0_6 = arith.constant 0 : index
    %c0_7 = arith.constant 0 : index
    %c0_8 = arith.constant 0 : index
    %c0_9 = arith.constant 0 : index
    %5 = vector.load %arg1[%c0_6, %c0_7, %c0_8, %c0_9] : memref<2x9x9x4xbf16, #tpu.memory_space<vmem>>, vector<2x8x8x4xbf16>
    %6 = vector.shape_cast %5 : vector<2x8x8x4xbf16> to vector<128x4xbf16>
    %c1 = arith.constant 1 : index
    %c0_10 = arith.constant 0 : index
    %c0_11 = arith.constant 0 : index
    %7 = vector.load %arg4[%c1, %c0_10, %c0_11] : memref<9x4x8xbf16, #tpu.memory_space<vmem>>, vector<1x4x8xbf16>
    %8 = vector.shape_cast %7 : vector<1x4x8xbf16> to vector<4x8xbf16>
    %cst_12 = arith.constant dense<0.000000e+00> : vector<128x8xf32>
    %9 = tpu.matmul %6, %8, %cst_12 {dimension_numbers = #tpu.dot_dimension_numbers<[1], [0], [0], [1], [0, 0, 1, 1], [], []>} : vector<128x4xbf16>, vector<4x8xbf16>, vector<128x8xf32> -> vector<128x8xf32>
    %10 = arith.addf %4, %9 : vector<128x8xf32>
    %c0_13 = arith.constant 0 : index
    %c0_14 = arith.constant 0 : index
    %c1_15 = arith.constant 1 : index
    %c0_16 = arith.constant 0 : index
    %11 = vector.load %arg0[%c0_13, %c0_14, %c1_15, %c0_16] : memref<2x9x9x4xbf16, #tpu.memory_space<vmem>>, vector<2x8x8x4xbf16>
    %12 = vector.shape_cast %11 : vector<2x8x8x4xbf16> to vector<128x4xbf16>
    %c2 = arith.constant 2 : index
    %c0_17 = arith.constant 0 : index
    %c0_18 = arith.constant 0 : index
    %13 = vector.load %arg4[%c2, %c0_17, %c0_18] : memref<9x4x8xbf16, #tpu.memory_space<vmem>>, vector<1x4x8xbf16>
    %14 = vector.shape_cast %13 : vector<1x4x8xbf16> to vector<4x8xbf16>
    %cst_19 = arith.constant dense<0.000000e+00> : vector<128x8xf32>
    %15 = tpu.matmul %12, %14, %cst_19 {dimension_numbers = #tpu.dot_dimension_numbers<[1], [0], [0], [1], [0, 0, 1, 1], [], []>} : vector<128x4xbf16>, vector<4x8xbf16>, vector<128x8xf32> -> vector<128x8xf32>
    %16 = arith.addf %10, %15 : vector<128x8xf32>
    %c0_20 = arith.constant 0 : index
    %c0_21 = arith.constant 0 : index
    %c0_22 = arith.constant 0 : index
    %c0_23 = arith.constant 0 : index
    %17 = vector.load %arg2[%c0_20, %c0_21, %c0_22, %c0_23] : memref<2x9x9x4xbf16, #tpu.memory_space<vmem>>, vector<2x8x8x4xbf16>
    %18 = vector.shape_cast %17 : vector<2x8x8x4xbf16> to vector<128x4xbf16>
    %c3 = arith.constant 3 : index
    %c0_24 = arith.constant 0 : index
    %c0_25 = arith.constant 0 : index
    %19 = vector.load %arg4[%c3, %c0_24, %c0_25] : memref<9x4x8xbf16, #tpu.memory_space<vmem>>, vector<1x4x8xbf16>
    %20 = vector.shape_cast %19 : vector<1x4x8xbf16> to vector<4x8xbf16>
    %cst_26 = arith.constant dense<0.000000e+00> : vector<128x8xf32>
    %21 = tpu.matmul %18, %20, %cst_26 {dimension_numbers = #tpu.dot_dimension_numbers<[1], [0], [0], [1], [0, 0, 1, 1], [], []>} : vector<128x4xbf16>, vector<4x8xbf16>, vector<128x8xf32> -> vector<128x8xf32>
    %22 = arith.addf %16, %21 : vector<128x8xf32>
    %c0_27 = arith.constant 0 : index
    %c0_28 = arith.constant 0 : index
    %c0_29 = arith.constant 0 : index
    %c0_30 = arith.constant 0 : index
    %23 = vector.load %arg3[%c0_27, %c0_28, %c0_29, %c0_30] : memref<2x9x9x4xbf16, #tpu.memory_space<vmem>>, vector<2x8x8x4xbf16>
    %24 = vector.shape_cast %23 : vector<2x8x8x4xbf16> to vector<128x4xbf16>
    %c4 = arith.constant 4 : index
    %c0_31 = arith.constant 0 : index
    %c0_32 = arith.constant 0 : index
    %25 = vector.load %arg4[%c4, %c0_31, %c0_32] : memref<9x4x8xbf16, #tpu.memory_space<vmem>>, vector<1x4x8xbf16>
    %26 = vector.shape_cast %25 : vector<1x4x8xbf16> to vector<4x8xbf16>
    %cst_33 = arith.constant dense<0.000000e+00> : vector<128x8xf32>
    %27 = tpu.matmul %24, %26, %cst_33 {dimension_numbers = #tpu.dot_dimension_numbers<[1], [0], [0], [1], [0, 0, 1, 1], [], []>} : vector<128x4xbf16>, vector<4x8xbf16>, vector<128x8xf32> -> vector<128x8xf32>
    %28 = arith.addf %22, %27 : vector<128x8xf32>
    %c0_34 = arith.constant 0 : index
    %c0_35 = arith.constant 0 : index
    %c1_36 = arith.constant 1 : index
    %c0_37 = arith.constant 0 : index
    %29 = vector.load %arg2[%c0_34, %c0_35, %c1_36, %c0_37] : memref<2x9x9x4xbf16, #tpu.memory_space<vmem>>, vector<2x8x8x4xbf16>
    %30 = vector.shape_cast %29 : vector<2x8x8x4xbf16> to vector<128x4xbf16>
    %c5 = arith.constant 5 : index
    %c0_38 = arith.constant 0 : index
    %c0_39 = arith.constant 0 : index
    %31 = vector.load %arg4[%c5, %c0_38, %c0_39] : memref<9x4x8xbf16, #tpu.memory_space<vmem>>, vector<1x4x8xbf16>
    %32 = vector.shape_cast %31 : vector<1x4x8xbf16> to vector<4x8xbf16>
    %cst_40 = arith.constant dense<0.000000e+00> : vector<128x8xf32>
    %33 = tpu.matmul %30, %32, %cst_40 {dimension_numbers = #tpu.dot_dimension_numbers<[1], [0], [0], [1], [0, 0, 1, 1], [], []>} : vector<128x4xbf16>, vector<4x8xbf16>, vector<128x8xf32> -> vector<128x8xf32>
    %34 = arith.addf %28, %33 : vector<128x8xf32>
    %c0_41 = arith.constant 0 : index
    %c1_42 = arith.constant 1 : index
    %c0_43 = arith.constant 0 : index
    %c0_44 = arith.constant 0 : index
    %35 = vector.load %arg0[%c0_41, %c1_42, %c0_43, %c0_44] : memref<2x9x9x4xbf16, #tpu.memory_space<vmem>>, vector<2x8x8x4xbf16>
    %36 = vector.shape_cast %35 : vector<2x8x8x4xbf16> to vector<128x4xbf16>
    %c6 = arith.constant 6 : index
    %c0_45 = arith.constant 0 : index
    %c0_46 = arith.constant 0 : index
    %37 = vector.load %arg4[%c6, %c0_45, %c0_46] : memref<9x4x8xbf16, #tpu.memory_space<vmem>>, vector<1x4x8xbf16>
    %38 = vector.shape_cast %37 : vector<1x4x8xbf16> to vector<4x8xbf16>
    %cst_47 = arith.constant dense<0.000000e+00> : vector<128x8xf32>
    %39 = tpu.matmul %36, %38, %cst_47 {dimension_numbers = #tpu.dot_dimension_numbers<[1], [0], [0], [1], [0, 0, 1, 1], [], []>} : vector<128x4xbf16>, vector<4x8xbf16>, vector<128x8xf32> -> vector<128x8xf32>
    %40 = arith.addf %34, %39 : vector<128x8xf32>
    %c0_48 = arith.constant 0 : index
    %c1_49 = arith.constant 1 : index
    %c0_50 = arith.constant 0 : index
    %c0_51 = arith.constant 0 : index
    %41 = vector.load %arg1[%c0_48, %c1_49, %c0_50, %c0_51] : memref<2x9x9x4xbf16, #tpu.memory_space<vmem>>, vector<2x8x8x4xbf16>
    %42 = vector.shape_cast %41 : vector<2x8x8x4xbf16> to vector<128x4xbf16>
    %c7 = arith.constant 7 : index
    %c0_52 = arith.constant 0 : index
    %c0_53 = arith.constant 0 : index
    %43 = vector.load %arg4[%c7, %c0_52, %c0_53] : memref<9x4x8xbf16, #tpu.memory_space<vmem>>, vector<1x4x8xbf16>
    %44 = vector.shape_cast %43 : vector<1x4x8xbf16> to vector<4x8xbf16>
    %cst_54 = arith.constant dense<0.000000e+00> : vector<128x8xf32>
    %45 = tpu.matmul %42, %44, %cst_54 {dimension_numbers = #tpu.dot_dimension_numbers<[1], [0], [0], [1], [0, 0, 1, 1], [], []>} : vector<128x4xbf16>, vector<4x8xbf16>, vector<128x8xf32> -> vector<128x8xf32>
    %46 = arith.addf %40, %45 : vector<128x8xf32>
    %c0_55 = arith.constant 0 : index
    %c1_56 = arith.constant 1 : index
    %c1_57 = arith.constant 1 : index
    %c0_58 = arith.constant 0 : index
    %47 = vector.load %arg0[%c0_55, %c1_56, %c1_57, %c0_58] : memref<2x9x9x4xbf16, #tpu.memory_space<vmem>>, vector<2x8x8x4xbf16>
    %48 = vector.shape_cast %47 : vector<2x8x8x4xbf16> to vector<128x4xbf16>
    %c8 = arith.constant 8 : index
    %c0_59 = arith.constant 0 : index
    %c0_60 = arith.constant 0 : index
    %49 = vector.load %arg4[%c8, %c0_59, %c0_60] : memref<9x4x8xbf16, #tpu.memory_space<vmem>>, vector<1x4x8xbf16>
    %50 = vector.shape_cast %49 : vector<1x4x8xbf16> to vector<4x8xbf16>
    %cst_61 = arith.constant dense<0.000000e+00> : vector<128x8xf32>
    %51 = tpu.matmul %48, %50, %cst_61 {dimension_numbers = #tpu.dot_dimension_numbers<[1], [0], [0], [1], [0, 0, 1, 1], [], []>} : vector<128x4xbf16>, vector<4x8xbf16>, vector<128x8xf32> -> vector<128x8xf32>
    %52 = arith.addf %46, %51 : vector<128x8xf32>
    %c0_62 = arith.constant 0 : index
    %c0_63 = arith.constant 0 : index
    %53 = vector.load %arg5[%c0_62, %c0_63] : memref<1x8xf32, #tpu.memory_space<vmem>>, vector<1x8xf32>
    %c0_64 = arith.constant 0 : index
    %c0_65 = arith.constant 0 : index
    %54 = vector.load %arg6[%c0_64, %c0_65] : memref<1x8xf32, #tpu.memory_space<vmem>>, vector<1x8xf32>
    %cst_66 = arith.constant dense<0.000000e+00> : vector<8xf32>
    %55 = vector.multi_reduction <add>, %52, %cst_66 [0] : vector<128x8xf32> to vector<8xf32>
    %56 = vector.shape_cast %55 : vector<8xf32> to vector<1x8xf32>
    %cst_67 = arith.constant 7.812500e-03 : f32
    %57 = vector.broadcast %cst_67 : f32 to vector<1x8xf32>
    %58 = arith.mulf %56, %57 : vector<1x8xf32>
    %59 = vector.broadcast %58 : vector<1x8xf32> to vector<128x8xf32>
    %60 = arith.subf %52, %59 : vector<128x8xf32>
    %61 = arith.mulf %60, %60 : vector<128x8xf32>
    %cst_68 = arith.constant dense<0.000000e+00> : vector<8xf32>
    %62 = vector.multi_reduction <add>, %61, %cst_68 [0] : vector<128x8xf32> to vector<8xf32>
    %63 = vector.shape_cast %62 : vector<8xf32> to vector<1x8xf32>
    %cst_69 = arith.constant 7.812500e-03 : f32
    %64 = vector.broadcast %cst_69 : f32 to vector<1x8xf32>
    %65 = arith.mulf %63, %64 : vector<1x8xf32>
    %cst_70 = arith.constant 9.99999974E-6 : f32
    %66 = vector.broadcast %cst_70 : f32 to vector<1x8xf32>
    %67 = arith.addf %65, %66 : vector<1x8xf32>
    %68 = math.rsqrt %67 : vector<1x8xf32>
    %69 = arith.mulf %68, %53 : vector<1x8xf32>
    %70 = vector.broadcast %69 : vector<1x8xf32> to vector<128x8xf32>
    %71 = arith.mulf %60, %70 : vector<128x8xf32>
    %72 = vector.broadcast %54 : vector<1x8xf32> to vector<128x8xf32>
    %73 = arith.addf %71, %72 : vector<128x8xf32>
    %cst_71 = arith.constant 0.000000e+00 : f32
    %74 = vector.broadcast %cst_71 : f32 to vector<128x8xf32>
    %75 = arith.maximumf %73, %74 : vector<128x8xf32>
    %cst_72 = arith.constant 0.000000e+00 : bf16
    %76 = vector.broadcast %cst_72 : bf16 to vector<2x1x10x8xbf16>
    %cst_73 = arith.constant 0.000000e+00 : bf16
    %77 = vector.broadcast %cst_73 : bf16 to vector<2x10x1x8xbf16>
    %c0_74 = arith.constant 0 : index
    %c0_75 = arith.constant 0 : index
    %c0_76 = arith.constant 0 : index
    %c0_77 = arith.constant 0 : index
    %78 = vector.load %arg14[%c0_74, %c0_75, %c0_76, %c0_77] : memref<2x10x10x8xbf16, #tpu.memory_space<vmem>>, vector<2x1x10x8xbf16>
    tpu.vector_store %arg14[%c0_74, %c0_75, %c0_76, %c0_77], %76 {strides = array<i32>} : memref<2x10x10x8xbf16, #tpu.memory_space<vmem>>, vector<2x1x10x8xbf16>,
    %c0_78 = arith.constant 0 : index
    %c9 = arith.constant 9 : index
    %c0_79 = arith.constant 0 : index
    %c0_80 = arith.constant 0 : index
    %79 = vector.load %arg14[%c0_78, %c9, %c0_79, %c0_80] : memref<2x10x10x8xbf16, #tpu.memory_space<vmem>>, vector<2x1x10x8xbf16>
    tpu.vector_store %arg14[%c0_78, %c9, %c0_79, %c0_80], %76 {strides = array<i32>} : memref<2x10x10x8xbf16, #tpu.memory_space<vmem>>, vector<2x1x10x8xbf16>,
    %c0_81 = arith.constant 0 : index
    %c0_82 = arith.constant 0 : index
    %c0_83 = arith.constant 0 : index
    %c0_84 = arith.constant 0 : index
    %80 = vector.load %arg14[%c0_81, %c0_82, %c0_83, %c0_84] : memref<2x10x10x8xbf16, #tpu.memory_space<vmem>>, vector<2x10x1x8xbf16>
    tpu.vector_store %arg14[%c0_81, %c0_82, %c0_83, %c0_84], %77 {strides = array<i32>} : memref<2x10x10x8xbf16, #tpu.memory_space<vmem>>, vector<2x10x1x8xbf16>,
    %c0_85 = arith.constant 0 : index
    %c0_86 = arith.constant 0 : index
    %c9_87 = arith.constant 9 : index
    %c0_88 = arith.constant 0 : index
    %81 = vector.load %arg14[%c0_85, %c0_86, %c9_87, %c0_88] : memref<2x10x10x8xbf16, #tpu.memory_space<vmem>>, vector<2x10x1x8xbf16>
    tpu.vector_store %arg14[%c0_85, %c0_86, %c9_87, %c0_88], %77 {strides = array<i32>} : memref<2x10x10x8xbf16, #tpu.memory_space<vmem>>, vector<2x10x1x8xbf16>,
    %82 = vector.shape_cast %75 : vector<128x8xf32> to vector<2x8x8x8xf32>
    %83 = arith.truncf %82 : vector<2x8x8x8xf32> to vector<2x8x8x8xbf16>
    %c0_89 = arith.constant 0 : index
    %c1_90 = arith.constant 1 : index
    %c1_91 = arith.constant 1 : index
    %c0_92 = arith.constant 0 : index
    %84 = vector.load %arg14[%c0_89, %c1_90, %c1_91, %c0_92] : memref<2x10x10x8xbf16, #tpu.memory_space<vmem>>, vector<2x8x8x8xbf16>
    tpu.vector_store %arg14[%c0_89, %c1_90, %c1_91, %c0_92], %83 {strides = array<i32>} : memref<2x10x10x8xbf16, #tpu.memory_space<vmem>>, vector<2x8x8x8xbf16>,
    %c0_93 = arith.constant 0 : index
    %c0_94 = arith.constant 0 : index
    %c0_95 = arith.constant 0 : index
    %c0_96 = arith.constant 0 : index
    %85 = vector.load %arg14[%c0_93, %c0_94, %c0_95, %c0_96] : memref<2x10x10x8xbf16, #tpu.memory_space<vmem>>, vector<2x8x8x8xbf16>
    %86 = vector.shape_cast %85 : vector<2x8x8x8xbf16> to vector<128x8xbf16>
    %c0_97 = arith.constant 0 : index
    %c0_98 = arith.constant 0 : index
    %c0_99 = arith.constant 0 : index
    %87 = vector.load %arg7[%c0_97, %c0_98, %c0_99] : memref<9x8x8xbf16, #tpu.memory_space<vmem>>, vector<1x8x8xbf16>
    %88 = vector.shape_cast %87 : vector<1x8x8xbf16> to vector<8x8xbf16>
    %cst_100 = arith.constant dense<0.000000e+00> : vector<128x8xf32>
    %89 = tpu.matmul %86, %88, %cst_100 {dimension_numbers = #tpu.dot_dimension_numbers<[1], [0], [0], [1], [0, 0, 1, 1], [], []>} : vector<128x8xbf16>, vector<8x8xbf16>, vector<128x8xf32> -> vector<128x8xf32>
    %c0_101 = arith.constant 0 : index
    %c0_102 = arith.constant 0 : index
    %c1_103 = arith.constant 1 : index
    %c0_104 = arith.constant 0 : index
    %90 = vector.load %arg14[%c0_101, %c0_102, %c1_103, %c0_104] : memref<2x10x10x8xbf16, #tpu.memory_space<vmem>>, vector<2x8x8x8xbf16>
    %91 = vector.shape_cast %90 : vector<2x8x8x8xbf16> to vector<128x8xbf16>
    %c1_105 = arith.constant 1 : index
    %c0_106 = arith.constant 0 : index
    %c0_107 = arith.constant 0 : index
    %92 = vector.load %arg7[%c1_105, %c0_106, %c0_107] : memref<9x8x8xbf16, #tpu.memory_space<vmem>>, vector<1x8x8xbf16>
    %93 = vector.shape_cast %92 : vector<1x8x8xbf16> to vector<8x8xbf16>
    %cst_108 = arith.constant dense<0.000000e+00> : vector<128x8xf32>
    %94 = tpu.matmul %91, %93, %cst_108 {dimension_numbers = #tpu.dot_dimension_numbers<[1], [0], [0], [1], [0, 0, 1, 1], [], []>} : vector<128x8xbf16>, vector<8x8xbf16>, vector<128x8xf32> -> vector<128x8xf32>
    %95 = arith.addf %89, %94 : vector<128x8xf32>
    %c0_109 = arith.constant 0 : index
    %c0_110 = arith.constant 0 : index
    %c2_111 = arith.constant 2 : index
    %c0_112 = arith.constant 0 : index
    %96 = vector.load %arg14[%c0_109, %c0_110, %c2_111, %c0_112] : memref<2x10x10x8xbf16, #tpu.memory_space<vmem>>, vector<2x8x8x8xbf16>
    %97 = vector.shape_cast %96 : vector<2x8x8x8xbf16> to vector<128x8xbf16>
    %c2_113 = arith.constant 2 : index
    %c0_114 = arith.constant 0 : index
    %c0_115 = arith.constant 0 : index
    %98 = vector.load %arg7[%c2_113, %c0_114, %c0_115] : memref<9x8x8xbf16, #tpu.memory_space<vmem>>, vector<1x8x8xbf16>
    %99 = vector.shape_cast %98 : vector<1x8x8xbf16> to vector<8x8xbf16>
    %cst_116 = arith.constant dense<0.000000e+00> : vector<128x8xf32>
    %100 = tpu.matmul %97, %99, %cst_116 {dimension_numbers = #tpu.dot_dimension_numbers<[1], [0], [0], [1], [0, 0, 1, 1], [], []>} : vector<128x8xbf16>, vector<8x8xbf16>, vector<128x8xf32> -> vector<128x8xf32>
    %101 = arith.addf %95, %100 : vector<128x8xf32>
    %c0_117 = arith.constant 0 : index
    %c1_118 = arith.constant 1 : index
    %c0_119 = arith.constant 0 : index
    %c0_120 = arith.constant 0 : index
    %102 = vector.load %arg14[%c0_117, %c1_118, %c0_119, %c0_120] : memref<2x10x10x8xbf16, #tpu.memory_space<vmem>>, vector<2x8x8x8xbf16>
    %103 = vector.shape_cast %102 : vector<2x8x8x8xbf16> to vector<128x8xbf16>
    %c3_121 = arith.constant 3 : index
    %c0_122 = arith.constant 0 : index
    %c0_123 = arith.constant 0 : index
    %104 = vector.load %arg7[%c3_121, %c0_122, %c0_123] : memref<9x8x8xbf16, #tpu.memory_space<vmem>>, vector<1x8x8xbf16>
    %105 = vector.shape_cast %104 : vector<1x8x8xbf16> to vector<8x8xbf16>
    %cst_124 = arith.constant dense<0.000000e+00> : vector<128x8xf32>
    %106 = tpu.matmul %103, %105, %cst_124 {dimension_numbers = #tpu.dot_dimension_numbers<[1], [0], [0], [1], [0, 0, 1, 1], [], []>} : vector<128x8xbf16>, vector<8x8xbf16>, vector<128x8xf32> -> vector<128x8xf32>
    %107 = arith.addf %101, %106 : vector<128x8xf32>
    %c0_125 = arith.constant 0 : index
    %c1_126 = arith.constant 1 : index
    %c1_127 = arith.constant 1 : index
    %c0_128 = arith.constant 0 : index
    %108 = vector.load %arg14[%c0_125, %c1_126, %c1_127, %c0_128] : memref<2x10x10x8xbf16, #tpu.memory_space<vmem>>, vector<2x8x8x8xbf16>
    %109 = vector.shape_cast %108 : vector<2x8x8x8xbf16> to vector<128x8xbf16>
    %c4_129 = arith.constant 4 : index
    %c0_130 = arith.constant 0 : index
    %c0_131 = arith.constant 0 : index
    %110 = vector.load %arg7[%c4_129, %c0_130, %c0_131] : memref<9x8x8xbf16, #tpu.memory_space<vmem>>, vector<1x8x8xbf16>
    %111 = vector.shape_cast %110 : vector<1x8x8xbf16> to vector<8x8xbf16>
    %cst_132 = arith.constant dense<0.000000e+00> : vector<128x8xf32>
    %112 = tpu.matmul %109, %111, %cst_132 {dimension_numbers = #tpu.dot_dimension_numbers<[1], [0], [0], [1], [0, 0, 1, 1], [], []>} : vector<128x8xbf16>, vector<8x8xbf16>, vector<128x8xf32> -> vector<128x8xf32>
    %113 = arith.addf %107, %112 : vector<128x8xf32>
    %c0_133 = arith.constant 0 : index
    %c1_134 = arith.constant 1 : index
    %c2_135 = arith.constant 2 : index
    %c0_136 = arith.constant 0 : index
    %114 = vector.load %arg14[%c0_133, %c1_134, %c2_135, %c0_136] : memref<2x10x10x8xbf16, #tpu.memory_space<vmem>>, vector<2x8x8x8xbf16>
    %115 = vector.shape_cast %114 : vector<2x8x8x8xbf16> to vector<128x8xbf16>
    %c5_137 = arith.constant 5 : index
    %c0_138 = arith.constant 0 : index
    %c0_139 = arith.constant 0 : index
    %116 = vector.load %arg7[%c5_137, %c0_138, %c0_139] : memref<9x8x8xbf16, #tpu.memory_space<vmem>>, vector<1x8x8xbf16>
    %117 = vector.shape_cast %116 : vector<1x8x8xbf16> to vector<8x8xbf16>
    %cst_140 = arith.constant dense<0.000000e+00> : vector<128x8xf32>
    %118 = tpu.matmul %115, %117, %cst_140 {dimension_numbers = #tpu.dot_dimension_numbers<[1], [0], [0], [1], [0, 0, 1, 1], [], []>} : vector<128x8xbf16>, vector<8x8xbf16>, vector<128x8xf32> -> vector<128x8xf32>
    %119 = arith.addf %113, %118 : vector<128x8xf32>
    %c0_141 = arith.constant 0 : index
    %c2_142 = arith.constant 2 : index
    %c0_143 = arith.constant 0 : index
    %c0_144 = arith.constant 0 : index
    %120 = vector.load %arg14[%c0_141, %c2_142, %c0_143, %c0_144] : memref<2x10x10x8xbf16, #tpu.memory_space<vmem>>, vector<2x8x8x8xbf16>
    %121 = vector.shape_cast %120 : vector<2x8x8x8xbf16> to vector<128x8xbf16>
    %c6_145 = arith.constant 6 : index
    %c0_146 = arith.constant 0 : index
    %c0_147 = arith.constant 0 : index
    %122 = vector.load %arg7[%c6_145, %c0_146, %c0_147] : memref<9x8x8xbf16, #tpu.memory_space<vmem>>, vector<1x8x8xbf16>
    %123 = vector.shape_cast %122 : vector<1x8x8xbf16> to vector<8x8xbf16>
    %cst_148 = arith.constant dense<0.000000e+00> : vector<128x8xf32>
    %124 = tpu.matmul %121, %123, %cst_148 {dimension_numbers = #tpu.dot_dimension_numbers<[1], [0], [0], [1], [0, 0, 1, 1], [], []>} : vector<128x8xbf16>, vector<8x8xbf16>, vector<128x8xf32> -> vector<128x8xf32>
    %125 = arith.addf %119, %124 : vector<128x8xf32>
    %c0_149 = arith.constant 0 : index
    %c2_150 = arith.constant 2 : index
    %c1_151 = arith.constant 1 : index
    %c0_152 = arith.constant 0 : index
    %126 = vector.load %arg14[%c0_149, %c2_150, %c1_151, %c0_152] : memref<2x10x10x8xbf16, #tpu.memory_space<vmem>>, vector<2x8x8x8xbf16>
    %127 = vector.shape_cast %126 : vector<2x8x8x8xbf16> to vector<128x8xbf16>
    %c7_153 = arith.constant 7 : index
    %c0_154 = arith.constant 0 : index
    %c0_155 = arith.constant 0 : index
    %128 = vector.load %arg7[%c7_153, %c0_154, %c0_155] : memref<9x8x8xbf16, #tpu.memory_space<vmem>>, vector<1x8x8xbf16>
    %129 = vector.shape_cast %128 : vector<1x8x8xbf16> to vector<8x8xbf16>
    %cst_156 = arith.constant dense<0.000000e+00> : vector<128x8xf32>
    %130 = tpu.matmul %127, %129, %cst_156 {dimension_numbers = #tpu.dot_dimension_numbers<[1], [0], [0], [1], [0, 0, 1, 1], [], []>} : vector<128x8xbf16>, vector<8x8xbf16>, vector<128x8xf32> -> vector<128x8xf32>
    %131 = arith.addf %125, %130 : vector<128x8xf32>
    %c0_157 = arith.constant 0 : index
    %c2_158 = arith.constant 2 : index
    %c2_159 = arith.constant 2 : index
    %c0_160 = arith.constant 0 : index
    %132 = vector.load %arg14[%c0_157, %c2_158, %c2_159, %c0_160] : memref<2x10x10x8xbf16, #tpu.memory_space<vmem>>, vector<2x8x8x8xbf16>
    %133 = vector.shape_cast %132 : vector<2x8x8x8xbf16> to vector<128x8xbf16>
    %c8_161 = arith.constant 8 : index
    %c0_162 = arith.constant 0 : index
    %c0_163 = arith.constant 0 : index
    %134 = vector.load %arg7[%c8_161, %c0_162, %c0_163] : memref<9x8x8xbf16, #tpu.memory_space<vmem>>, vector<1x8x8xbf16>
    %135 = vector.shape_cast %134 : vector<1x8x8xbf16> to vector<8x8xbf16>
    %cst_164 = arith.constant dense<0.000000e+00> : vector<128x8xf32>
    %136 = tpu.matmul %133, %135, %cst_164 {dimension_numbers = #tpu.dot_dimension_numbers<[1], [0], [0], [1], [0, 0, 1, 1], [], []>} : vector<128x8xbf16>, vector<8x8xbf16>, vector<128x8xf32> -> vector<128x8xf32>
    %137 = arith.addf %131, %136 : vector<128x8xf32>
    %c0_165 = arith.constant 0 : index
    %c0_166 = arith.constant 0 : index
    %138 = vector.load %arg8[%c0_165, %c0_166] : memref<1x8xf32, #tpu.memory_space<vmem>>, vector<1x8xf32>
    %c0_167 = arith.constant 0 : index
    %c0_168 = arith.constant 0 : index
    %139 = vector.load %arg9[%c0_167, %c0_168] : memref<1x8xf32, #tpu.memory_space<vmem>>, vector<1x8xf32>
    %cst_169 = arith.constant dense<0.000000e+00> : vector<8xf32>
    %140 = vector.multi_reduction <add>, %137, %cst_169 [0] : vector<128x8xf32> to vector<8xf32>
    %141 = vector.shape_cast %140 : vector<8xf32> to vector<1x8xf32>
    %cst_170 = arith.constant 7.812500e-03 : f32
    %142 = vector.broadcast %cst_170 : f32 to vector<1x8xf32>
    %143 = arith.mulf %141, %142 : vector<1x8xf32>
    %144 = vector.broadcast %143 : vector<1x8xf32> to vector<128x8xf32>
    %145 = arith.subf %137, %144 : vector<128x8xf32>
    %146 = arith.mulf %145, %145 : vector<128x8xf32>
    %cst_171 = arith.constant dense<0.000000e+00> : vector<8xf32>
    %147 = vector.multi_reduction <add>, %146, %cst_171 [0] : vector<128x8xf32> to vector<8xf32>
    %148 = vector.shape_cast %147 : vector<8xf32> to vector<1x8xf32>
    %cst_172 = arith.constant 7.812500e-03 : f32
    %149 = vector.broadcast %cst_172 : f32 to vector<1x8xf32>
    %150 = arith.mulf %148, %149 : vector<1x8xf32>
    %cst_173 = arith.constant 9.99999974E-6 : f32
    %151 = vector.broadcast %cst_173 : f32 to vector<1x8xf32>
    %152 = arith.addf %150, %151 : vector<1x8xf32>
    %153 = math.rsqrt %152 : vector<1x8xf32>
    %154 = arith.mulf %153, %138 : vector<1x8xf32>
    %155 = vector.broadcast %154 : vector<1x8xf32> to vector<128x8xf32>
    %156 = arith.mulf %145, %155 : vector<128x8xf32>
    %157 = vector.broadcast %139 : vector<1x8xf32> to vector<128x8xf32>
    %158 = arith.addf %156, %157 : vector<128x8xf32>
    %c0_174 = arith.constant 0 : index
    %c0_175 = arith.constant 0 : index
    %c0_176 = arith.constant 0 : index
    %c0_177 = arith.constant 0 : index
    %159 = vector.load %arg3[%c0_174, %c0_175, %c0_176, %c0_177] : memref<2x9x9x4xbf16, #tpu.memory_space<vmem>>, vector<2x8x8x4xbf16>
    %160 = vector.shape_cast %159 : vector<2x8x8x4xbf16> to vector<128x4xbf16>
    %c0_178 = arith.constant 0 : index
    %c0_179 = arith.constant 0 : index
    %161 = vector.load %arg10[%c0_178, %c0_179] : memref<4x8xbf16, #tpu.memory_space<vmem>>, vector<4x8xbf16>
    %cst_180 = arith.constant dense<0.000000e+00> : vector<128x8xf32>
    %162 = tpu.matmul %160, %161, %cst_180 {dimension_numbers = #tpu.dot_dimension_numbers<[1], [0], [0], [1], [0, 0, 1, 1], [], []>} : vector<128x4xbf16>, vector<4x8xbf16>, vector<128x8xf32> -> vector<128x8xf32>
    %c0_181 = arith.constant 0 : index
    %c0_182 = arith.constant 0 : index
    %163 = vector.load %arg11[%c0_181, %c0_182] : memref<1x8xf32, #tpu.memory_space<vmem>>, vector<1x8xf32>
    %c0_183 = arith.constant 0 : index
    %c0_184 = arith.constant 0 : index
    %164 = vector.load %arg12[%c0_183, %c0_184] : memref<1x8xf32, #tpu.memory_space<vmem>>, vector<1x8xf32>
    %cst_185 = arith.constant dense<0.000000e+00> : vector<8xf32>
    %165 = vector.multi_reduction <add>, %162, %cst_185 [0] : vector<128x8xf32> to vector<8xf32>
    %166 = vector.shape_cast %165 : vector<8xf32> to vector<1x8xf32>
    %cst_186 = arith.constant 7.812500e-03 : f32
    %167 = vector.broadcast %cst_186 : f32 to vector<1x8xf32>
    %168 = arith.mulf %166, %167 : vector<1x8xf32>
    %169 = vector.broadcast %168 : vector<1x8xf32> to vector<128x8xf32>
    %170 = arith.subf %162, %169 : vector<128x8xf32>
    %171 = arith.mulf %170, %170 : vector<128x8xf32>
    %cst_187 = arith.constant dense<0.000000e+00> : vector<8xf32>
    %172 = vector.multi_reduction <add>, %171, %cst_187 [0] : vector<128x8xf32> to vector<8xf32>
    %173 = vector.shape_cast %172 : vector<8xf32> to vector<1x8xf32>
    %cst_188 = arith.constant 7.812500e-03 : f32
    %174 = vector.broadcast %cst_188 : f32 to vector<1x8xf32>
    %175 = arith.mulf %173, %174 : vector<1x8xf32>
    %cst_189 = arith.constant 9.99999974E-6 : f32
    %176 = vector.broadcast %cst_189 : f32 to vector<1x8xf32>
    %177 = arith.addf %175, %176 : vector<1x8xf32>
    %178 = math.rsqrt %177 : vector<1x8xf32>
    %179 = arith.mulf %178, %163 : vector<1x8xf32>
    %180 = vector.broadcast %179 : vector<1x8xf32> to vector<128x8xf32>
    %181 = arith.mulf %170, %180 : vector<128x8xf32>
    %182 = vector.broadcast %164 : vector<1x8xf32> to vector<128x8xf32>
    %183 = arith.addf %181, %182 : vector<128x8xf32>
    %184 = arith.addf %158, %183 : vector<128x8xf32>
    %cst_190 = arith.constant 0.000000e+00 : f32
    %185 = vector.broadcast %cst_190 : f32 to vector<128x8xf32>
    %186 = arith.maximumf %184, %185 : vector<128x8xf32>
    %c0_191 = arith.constant 0 : index
    %c0_192 = arith.constant 0 : index
    %187 = vector.load %arg13[%c0_191, %c0_192] : memref<128x8xf32, #tpu.memory_space<vmem>>, vector<128x8xf32>
    tpu.vector_store %arg13[%c0_191, %c0_192], %186 {strides = array<i32>} : memref<128x8xf32, #tpu.memory_space<vmem>>, vector<128x8xf32>,
    return
  }
}

</mosaic_0001>

<bundles_post_ra>
// kernel: basic_block_forward.1
= control target key start
LH: loop header
LB: loop body
LE: loop exit
PB: predicated region body
PF: predicated region fallthrough
CT: control target
= control target key end

     0   :  { %vm146_vm0 = vcmask 1041408   ;;  %vm121_vm1 = vcmask 31744   ;;  %vm443_vm2 = vsmask.f32 3328  ;;  %vm444_vm3 = vsmask.f32 7440  ;;  %s10030_s0 = inlined_call_operand.vmem [shape: bf16[2,9,9,4], index: 0, kind: input, shape index: {}]   ;;  %s10031_s1 = inlined_call_operand.vmem [shape: bf16[2,9,9,4], index: 1, kind: input, shape index: {}]   ;;  %s10032_s2 = inlined_call_operand.vmem [shape: bf16[2,9,9,4], index: 2, kind: input, shape index: {}]   ;;  %s10033_s3 = inlined_call_operand.vmem [shape: bf16[2,9,9,4], index: 3, kind: input, shape index: {}]   ;;  %s10034_s4 = inlined_call_operand.vmem [shape: bf16[9,4,8], index: 4, kind: input, shape index: {}]   ;;  %s10035_s5 = inlined_call_operand.vmem [shape: f32[1,8], index: 5, kind: input, shape index: {}]   ;;  %s10036_s6 = inlined_call_operand.vmem [shape: f32[1,8], index: 6, kind: input, shape index: {}]   ;;  %s10037_s7 = inlined_call_operand.vmem [shape: bf16[9,8,8], index: 7, kind: input, shape index: {}]   ;;  %s10038_s8 = inlined_call_operand.vmem [shape: f32[1,8], index: 8, kind: input, shape index: {}]   ;;  %s10039_s9 = inlined_call_operand.vmem [shape: f32[1,8], index: 9, kind: input, shape index: {}]   ;;  %s10040_s10 = inlined_call_operand.vmem [shape: bf16[4,8], index: 10, kind: input, shape index: {}]   ;;  %s10041_s11 = inlined_call_operand.vmem [shape: f32[1,8], index: 11, kind: input, shape index: {}]   ;;  %s10042_s12 = inlined_call_operand.vmem [shape: f32[1,8], index: 12, kind: input, shape index: {}]   ;;  %s10043_s13 = inlined_call_operand.hbm [shape: f32[128,8], index: 13, kind: output, shape index: {}]  }
   0x1   :  { %v6310_v0 = vld [vmem:[%s10034_s4 + $0x2] sm:$0x3]  ;;  %v7573_v3 = vld [vmem:[%s10031_s1 + $0x10] ss:$8 sps:$4 sm:$0xff]   ;;  %v62_v4 = vld [vmem:[%s10034_s4] sm:$0x3] }
   0x2   :  { %7548 = vmatprep.subr.msk.bf16.mxu0 %vm146_vm0, %v6310_v0  ;;  %v148_v1 = vsel %vm146_vm0, %v6310_v0, 0  ;;  %v7572_v2 = vld [vmem:[%s10031_s1] ss:$8 sps:$4 sm:$0xff]   ;;  %7549 = vmatprep.subr.msk.bf16.mxu1 %vm146_vm0, %v6310_v0  ;;  %v312_v5 = vsel %vm146_vm0, %v62_v4, 0  ;;  %v6343_v7 = vld [vmem:[%s10034_s4 + $0x4] sm:$0x3]  ;;  %vm7849_vm4 = vmor %vm443_vm2, %vm444_vm3 }
   0x3   :  { %6949 = vmatpush3.bf16.msra.mxu0 %v148_v1  ;;  %7291 = vmatpush3.bf16.msra.mxu1 %v148_v1  ;;  %v7574_v6 = vld [vmem:[%s10031_s1 + $0x20] ss:$8 sps:$4 sm:$0xff]   ;;  %v7575_v8 = vld [vmem:[%s10031_s1 + $0x30] ss:$8 sps:$4 sm:$0xff]   ;;  %v721_v16 = vsel %vm146_vm0, %v6343_v7, 0 }
   0x4   :  { %6950 = vmatprep.mubr.msk.bf16.mxu0 %vm121_vm1, %v7572_v2  ;;  %7550 = vmatprep.subr.msk.bf16.mxu0 %vm146_vm0, %v62_v4  ;;  %v7576_v9 = vld [vmem:[%s10030_s0] ss:$8 sps:$4 sm:$0xff]   ;;  %v7577_v11 = vld [vmem:[%s10030_s0 + $0x10] ss:$8 sps:$4 sm:$0xff]   ;;  %v6360_v21 = vld [vmem:[%s10034_s4 + $0x6] sm:$0x3] }
   0x5   :  { %v411_v10 = vld [vmem:[%s10030_s0] sm:$0xf]  ;;  %v413_v12 = vld [vmem:[%s10030_s0 + $0x8] sm:$0xf]  ;;  %v415_v17 = vld [vmem:[%s10030_s0 + $0x10] sm:$0xf] }
   0x6   :  { %6951 = vmatmul.mubr.msk.bf16.vlgmr.msra.gmra.mrb[0].mxu0 %vm121_vm1, %v7573_v3  ;;  %v7578_v13 = vld [vmem:[%s10030_s0 + $0x20] ss:$8 sps:$4 sm:$0xff]   ;;  %v447_v14 = vshrl.u32 %v411_v10, 16  ;;  %v450_v15 = vshll.u32 %v411_v10, 16  ;;  %v461_v18 = vshrl.u32 %v413_v12, 16  ;;  %v464_v19 = vshll.u32 %v413_v12, 16 }
   0x7   :  { %6967 = vmatpush3.bf16.msra.mxu0 %v312_v5  ;;  %6954 = vmatprep.mubr.msk.bf16.mxu0 %vm121_vm1, %v7574_v6  ;;  %v417_v20 = vld [vmem:[%s10030_s0 + $0x18] sm:$0xf]  ;;  %v412_v22 = vld [vmem:[%s10030_s0 + $0x4] sm:$0x1]  ;;  %v475_v25 = vshrl.u32 %v415_v17, 16  ;;  %v478_v26 = vshll.u32 %v415_v17, 16 }
   0x8   :  { %7551 = vmatprep.subr.msk.bf16.mxu0 %vm146_vm0, %v6343_v7  ;;  %v449_v23 = vrot.slane %v447_v14, 4  ;;  %v452_v24 = vrot.slane %v450_v15, 5  ;;  %v414_v27 = vld [vmem:[%s10030_s0 + $0xc] sm:$0x1]  ;;  %v489_v28 = vshrl.u32 %v417_v20, 16  ;;  %v492_v29 = vshll.u32 %v417_v20, 16 }
   0x9   :  { %v7579_v30 = vld [vmem:[%s10030_s0 + $0x30] ss:$8 sps:$4 sm:$0xff]   ;;  %v463_v31 = vrot.slane %v461_v18, 4  ;;  %v466_v32 = vrot.slane %v464_v19, 5  ;;  %v419_v33 = vld [vmem:[%s10030_s0 + $0x20] sm:$0xf] }
   0xa   :  { %v7580_v34 = vld [vmem:[%s10030_s0 + $0x48] ss:$8 sps:$4 sm:$0xff]   ;;  %v456_v35 = vshll.u32 %v412_v22, 16  ;;  %v416_v36 = vld [vmem:[%s10030_s0 + $0x14] sm:$0x1]  ;;  %v453_v37 = vor.u32 %v452_v24, %v449_v23  ;;  %v470_v38 = vshll.u32 %v414_v27, 16 }
   0xb   :  { %v477_v39 = vrot.slane %v475_v25, 4  ;;  %v480_v40 = vrot.slane %v478_v26, 5  ;;  %v421_v41 = vld [vmem:[%s10030_s0 + $0x28] sm:$0xf]  ;;  %v418_v42 = vld [vmem:[%s10030_s0 + $0x1c] sm:$0x1]  ;;  %v467_v47 = vor.u32 %v466_v32, %v463_v31 }
   0xc   :  { %v491_v43 = vrot.slane %v489_v28, 4  ;;  %v494_v44 = vrot.slane %v492_v29, 5  ;;  %v503_v45 = vshrl.u32 %v419_v33, 16  ;;  %v506_v46 = vshll.u32 %v419_v33, 16  ;;  %v420_v49 = vld [vmem:[%s10030_s0 + $0x24] sm:$0x1] }
   0xd   :  { %v484_v48 = vshll.u32 %v416_v36, 16  ;;  %v517_v50 = vshrl.u32 %v421_v41, 16  ;;  %v520_v51 = vshll.u32 %v421_v41, 16  ;;  %v454_v52 = vrot.slane %v453_v37, 4  ;;  %v7581_v56 = vld [vmem:[%s10030_s0 + $0x58] ss:$8 sps:$4 sm:$0xff]  }
   0xe   :  { %6955 = vmatmul.mubr.msk.bf16.gmra.mrb[4].mxu0 %vm121_vm1, %v7575_v8  ;;  %v458_v53 = vrot.slane %v456_v35, 5  ;;  %v472_v54 = vrot.slane %v470_v38, 5  ;;  %v498_v55 = vshll.u32 %v418_v42, 16  ;;  %v481_v58 = vor.u32 %v480_v40, %v477_v39  ;;  %v423_v62 = vld [vmem:[%s10030_s0 + $0x30] sm:$0xf] }
   0xf   :  { %6968 = vmatprep.mubr.msk.bf16.mxu0 %vm121_vm1, %v7576_v9  ;;  %v495_v59 = vor.u32 %v494_v44, %v491_v43  ;;  %v505_v60 = vrot.slane %v503_v45, 4  ;;  %v508_v61 = vrot.slane %v506_v46, 5  ;;  %v7582_v63 = vld [vmem:[%s10030_s0 + $0x68] ss:$8 sps:$4 sm:$0xff]   ;;  %v468_v0 = vrot.slane %v467_v47, 4 }
  0x10   :  { %v486_v1 = vrot.slane %v484_v48, 5  ;;  %v7860_v2 = vsel %vm146_vm0, %v6360_v21, 0  ;;  %v422_v3 = vld [vmem:[%s10030_s0 + $0x2c] sm:$0x1]  ;;  %v512_v4 = vshll.u32 %v420_v49, 16  ;;  %v519_v5 = vrot.slane %v517_v50, 4 }
  0x11   :  { %v522_v6 = vrot.slane %v520_v51, 5  ;;  %v425_v7 = vld [vmem:[%s10030_s0 + $0x38] sm:$0xf]  ;;  %v427_v8 = vld [vmem:[%s10030_s0 + $0x48] sm:$0xf]  ;;  %v459_v9 = vsel %vm7849_vm4, %v454_v52, %v458_v53  ;;  %v500_v10 = vrot.slane %v498_v55, 5  ;;  %v473_v23 = vsel %vm7849_vm4, %v468_v0, %v472_v54 }
  0x12   :  { %v531_v12 = vshrl.u32 %v423_v62, 16  ;;  %v482_v14 = vrot.slane %v481_v58, 4  ;;  %v496_v15 = vrot.slane %v495_v59, 4  ;;  %v526_v17 = vshll.u32 %v422_v3, 16  ;;  %v429_v18 = vld [vmem:[%s10030_s0 + $0x50] sm:$0xf] }
  0x13   :  { %v545_v19 = vshrl.u32 %v425_v7, 16  ;;  %v548_v20 = vshll.u32 %v425_v7, 16  ;;  %v562_v22 = vshll.u32 %v427_v8, 16  ;;  %v7882_v24 = vrot.slane %v512_v4, 5  ;;  %v426_v27 = vld [vmem:[%s10030_s0 + $0x3c] sm:$0x1] }
  0x14   :  { %v523_v25 = vor.u32 %v522_v6, %v519_v5  ;;  %v533_v28 = vrot.slane %v531_v12, 4  ;;  %v576_v31 = vshll.u32 %v429_v18, 16  ;;  %v7583_v32 = vld [vmem:[%s10030_s0 + $0x78] ss:$8 sps:$4 sm:$0xff]   ;;  %v487_v33 = vsel %vm7849_vm4, %v482_v14, %v486_v1  ;;  %v428_v37 = vld [vmem:[%s10030_s0 + $0x4c] sm:$0x1] }
  0x15   :  { %v528_v36 = vrot.slane %v526_v17, 5  ;;  %v430_v38 = vld [vmem:[%s10030_s0 + $0x54] sm:$0x1]  ;;  %v547_v39 = vrot.slane %v545_v19, 4  ;;  %v550_v40 = vrot.slane %v548_v20, 5  ;;  %v564_v42 = vrot.slane %v562_v22, 5 }
  0x16   :  { %6969 = vmatmul.mubr.msk.bf16.vlgmr.msra.gmra.mrb[0].mxu0 %vm121_vm1, %v7577_v11  ;;  %v424_v11 = vld [vmem:[%s10030_s0 + $0x34] sm:$0x1]  ;;  %v431_v43 = vld [vmem:[%s10030_s0 + $0x58] sm:$0xf]  ;;  %v6344_v44 = vcombine.low %v459_v9, %v473_v23  ;;  %v524_v45 = vrot.slane %v523_v25, 4  ;;  %v554_v46 = vshll.u32 %v426_v27, 16 }
  0x17   :  { %6985 = vmatpush3.bf16.msra.mxu0 %v721_v16  ;;  %6972 = vmatprep.mubr.msk.bf16.mxu0 %vm121_vm1, %v7578_v13  ;;  %v534_v13 = vshll.u32 %v423_v62, 16  ;;  %v509_v16 = vor.u32 %v508_v61, %v505_v60  ;;  %v540_v26 = vshll.u32 %v424_v11, 16  ;;  %v578_v50 = vrot.slane %v576_v31, 5  ;;  %v433_v51 = vld [vmem:[%s10030_s0 + $0x60] sm:$0xf] }
  0x18   :  { %7552 = vmatprep.subr.msk.bf16.mxu0 %vm146_vm0, %v6360_v21  ;;  %v559_v21 = vshrl.u32 %v427_v8, 16  ;;  %v435_v52 = vld [vmem:[%s10030_s0 + $0x68] sm:$0xf]  ;;  %v587_v55 = vshrl.u32 %v431_v43, 16  ;;  %v551_v58 = vor.u32 %v550_v40, %v547_v39  ;;  %v568_v60 = vshll.u32 %v428_v37, 16 }
  0x19   :  { %v536_v29 = vrot.slane %v534_v13, 5  ;;  %v510_v35 = vrot.slane %v509_v16, 4  ;;  %v7913_v54 = vrot.slane %v540_v26, 5  ;;  %v582_v61 = vshll.u32 %v430_v38, 16  ;;  %v437_v62 = vld [vmem:[%s10030_s0 + $0x70] sm:$0xf] }
  0x1a   :  { %v561_v41 = vrot.slane %v559_v21, 4  ;;  %v604_v0 = vshll.u32 %v433_v51, 16  ;;  %v615_v1 = vshrl.u32 %v435_v52, 16  ;;  %v618_v3 = vshll.u32 %v435_v52, 16  ;;  %v432_v8 = vld [vmem:[%s10030_s0 + $0x5c] sm:$0x1] }
  0x1b   :  { %v537_v48 = vor.u32 %v536_v29, %v533_v28  ;;  %v515_v53 = vsel %vm7849_vm4, %v510_v35, %v7882_v24  ;;  %v529_v4 = vsel %vm7849_vm4, %v524_v45, %v528_v36  ;;  %v556_v6 = vrot.slane %v554_v46, 5  ;;  %v434_v9 = vld [vmem:[%s10030_s0 + $0x64] sm:$0x1]  ;;  %v436_v12 = vld [vmem:[%s10030_s0 + $0x6c] sm:$0x1] }
  0x1c   :  { %v565_v59 = vor.u32 %v564_v42, %v561_v41  ;;  %v629_v13 = vshrl.u32 %v437_v62, 16  ;;  %v632_v14 = vshll.u32 %v437_v62, 16  ;;  %v570_v17 = vrot.slane %v568_v60, 5  ;;  %v439_v19 = vld [vmem:[%s10030_s0 + $0x78] sm:$0xf] }
  0x1d   :  { %v538_v5 = vrot.slane %v537_v48, 4  ;;  %v606_v21 = vrot.slane %v604_v0, 5  ;;  %v617_v22 = vrot.slane %v615_v1, 4  ;;  %v620_v23 = vrot.slane %v618_v3, 5  ;;  %v441_v27 = vld [vmem:[%s10030_s0 + $0x80] sm:$0xf] }
  0x1e   :  { %6973 = vmatmul.mubr.msk.bf16.gmra.mrb[4].mxu0 %vm121_vm1, %v7579_v30  ;;  %v573_v30 = vshrl.u32 %v429_v18, 16  ;;  %v566_v16 = vrot.slane %v565_v59, 4  ;;  %v584_v18 = vrot.slane %v582_v61, 5  ;;  %v6346_v24 = vcombine.low %v515_v53, %v529_v4  ;;  %v6377_v36 = vld [vmem:[%s10034_s4 + $0x8] sm:$0x3] }
  0x1f   :  { %6976 = vmatprep.mubr.msk.bf16.mxu0 %vm121_vm1, %v7580_v34  ;;  %v501_v34 = vsel %vm7849_vm4, %v496_v15, %v500_v10  ;;  %v589_v10 = vrot.slane %v587_v55, 4  ;;  %v552_v15 = vrot.slane %v551_v58, 4  ;;  %v596_v26 = vshll.u32 %v432_v8, 16 }
  0x20   :  { %v6345_v47 = vcombine.low %v487_v33, %v501_v34  ;;  %v575_v49 = vrot.slane %v573_v30, 4  ;;  %v631_v29 = vrot.slane %v629_v13, 4  ;;  %v634_v30 = vrot.slane %v632_v14, 5  ;;  %v438_v34 = vld [vmem:[%s10030_s0 + $0x74] sm:$0x1] }
  0x21   :  { %v543_v31 = vsel %vm7849_vm4, %v538_v5, %v7913_v54  ;;  %v610_v33 = vshll.u32 %v434_v9, 16  ;;  %v624_v35 = vshll.u32 %v436_v12, 16  ;;  %v621_v38 = vor.u32 %v620_v23, %v617_v22  ;;  %v442_v54 = vld [vmem:[%s10030_s0 + $0x84] sm:$0x1]  ;;  %v7587_v22 = vld [vmem:[%s10032_s2 + $0x30] ss:$8 sps:$4 sm:$0xff]  }
  0x22   :  { %v579_v7 = vor.u32 %v578_v50, %v575_v49  ;;  %v643_v39 = vshrl.u32 %v439_v19, 16  ;;  %v646_v40 = vshll.u32 %v439_v19, 16  ;;  %v571_v41 = vsel %vm7849_vm4, %v566_v16, %v570_v17  ;;  %v7584_v17 = vld [vmem:[%s10032_s2] ss:$8 sps:$4 sm:$0xff]  }
  0x23   :  { %v598_v42 = vrot.slane %v596_v26, 5  ;;  %v635_v48 = vor.u32 %v634_v30, %v631_v29  ;;  %v612_v50 = vrot.slane %v610_v33, 5  ;;  %v622_v53 = vrot.slane %v621_v38, 4  ;;  %v7586_v19 = vld [vmem:[%s10032_s2 + $0x20] ss:$8 sps:$4 sm:$0xff]  }
  0x24   :  { %v580_v25 = vrot.slane %v579_v7, 4  ;;  %v645_v55 = vrot.slane %v643_v39, 4  ;;  %v666_v5 = vshll.u32 %v442_v54, 16  ;;  %v7588_v23 = vld [vmem:[%s10032_s2 + $0x48] ss:$8 sps:$4 sm:$0xff]  }
  0x25   :  { %v636_v61 = vrot.slane %v635_v48, 4  ;;  %v7591_v26 = vld [vmem:[%s10032_s2 + $0x78] ss:$8 sps:$4 sm:$0xff]   ;;  %v1234_v29 = vld [vmem:[%s10032_s2 + $0x8] sm:$0xf] }
  0x26   :  { %6977 = vmatmul.mubr.msk.bf16.gmra.mrb[8].mxu0 %vm121_vm1, %v7581_v56  ;;  %v590_v56 = vshll.u32 %v431_v43, 16  ;;  %v657_v43 = vshrl.u32 %v441_v27, 16  ;;  %v585_v45 = vsel %vm7849_vm4, %v580_v25, %v584_v18  ;;  %v668_v13 = vrot.slane %v666_v5, 5  ;;  %v7585_v18 = vld [vmem:[%s10032_s2 + $0x10] ss:$8 sps:$4 sm:$0xff]  }
  0x27   :  { %6980 = vmatprep.mubr.msk.bf16.mxu0 %vm121_vm1, %v7582_v63  ;;  %v601_v63 = vshrl.u32 %v433_v51, 16  ;;  %v626_v51 = vrot.slane %v624_v35, 5  ;;  %v6348_v58 = vcombine.low %v571_v41, %v585_v45  ;;  %v7590_v25 = vld [vmem:[%s10032_s2 + $0x68] ss:$8 sps:$4 sm:$0xff]   ;;  %v1233_v38 = vld [vmem:[%s10032_s2 + $0x4] sm:$0x1] }
  0x28   :  { %v592_v11 = vrot.slane %v590_v56, 5  ;;  %v648_v56 = vrot.slane %v646_v40, 5  ;;  %v659_v59 = vrot.slane %v657_v43, 4  ;;  %v7593_v33 = vld [vmem:[%s10033_s3 + $0x10] ss:$8 sps:$4 sm:$0xff]  }
  0x29   :  { %v603_v20 = vrot.slane %v601_v63, 4  ;;  %v7594_v35 = vld [vmem:[%s10033_s3 + $0x20] ss:$8 sps:$4 sm:$0xff]   ;;  %v1235_v39 = vld [vmem:[%s10032_s2 + $0xc] sm:$0x1] }
  0x2a   :  { %v593_v28 = vor.u32 %v592_v11, %v589_v10  ;;  %v649_v3 = vor.u32 %v648_v56, %v645_v55  ;;  %v1238_v40 = vld [vmem:[%s10032_s2 + $0x18] sm:$0xf]  ;;  %v6427_v48 = vld [vmem:[%s10034_s4 + $0xc] sm:$0x3] }
  0x2b   :  { %v607_v37 = vor.u32 %v606_v21, %v603_v20  ;;  %v1117_v20 = vsel %vm146_vm0, %v6377_v36, 0  ;;  %v6394_v21 = vld [vmem:[%s10034_s4 + $0xa] sm:$0x3] }
  0x2c   :  { %v594_v46 = vrot.slane %v593_v28, 4  ;;  %v650_v11 = vrot.slane %v649_v3, 4  ;;  %v1232_v28 = vld [vmem:[%s10032_s2] sm:$0xf]  ;;  %v1539_v30 = vsel %vm146_vm0, %v6394_v21, 0 }
  0x2d   :  { %v608_v52 = vrot.slane %v607_v37, 4  ;;  %v1282_v37 = vshll.u32 %v1234_v29, 16 }
  0x2e   :  { %6981 = vmatmul.mubr.msk.bf16.gmra.mrb[12].mxu0 %vm121_vm1, %v7583_v32  ;;  %v557_v32 = vsel %vm7849_vm4, %v552_v15, %v556_v6  ;;  %v599_v63 = vsel %vm7849_vm4, %v594_v46, %v598_v42  ;;  %v627_v6 = vsel %vm7849_vm4, %v622_v53, %v626_v51  ;;  %v1288_v51 = vshll.u32 %v1235_v39, 16  ;;  %v1250_v39 = vld [vmem:[%s10032_s2 + $0x50] sm:$0xf] }
  0x2f   :  { %6986 = vmatprep.mubr.msk.bf16.mxu0 %vm121_vm1, %v6344_v44  ;;  %v660_v44 = vshll.u32 %v441_v27, 16  ;;  %v6347_v49 = vcombine.low %v543_v31, %v557_v32  ;;  %v613_v1 = vsel %vm7849_vm4, %v608_v52, %v612_v50  ;;  %v7592_v27 = vld [vmem:[%s10033_s3] ss:$8 sps:$4 sm:$0xff]   ;;  %v1265_v31 = vshrl.u32 %v1232_v28, 16  ;;  %v1239_v52 = vld [vmem:[%s10032_s2 + $0x1c] sm:$0x1] }
  0x30   :  { %v6349_v8 = vcombine.low %v599_v63, %v613_v1  ;;  %v1268_v32 = vshll.u32 %v1232_v28, 16  ;;  %v1284_v46 = vrot.slane %v1282_v37, 5  ;;  %v1274_v50 = vshll.u32 %v1233_v38, 16  ;;  %v7596_v63 = vld [vmem:[%s10033_s3 + $0x48] ss:$8 sps:$4 sm:$0xff]  }
  0x31   :  { %v662_v60 = vrot.slane %v660_v44, 5  ;;  %v1267_v43 = vrot.slane %v1265_v31, 4  ;;  %v1316_v3 = vshll.u32 %v1239_v52, 16  ;;  %v7599_v52 = vld [vmem:[%s10033_s3 + $0x78] ss:$8 sps:$4 sm:$0xff]  }
  0x32   :  { %v1270_v44 = vrot.slane %v1268_v32, 5  ;;  %v7616_v32 = vld [vmem:[%s10031_s1 + $0x48] ss:$8 sps:$4 sm:$0xff]  }
  0x33   :  { %v663_v4 = vor.u32 %v662_v60, %v659_v59  ;;  %v7595_v59 = vld [vmem:[%s10033_s3 + $0x30] ss:$8 sps:$4 sm:$0xff]   ;;  %6958 = vmatprep.mubr.msk.bf16.mxu1 %vm121_vm1, %v7616_v32 }
  0x34   :  { %v1271_v55 = vor.u32 %v1270_v44, %v1267_v43  ;;  %v7617_v44 = vld [vmem:[%s10031_s1 + $0x58] ss:$8 sps:$4 sm:$0xff]  }
  0x35   :  { %v664_v12 = vrot.slane %v663_v4, 4  ;;  %v1290_v4 = vrot.slane %v1288_v51, 5  ;;  %v1391_v51 = vshrl.u32 %v1250_v39, 16  ;;  %6959 = vmatmul.mubr.msk.bf16.vlgmr.msra.gmra.mrb[0].mxu1 %vm121_vm1, %v7617_v44  ;;  %v1259_v44 = vld [vmem:[%s10032_s2 + $0x74] sm:$0x1] }
  0x36   :  { %6987 = vmatmul.mubr.msk.bf16.vlgmr.msra.gmra.mrb[0].mxu0 %vm121_vm1, %v6345_v47  ;;  %v638_v47 = vshll.u32 %v438_v34, 16  ;;  %v1236_v34 = vld [vmem:[%s10032_s2 + $0x10] sm:$0xf] }
  0x37   :  { %7003 = vmatpush3.bf16.msra.mxu0 %v7860_v2  ;;  %6990 = vmatprep.mubr.msk.bf16.mxu0 %vm121_vm1, %v6346_v24  ;;  %v440_v2 = vld [vmem:[%s10030_s0 + $0x7c] sm:$0x1]  ;;  %v669_v15 = vsel %vm7849_vm4, %v664_v12, %v668_v13  ;;  %v7589_v24 = vld [vmem:[%s10032_s2 + $0x58] ss:$8 sps:$4 sm:$0xff]   ;;  %v1293_v41 = vshrl.u32 %v1236_v34, 16  ;;  %v1296_v42 = vshll.u32 %v1236_v34, 16 }
  0x38   :  { %7553 = vmatprep.subr.msk.bf16.mxu0 %vm146_vm0, %v6377_v36  ;;  %v640_v62 = vrot.slane %v638_v47, 5  ;;  %v652_v0 = vshll.u32 %v440_v2, 16  ;;  %v1279_v36 = vshrl.u32 %v1234_v29, 16  ;;  %v1307_v47 = vshrl.u32 %v1238_v40, 16  ;;  %v1237_v2 = vld [vmem:[%s10032_s2 + $0x14] sm:$0x1] }
  0x39   :  { %v1295_v53 = vrot.slane %v1293_v41, 4  ;;  %v1298_v54 = vrot.slane %v1296_v42, 5  ;;  %v1302_v1 = vshll.u32 %v1237_v2, 16  ;;  %v1241_v13 = vld [vmem:[%s10032_s2 + $0x24] sm:$0x1]  ;;  %v1394_v2 = vshll.u32 %v1250_v39, 16 }
  0x3a   :  { %v641_v7 = vsel %vm7849_vm4, %v636_v61, %v640_v62  ;;  %v654_v9 = vrot.slane %v652_v0, 5  ;;  %v1281_v45 = vrot.slane %v1279_v36, 4  ;;  %v1309_v60 = vrot.slane %v1307_v47, 4  ;;  %v1242_v62 = vld [vmem:[%s10032_s2 + $0x28] sm:$0xf] }
  0x3b   :  { %v6350_v10 = vcombine.low %v627_v6, %v641_v7  ;;  %v1276_v0 = vrot.slane %v1274_v50, 5  ;;  %v1299_v5 = vor.u32 %v1298_v54, %v1295_v53  ;;  %v1246_v29 = vld [vmem:[%s10032_s2 + $0x38] sm:$0xf]  ;;  %v1330_v31 = vshll.u32 %v1241_v13, 16  ;;  %v1248_v34 = vld [vmem:[%s10032_s2 + $0x48] sm:$0xf] }
  0x3c   :  { %v655_v14 = vsel %vm7849_vm4, %v650_v11, %v654_v9  ;;  %v1285_v56 = vor.u32 %v1284_v46, %v1281_v45  ;;  %v1338_v11 = vshll.u32 %v1242_v62, 16  ;;  %v1363_v43 = vshrl.u32 %v1246_v29, 16  ;;  %v1258_v13 = vld [vmem:[%s10032_s2 + $0x70] sm:$0xf]  ;;  %v1257_v39 = vld [vmem:[%s10032_s2 + $0x6c] sm:$0x1] }
  0x3d   :  { %v6351_v16 = vcombine.low %v655_v14, %v669_v15  ;;  %v8074_v14 = vrot.slane %v1302_v1, 5  ;;  %v8076_v15 = vrot.slane %v1316_v3, 5  ;;  %v1366_v45 = vshll.u32 %v1246_v29, 16  ;;  %v1251_v3 = vld [vmem:[%s10032_s2 + $0x54] sm:$0x1] }
  0x3e   :  { %6991 = vmatmul.mubr.msk.bf16.gmra.mrb[4].mxu0 %vm121_vm1, %v6347_v49  ;;  %v1310_v49 = vshll.u32 %v1238_v40, 16  ;;  %v1286_v9 = vrot.slane %v1285_v56, 4  ;;  %v1340_v28 = vrot.slane %v1338_v11, 5  ;;  %v1380_v47 = vshll.u32 %v1248_v34, 16  ;;  %v7619_v29 = vld [vmem:[%s10031_s1 + $0x78] ss:$8 sps:$4 sm:$0xff]  }
  0x3f   :  { %6994 = vmatprep.mubr.msk.bf16.mxu0 %vm121_vm1, %v6348_v58  ;;  %v1240_v58 = vld [vmem:[%s10032_s2 + $0x20] sm:$0xf]  ;;  %v1332_v50 = vrot.slane %v1330_v31, 5 }
  0x40   :  { %v1312_v61 = vrot.slane %v1310_v49, 5  ;;  %v1321_v6 = vshrl.u32 %v1240_v58, 16  ;;  %v1324_v7 = vshll.u32 %v1240_v58, 16  ;;  %v1252_v58 = vld [vmem:[%s10032_s2 + $0x58] sm:$0xf] }
  0x42   :  { %v1313_v12 = vor.u32 %v1312_v61, %v1309_v60 }
  0x46   :  { %6995 = vmatmul.mubr.msk.bf16.gmra.mrb[8].mxu0 %vm121_vm1, %v6349_v8  ;;  %v1272_v8 = vrot.slane %v1271_v55, 4 }
  0x47   :  { %6998 = vmatprep.mubr.msk.bf16.mxu0 %vm121_vm1, %v6350_v10  ;;  %v1335_v10 = vshrl.u32 %v1242_v62, 16  ;;  %v1365_v62 = vrot.slane %v1363_v43, 4 }
  0x4e   :  { %6999 = vmatmul.mubr.msk.bf16.gmra.mrb[12].mxu0 %vm121_vm1, %v6351_v16  ;;  %v1243_v16 = vld [vmem:[%s10032_s2 + $0x2c] sm:$0x1] }
  0x4f   :  { %7004 = vmatprep.mubr.msk.bf16.mxu0 %vm121_vm1, %v7584_v17  ;;  %v1244_v17 = vld [vmem:[%s10032_s2 + $0x30] sm:$0xf]  ;;  %v1344_v37 = vshll.u32 %v1243_v16, 16 }
  0x50   :  { %v1349_v38 = vshrl.u32 %v1244_v17, 16  ;;  %v1352_v41 = vshll.u32 %v1244_v17, 16 }
  0x51   :  { %v1346_v55 = vrot.slane %v1344_v37, 5 }
  0x52   :  { %v1351_v56 = vrot.slane %v1349_v38, 4  ;;  %v1354_v60 = vrot.slane %v1352_v41, 5 }
  0x56   :  { %7005 = vmatmul.mubr.msk.bf16.vlgmr.msra.gmra.mrb[0].mxu0 %vm121_vm1, %v7585_v18  ;;  %v7597_v18 = vld [vmem:[%s10033_s3 + $0x58] ss:$8 sps:$4 sm:$0xff]  }
  0x57   :  { %7021 = vmatpush3.bf16.msra.mxu0 %v1117_v20  ;;  %7008 = vmatprep.mubr.msk.bf16.mxu0 %vm121_vm1, %v7586_v19  ;;  %v1300_v19 = vrot.slane %v1299_v5, 4  ;;  %v8088_v20 = vsel %vm146_vm0, %v6427_v48, 0  ;;  %v1382_v5 = vrot.slane %v1380_v47, 5 }
  0x58   :  { %7554 = vmatprep.subr.msk.bf16.mxu0 %vm146_vm0, %v6394_v21  ;;  %v1323_v21 = vrot.slane %v1321_v6, 4  ;;  %v1254_v6 = vld [vmem:[%s10032_s2 + $0x60] sm:$0xf] }
  0x59   :  { %v1305_v49 = vsel %vm7849_vm4, %v1300_v19, %v8074_v14  ;;  %v1419_v16 = vshrl.u32 %v1254_v6, 16  ;;  %v1422_v17 = vshll.u32 %v1254_v6, 16 }
  0x5b   :  { %v1421_v37 = vrot.slane %v1419_v16, 4  ;;  %v1424_v38 = vrot.slane %v1422_v17, 5 }
  0x5e   :  { %7009 = vmatmul.mubr.msk.bf16.gmra.mrb[4].mxu0 %vm121_vm1, %v7587_v22  ;;  %v1326_v22 = vrot.slane %v1324_v7, 5  ;;  %v1393_v7 = vrot.slane %v1391_v51, 4 }
  0x5f   :  { %7012 = vmatprep.mubr.msk.bf16.mxu0 %vm121_vm1, %v7588_v23  ;;  %v1245_v23 = vld [vmem:[%s10032_s2 + $0x34] sm:$0x1] }
  0x60   :  { %v1327_v36 = vor.u32 %v1326_v22, %v1323_v21  ;;  %v1358_v42 = vshll.u32 %v1245_v23, 16 }
  0x62   :  { %v1328_v54 = vrot.slane %v1327_v36, 4  ;;  %v8134_v61 = vrot.slane %v1358_v42, 5 }
  0x64   :  { %v1333_v14 = vsel %vm7849_vm4, %v1328_v54, %v1332_v50 }
  0x66   :  { %7013 = vmatmul.mubr.msk.bf16.gmra.mrb[8].mxu0 %vm121_vm1, %v7589_v24  ;;  %v7598_v24 = vld [vmem:[%s10033_s3 + $0x68] ss:$8 sps:$4 sm:$0xff]  }
  0x67   :  { %7016 = vmatprep.mubr.msk.bf16.mxu0 %vm121_vm1, %v7590_v25  ;;  %v1277_v25 = vsel %vm7849_vm4, %v1272_v8, %v1276_v0  ;;  %v1368_v0 = vrot.slane %v1366_v45, 5  ;;  %v1396_v8 = vrot.slane %v1394_v2, 5 }
  0x69   :  { %v1369_v21 = vor.u32 %v1368_v0, %v1365_v62 }
  0x6e   :  { %7017 = vmatmul.mubr.msk.bf16.gmra.mrb[12].mxu0 %vm121_vm1, %v7591_v26  ;;  %v1291_v26 = vsel %vm7849_vm4, %v1286_v9, %v1290_v4  ;;  %v1405_v9 = vshrl.u32 %v1252_v58, 16 }
  0x6f   :  { %7022 = vmatprep.mubr.msk.bf16.mxu0 %vm121_vm1, %v7592_v27  ;;  %v1337_v27 = vrot.slane %v1335_v10, 4  ;;  %v1408_v10 = vshll.u32 %v1252_v58, 16  ;;  %v1456_v58 = vshll.u32 %v1259_v44, 16 }
  0x71   :  { %v1341_v40 = vor.u32 %v1340_v28, %v1337_v27  ;;  %v1407_v27 = vrot.slane %v1405_v9, 4  ;;  %v1410_v28 = vrot.slane %v1408_v10, 5 }
  0x76   :  { %7023 = vmatmul.mubr.msk.bf16.vlgmr.msra.gmra.mrb[0].mxu0 %vm121_vm1, %v7593_v33  ;;  %v1247_v33 = vld [vmem:[%s10032_s2 + $0x3c] sm:$0x1] }
  0x77   :  { %7039 = vmatpush3.bf16.msra.mxu0 %v1539_v30  ;;  %7026 = vmatprep.mubr.msk.bf16.mxu0 %vm121_vm1, %v7594_v35  ;;  %v1314_v30 = vrot.slane %v1313_v12, 4  ;;  %v6395_v35 = vcombine.low %v1277_v25, %v1291_v26  ;;  %v1372_v46 = vshll.u32 %v1247_v33, 16  ;;  %v1256_v12 = vld [vmem:[%s10032_s2 + $0x68] sm:$0xf]  ;;  %v1397_v25 = vor.u32 %v1396_v8, %v1393_v7 }
  0x78   :  { %7555 = vmatprep.subr.msk.bf16.mxu0 %vm146_vm0, %v6427_v48  ;;  %v1377_v48 = vshrl.u32 %v1248_v34, 16  ;;  %v1400_v26 = vshll.u32 %v1251_v3, 16  ;;  %v1433_v31 = vshrl.u32 %v1256_v12, 16  ;;  %v1436_v32 = vshll.u32 %v1256_v12, 16 }
  0x79   :  { %v1319_v53 = vsel %vm7849_vm4, %v1314_v30, %v8076_v15  ;;  %v8139_v1 = vrot.slane %v1372_v46, 5  ;;  %v1355_v15 = vor.u32 %v1354_v60, %v1351_v56  ;;  %v1255_v30 = vld [vmem:[%s10032_s2 + $0x64] sm:$0x1]  ;;  %v1447_v33 = vshrl.u32 %v1258_v13, 16 }
  0x7a   :  { %v1379_v4 = vrot.slane %v1377_v48, 4  ;;  %v6396_v11 = vcombine.low %v1305_v49, %v1319_v53  ;;  %v1450_v34 = vshll.u32 %v1258_v13, 16  ;;  %v1398_v45 = vrot.slane %v1397_v25, 4  ;;  %v1260_v49 = vld [vmem:[%s10032_s2 + $0x78] sm:$0xf] }
  0x7b   :  { %v1402_v46 = vrot.slane %v1400_v26, 5  ;;  %v1411_v48 = vor.u32 %v1410_v28, %v1407_v27  ;;  %v1428_v47 = vshll.u32 %v1255_v30, 16  ;;  %v1435_v50 = vrot.slane %v1433_v31, 4  ;;  %v1262_v53 = vld [vmem:[%s10032_s2 + $0x80] sm:$0xf] }
  0x7c   :  { %v1383_v22 = vor.u32 %v1382_v5, %v1379_v4  ;;  %v1438_v51 = vrot.slane %v1436_v32, 5  ;;  %v1449_v2 = vrot.slane %v1447_v33, 4  ;;  %v1442_v56 = vshll.u32 %v1257_v39, 16 }
  0x7d   :  { %v1464_v0 = vshll.u32 %v1260_v49, 16  ;;  %v1403_v3 = vsel %vm7849_vm4, %v1398_v45, %v1402_v46  ;;  %v1475_v5 = vshrl.u32 %v1262_v53, 16  ;;  %v1478_v6 = vshll.u32 %v1262_v53, 16 }
  0x7e   :  { %7027 = vmatmul.mubr.msk.bf16.gmra.mrb[4].mxu0 %vm121_vm1, %v7595_v59  ;;  %v1342_v59 = vrot.slane %v1341_v40, 4  ;;  %v1370_v40 = vrot.slane %v1369_v21, 4  ;;  %v1384_v41 = vrot.slane %v1383_v22, 4  ;;  %v1430_v7 = vrot.slane %v1428_v47, 5 }
  0x7f   :  { %7030 = vmatprep.mubr.msk.bf16.mxu0 %vm121_vm1, %v7596_v63  ;;  %v1249_v63 = vld [vmem:[%s10032_s2 + $0x4c] sm:$0x1]  ;;  %v1439_v8 = vor.u32 %v1438_v51, %v1435_v50  ;;  %v1458_v12 = vrot.slane %v1456_v58, 5  ;;  %v1466_v16 = vrot.slane %v1464_v0, 5 }
  0x80   :  { %v1347_v19 = vsel %vm7849_vm4, %v1342_v59, %v1346_v55  ;;  %v1386_v23 = vshll.u32 %v1249_v63, 16  ;;  %v1425_v55 = vor.u32 %v1424_v38, %v1421_v37  ;;  %v6460_v59 = vld [vmem:[%s10034_s4 + $0xe] sm:$0x3]  ;;  %v1375_v60 = vsel %vm7849_vm4, %v1370_v40, %v8139_v1 }
  0x81   :  { %v6397_v36 = vcombine.low %v1333_v14, %v1347_v19  ;;  %v1461_v63 = vshrl.u32 %v1260_v49, 16  ;;  %v1412_v1 = vrot.slane %v1411_v48, 4  ;;  %v1480_v19 = vrot.slane %v1478_v6, 5 }
  0x82   :  { %v1388_v42 = vrot.slane %v1386_v23, 5  ;;  %v1426_v10 = vrot.slane %v1425_v55, 4  ;;  %v1440_v21 = vrot.slane %v1439_v8, 4 }
  0x84   :  { %v1389_v62 = vsel %vm7849_vm4, %v1384_v41, %v1388_v42 }
  0x85   :  { %v6399_v17 = vcombine.low %v1389_v62, %v1403_v3 }
  0x86   :  { %7031 = vmatmul.mubr.msk.bf16.gmra.mrb[8].mxu0 %vm121_vm1, %v7597_v18  ;;  %v7618_v18 = vld [vmem:[%s10031_s1 + $0x68] ss:$8 sps:$4 sm:$0xff]  }
  0x87   :  { %7034 = vmatprep.mubr.msk.bf16.mxu0 %vm121_vm1, %v7598_v24  ;;  %v1253_v24 = vld [vmem:[%s10032_s2 + $0x5c] sm:$0x1]  ;;  %6962 = vmatprep.mubr.msk.bf16.mxu1 %vm121_vm1, %v7618_v18  ;;  %v1477_v18 = vrot.slane %v1475_v5, 4 }
  0x88   :  { %6963 = vmatmul.mubr.msk.bf16.gmra.mrb[4].mxu1 %vm121_vm1, %v7619_v29  ;;  %v1414_v43 = vshll.u32 %v1253_v24, 16 }
  0x8a   :  { %v1416_v4 = vrot.slane %v1414_v43, 5 }
  0x8c   :  { %v1417_v23 = vsel %vm7849_vm4, %v1412_v1, %v1416_v4 }
  0x8e   :  { %7035 = vmatmul.mubr.msk.bf16.gmra.mrb[12].mxu0 %vm121_vm1, %v7599_v52  ;;  %v1452_v52 = vrot.slane %v1450_v34, 5 }
  0x8f   :  { %7040 = vmatprep.mubr.msk.bf16.mxu0 %vm121_vm1, %v6395_v35  ;;  %v1356_v35 = vrot.slane %v1355_v15, 4  ;;  %v1463_v15 = vrot.slane %v1461_v63, 4 }
  0x90   :  { %v1453_v9 = vor.u32 %v1452_v52, %v1449_v2 }
  0x91   :  { %v1361_v54 = vsel %vm7849_vm4, %v1356_v35, %v8134_v61  ;;  %v1261_v61 = vld [vmem:[%s10032_s2 + $0x7c] sm:$0x1] }
  0x92   :  { %v1470_v13 = vshll.u32 %v1261_v61, 16  ;;  %v6398_v14 = vcombine.low %v1361_v54, %v1375_v60  ;;  %v1454_v22 = vrot.slane %v1453_v9, 4 }
  0x96   :  { %7041 = vmatmul.mubr.msk.bf16.vlgmr.msra.gmra.mrb[0].mxu0 %vm121_vm1, %v6396_v11  ;;  %v1444_v11 = vrot.slane %v1442_v56, 5 }
  0x97   :  { %7057 = vmatpush3.bf16.msra.mxu0 %v8088_v20  ;;  %7044 = vmatprep.mubr.msk.bf16.mxu0 %vm121_vm1, %v6397_v36  ;;  %v1263_v20 = vld [vmem:[%s10032_s2 + $0x84] sm:$0x1] }
  0x98   :  { %7556 = vmatprep.subr.msk.bf16.mxu0 %vm146_vm0, %v6460_v59 }
  0x9e   :  { %7045 = vmatmul.mubr.msk.bf16.gmra.mrb[4].mxu0 %vm121_vm1, %v6398_v14 }
  0x9f   :  { %18 = vsyncpa [#allocation4], 0  ;;  %7048 = vmatprep.mubr.msk.bf16.mxu0 %vm121_vm1, %v6399_v17  ;;  %v1431_v24 = vsel %vm7849_vm4, %v1426_v10, %v1430_v7  ;;  %v1467_v25 = vor.u32 %v1466_v16, %v1463_v15  ;;  %v1481_v26 = vor.u32 %v1480_v19, %v1477_v18  ;;  %v1484_v27 = vshll.u32 %v1263_v20, 16  ;;  %v7600_v39 = vld [vmem:[%s10030_s0 + $0x8] ss:$8 sps:$4 sm:$0xff]  }
  0xa0   :  { %v1445_v28 = vsel %vm7849_vm4, %v1440_v21, %v1444_v11  ;;  %v1459_v29 = vsel %vm7849_vm4, %v1454_v22, %v1458_v12  ;;  %v6400_v30 = vcombine.low %v1417_v23, %v1431_v24  ;;  %v1472_v31 = vrot.slane %v1470_v13, 5  ;;  %v7601_v40 = vld [vmem:[%s10030_s0 + $0x18] ss:$8 sps:$4 sm:$0xff]   ;;  %v7602_v41 = vld [vmem:[%s10030_s0 + $0x28] ss:$8 sps:$4 sm:$0xff]  }
  0xa1   :  { %v6401_v32 = vcombine.low %v1445_v28, %v1459_v29  ;;  %v1468_v33 = vrot.slane %v1467_v25, 4  ;;  %v1482_v34 = vrot.slane %v1481_v26, 4  ;;  %v1486_v36 = vrot.slane %v1484_v27, 5  ;;  %v6509_v43 = vld [vmem:[%s10034_s4 + $0x10] sm:$0x3] }
  0xa2   :  { %v1937_v42 = vsel %vm146_vm0, %v6460_v59, 0  ;;  %v7603_v44 = vld [vmem:[%s10030_s0 + $0x38] ss:$8 sps:$4 sm:$0xff]   ;;  %v7608_v49 = vld [vmem:[%s10031_s1 + $0x8] ss:$8 sps:$4 sm:$0xff]   ;;  %v2359_v56 = vsel %vm146_vm0, %v6509_v43, 0 }
  0xa3   :  { %v1473_v35 = vsel %vm7849_vm4, %v1468_v33, %v1472_v31  ;;  %v1487_v37 = vsel %vm7849_vm4, %v1482_v34, %v1486_v36  ;;  %v7604_v45 = vld [vmem:[%s10030_s0 + $0x50] ss:$8 sps:$4 sm:$0xff]   ;;  %v7605_v46 = vld [vmem:[%s10030_s0 + $0x60] ss:$8 sps:$4 sm:$0xff]   ;;  %v6478_v4 = vld [vmem:[%s10030_s0 + $0xc] sm:$0x1] }
  0xa4   :  { %v6402_v38 = vcombine.low %v1473_v35, %v1487_v37  ;;  %v7606_v48 = vld [vmem:[%s10030_s0 + $0x70] ss:$8 sps:$4 sm:$0xff]   ;;  %v7607_v47 = vld [vmem:[%s10030_s0 + $0x80] ss:$8 sps:$4 sm:$0xff]   ;;  %v6480_v1 = vld [vmem:[%s10030_s0 + $0x14] sm:$0x1] }
  0xa5   :  { %v6477_v50 = vld [vmem:[%s10030_s0 + $0x8] sm:$0xf]  ;;  %v7609_v51 = vld [vmem:[%s10031_s1 + $0x18] ss:$8 sps:$4 sm:$0xff]   ;;  %v6479_v2 = vld [vmem:[%s10030_s0 + $0x10] sm:$0xf] }
  0xa6   :  { %7049 = vmatmul.mubr.msk.bf16.gmra.mrb[8].mxu0 %vm121_vm1, %v6400_v30  ;;  %v7610_v52 = vld [vmem:[%s10031_s1 + $0x28] ss:$8 sps:$4 sm:$0xff]   ;;  %v2085_v53 = vshrl.u32 %v6477_v50, 16  ;;  %v2088_v54 = vshll.u32 %v6477_v50, 16  ;;  %v6481_v55 = vld [vmem:[%s10030_s0 + $0x18] sm:$0xf] }
  0xa7   :  { %7052 = vmatprep.mubr.msk.bf16.mxu0 %vm121_vm1, %v6401_v32  ;;  %v2099_v58 = vshrl.u32 %v6479_v2, 16  ;;  %v2102_v59 = vshll.u32 %v6479_v2, 16  ;;  %v6483_v60 = vld [vmem:[%s10030_s0 + $0x20] sm:$0xf]  ;;  %v2113_v62 = vshrl.u32 %v6481_v55, 16  ;;  %v2116_v61 = vshll.u32 %v6481_v55, 16 }
  0xa8   :  { %v2087_v63 = vrot.slane %v2085_v53, 4  ;;  %v2090_v0 = vrot.slane %v2088_v54, 5  ;;  %v7611_v3 = vld [vmem:[%s10031_s1 + $0x38] ss:$8 sps:$4 sm:$0xff]   ;;  %v2127_v5 = vshrl.u32 %v6483_v60, 16  ;;  %v2130_v6 = vshll.u32 %v6483_v60, 16 }
  0xa9   :  { %v2101_v7 = vrot.slane %v2099_v58, 4  ;;  %v2104_v8 = vrot.slane %v2102_v59, 5  ;;  %v6485_v9 = vld [vmem:[%s10030_s0 + $0x28] sm:$0xf]  ;;  %v6482_v10 = vld [vmem:[%s10030_s0 + $0x1c] sm:$0x1] }
  0xaa   :  { %v6484_v11 = vld [vmem:[%s10030_s0 + $0x24] sm:$0x1]  ;;  %v2115_v12 = vrot.slane %v2113_v62, 4  ;;  %v2118_v13 = vrot.slane %v2116_v61, 5  ;;  %v7612_v14 = vld [vmem:[%s10031_s1 + $0x50] ss:$8 sps:$4 sm:$0xff]   ;;  %v2091_v20 = vor.u32 %v2090_v0, %v2087_v63 }
  0xab   :  { %v2094_v15 = vshll.u32 %v6478_v4, 16  ;;  %v2129_v16 = vrot.slane %v2127_v5, 4  ;;  %v2132_v17 = vrot.slane %v2130_v6, 5  ;;  %v6487_v18 = vld [vmem:[%s10030_s0 + $0x30] sm:$0xf]  ;;  %v2141_v19 = vshrl.u32 %v6485_v9, 16 }
  0xac   :  { %v2144_v21 = vshll.u32 %v6485_v9, 16  ;;  %v2105_v22 = vor.u32 %v2104_v8, %v2101_v7  ;;  %v2108_v23 = vshll.u32 %v6480_v1, 16  ;;  %v2122_v24 = vshll.u32 %v6482_v10, 16  ;;  %v6486_v28 = vld [vmem:[%s10030_s0 + $0x2c] sm:$0x1] }
  0xad   :  { %v2136_v25 = vshll.u32 %v6484_v11, 16  ;;  %v2119_v26 = vor.u32 %v2118_v13, %v2115_v12  ;;  %v2096_v27 = vrot.slane %v2094_v15, 5  ;;  %v2155_v29 = vshrl.u32 %v6487_v18, 16  ;;  %v7613_v31 = vld [vmem:[%s10031_s1 + $0x60] ss:$8 sps:$4 sm:$0xff]  }
  0xae   :  { %7053 = vmatmul.mubr.msk.bf16.gmra.mrb[12].mxu0 %vm121_vm1, %v6402_v38  ;;  %v2158_v30 = vshll.u32 %v6487_v18, 16  ;;  %v2092_v32 = vrot.slane %v2091_v20, 4  ;;  %v2133_v33 = vor.u32 %v2132_v17, %v2129_v16  ;;  %v2143_v34 = vrot.slane %v2141_v19, 4  ;;  %v6489_v35 = vld [vmem:[%s10030_s0 + $0x38] sm:$0xf] }
  0xaf   :  { %7058 = vmatprep.mubr.msk.bf16.mxu0 %vm121_vm1, %v7600_v39  ;;  %v2146_v36 = vrot.slane %v2144_v21, 5  ;;  %v7614_v37 = vld [vmem:[%s10031_s1 + $0x70] ss:$8 sps:$4 sm:$0xff]   ;;  %v2106_v38 = vrot.slane %v2105_v22, 4  ;;  %v2110_v39 = vrot.slane %v2108_v23, 5  ;;  %v2172_v50 = vshll.u32 %v6489_v35, 16 }
  0xb0   :  { %v2097_v2 = vsel %vm7849_vm4, %v2092_v32, %v2096_v27  ;;  %v6490_v55 = vld [vmem:[%s10030_s0 + $0x3c] sm:$0x1]  ;;  %v6492_v5 = vld [vmem:[%s10030_s0 + $0x44] sm:$0x1]  ;;  %v6494_v11 = vld [vmem:[%s10030_s0 + $0x54] sm:$0x1] }
  0xb1   :  { %v2147_v53 = vor.u32 %v2146_v36, %v2143_v34  ;;  %v2111_v62 = vsel %vm7849_vm4, %v2106_v38, %v2110_v39  ;;  %v2174_v1 = vrot.slane %v2172_v50, 5  ;;  %v2178_v10 = vshll.u32 %v6490_v55, 16  ;;  %v7615_v12 = vld [vmem:[%s10031_s1 + $0x80] ss:$8 sps:$4 sm:$0xff]   ;;  %v6496_v17 = vld [vmem:[%s10030_s0 + $0x5c] sm:$0x1] }
  0xb2   :  { %v6510_v16 = vcombine.low %v2097_v2, %v2111_v62  ;;  %v6497_v21 = vld [vmem:[%s10030_s0 + $0x60] sm:$0xf]  ;;  %v2220_v32 = vshll.u32 %v6496_v17, 16  ;;  %v6501_v34 = vld [vmem:[%s10030_s0 + $0x70] sm:$0xf]  ;;  %vm2476_vm5 = vcmask 64512  }
  0xb3   :  { %v2148_v8 = vrot.slane %v2147_v53, 4  ;;  %v6503_v36 = vld [vmem:[%s10030_s0 + $0x78] sm:$0xf]  ;;  %vm2648_vm6 = vcmask 57344   ;;  %vm2658_vm7 = vsmask.f32 256 }
  0xb4   :  { %v2222_v50 = vrot.slane %v2220_v32, 5  ;;  %vm8462_vm8 = vmand %vm2648_vm6, %vm2658_vm7  ;;  %vm2720_vm9 = vsmask.f32 7938  ;;  %vm2646_vm11 = vcmask 60416   ;;  %vm3412_vm13 = vcmask 1043456  }
  0xb5   :  { %vm8518_vm10 = vmand %vm2648_vm6, %vm2720_vm9  ;;  %vm3725_vm14 = vcmask 1042432   ;;  %vm3726_vm15 = vcmask 1046532  }
  0xb6   :  { %7059 = vmatmul.mubr.msk.bf16.vlgmr.msra.gmra.mrb[0].mxu0 %vm121_vm1, %v7601_v40  ;;  %v2124_v40 = vrot.slane %v2122_v24, 5  ;;  %v2192_v24 = vshll.u32 %v6492_v5, 16  ;;  %vm8596_vm12 = vmand %vm2646_vm11, %vm2720_vm9 }
  0xb7   :  { %7075 = vmatpush3.bf16.msra.mxu0 %v1937_v42  ;;  %7062 = vmatprep.mubr.msk.bf16.mxu0 %vm121_vm1, %v7602_v41  ;;  %v2138_v41 = vrot.slane %v2136_v25, 5  ;;  %v6488_v42 = vld [vmem:[%s10030_s0 + $0x34] sm:$0x1]  ;;  %v2206_v25 = vshll.u32 %v6494_v11, 16  ;;  %vm9160_vm2 = vmor %vm3725_vm14, %vm3726_vm15 }
  0xb8   :  { %7557 = vmatprep.subr.msk.bf16.mxu0 %vm146_vm0, %v6509_v43  ;;  %v2120_v43 = vrot.slane %v2119_v26, 4  ;;  %v2164_v54 = vshll.u32 %v6488_v42, 16  ;;  %v6499_v26 = vld [vmem:[%s10030_s0 + $0x68] sm:$0xf]  ;;  %v2194_v42 = vrot.slane %v2192_v24, 5 }
  0xb9   :  { %v2239_v38 = vshrl.u32 %v6499_v26, 16  ;;  %v2242_v39 = vshll.u32 %v6499_v26, 16  ;;  %v6506_v26 = vld [vmem:[%s10030_s0 + $0x84] sm:$0x1] }
  0xba   :  { %v2166_v9 = vrot.slane %v2164_v54, 5 }
  0xbb   :  { %v2241_v54 = vrot.slane %v2239_v38, 4  ;;  %v2244_v55 = vrot.slane %v2242_v39, 5 }
  0xbe   :  { %7063 = vmatmul.mubr.msk.bf16.gmra.mrb[4].mxu0 %vm121_vm1, %v7603_v44  ;;  %v2150_v44 = vshll.u32 %v6486_v28, 16 }
  0xbf   :  { %7066 = vmatprep.mubr.msk.bf16.mxu0 %vm121_vm1, %v7604_v45  ;;  %v6491_v45 = vld [vmem:[%s10030_s0 + $0x40] sm:$0xf] }
  0xc0   :  { %v2186_v58 = vshll.u32 %v6491_v45, 16  ;;  %v2152_v61 = vrot.slane %v2150_v44, 5  ;;  %v2253_v44 = vshrl.u32 %v6501_v34, 16 }
  0xc2   :  { %v2153_v28 = vsel %vm7849_vm4, %v2148_v8, %v2152_v61 }
  0xc6   :  { %7067 = vmatmul.mubr.msk.bf16.gmra.mrb[8].mxu0 %vm121_vm1, %v7605_v46  ;;  %v6493_v46 = vld [vmem:[%s10030_s0 + $0x50] sm:$0xf] }
  0xc7   :  { %7070 = vmatprep.mubr.msk.bf16.mxu0 %vm121_vm1, %v7606_v48  ;;  %v2157_v48 = vrot.slane %v2155_v29, 4  ;;  %v2197_v59 = vshrl.u32 %v6493_v46, 16  ;;  %v2200_v60 = vshll.u32 %v6493_v46, 16  ;;  %v2180_v29 = vrot.slane %v2178_v10, 5 }
  0xc8   :  { %v2267_v46 = vshrl.u32 %v6503_v36, 16  ;;  %v2245_v10 = vor.u32 %v2244_v55, %v2241_v54 }
  0xc9   :  { %v2199_v20 = vrot.slane %v2197_v59, 4  ;;  %v2202_v15 = vrot.slane %v2200_v60, 5  ;;  %v6505_v59 = vld [vmem:[%s10030_s0 + $0x80] sm:$0xf]  ;;  %v2255_v60 = vrot.slane %v2253_v44, 4 }
  0xca   :  { %v2269_v61 = vrot.slane %v2267_v46, 4  ;;  %v2246_v24 = vrot.slane %v2245_v10, 4 }
  0xce   :  { %7071 = vmatmul.mubr.msk.bf16.gmra.mrb[12].mxu0 %vm121_vm1, %v7607_v47  ;;  %v2160_v47 = vrot.slane %v2158_v30, 5 }
  0xcf   :  { %7076 = vmatprep.mubr.msk.bf16.mxu0 %vm121_vm1, %v7608_v49  ;;  %v2169_v49 = vshrl.u32 %v6489_v35, 16 }
  0xd0   :  { %v2161_v4 = vor.u32 %v2160_v47, %v2157_v48  ;;  %v2270_v48 = vshll.u32 %v6503_v36, 16  ;;  %v6508_v36 = vld [vmem:[%s10030_s0 + $0x8c] sm:$0x1] }
  0xd1   :  { %v2171_v6 = vrot.slane %v2169_v49, 4 }
  0xd2   :  { %v2162_v22 = vrot.slane %v2161_v4, 4 }
  0xd3   :  { %v2175_v23 = vor.u32 %v2174_v1, %v2171_v6  ;;  %v6502_v1 = vld [vmem:[%s10030_s0 + $0x74] sm:$0x1] }
  0xd6   :  { %7077 = vmatmul.mubr.msk.bf16.vlgmr.msra.gmra.mrb[0].mxu0 %vm121_vm1, %v7609_v51  ;;  %v6495_v51 = vld [vmem:[%s10030_s0 + $0x58] sm:$0xf] }
  0xd7   :  { %7093 = vmatpush3.bf16.msra.mxu0 %v2359_v56  ;;  %7080 = vmatprep.mubr.msk.bf16.mxu0 %vm121_vm1, %v7610_v52  ;;  %v2134_v52 = vrot.slane %v2133_v33, 4  ;;  %v2183_v56 = vshrl.u32 %v6491_v45, 16  ;;  %v2211_v63 = vshrl.u32 %v6495_v51, 16  ;;  %v2214_v0 = vshll.u32 %v6495_v51, 16 }
  0xd8   :  { %v2225_v33 = vshrl.u32 %v6497_v21, 16  ;;  %v2256_v45 = vshll.u32 %v6501_v34, 16 }
  0xd9   :  { %v2139_v7 = vsel %vm7849_vm4, %v2134_v52, %v2138_v41  ;;  %v2185_v13 = vrot.slane %v2183_v56, 4  ;;  %v2213_v18 = vrot.slane %v2211_v63, 4  ;;  %v2216_v19 = vrot.slane %v2214_v0, 5  ;;  %v6498_v52 = vld [vmem:[%s10030_s0 + $0x64] sm:$0x1] }
  0xda   :  { %v2176_v41 = vrot.slane %v2175_v23, 4  ;;  %v2227_v51 = vrot.slane %v2225_v33, 4  ;;  %v2258_v62 = vrot.slane %v2256_v45, 5  ;;  %v2272_v63 = vrot.slane %v2270_v48, 5  ;;  %v6507_v0 = vld [vmem:[%s10030_s0 + $0x88] sm:$0xf] }
  0xdb   :  { %v2217_v35 = vor.u32 %v2216_v19, %v2213_v18  ;;  %v2234_v6 = vshll.u32 %v6498_v52, 16 }
  0xdc   :  { %v2273_v17 = vor.u32 %v2272_v63, %v2269_v61 }
  0xdd   :  { %v2218_v2 = vrot.slane %v2217_v35, 4 }
  0xde   :  { %7081 = vmatmul.mubr.msk.bf16.gmra.mrb[4].mxu0 %vm121_vm1, %v7611_v3  ;;  %v2125_v3 = vsel %vm7849_vm4, %v2120_v43, %v2124_v40  ;;  %v2167_v40 = vsel %vm7849_vm4, %v2162_v22, %v2166_v9  ;;  %v2208_v43 = vrot.slane %v2206_v25, 5  ;;  %v2274_v33 = vrot.slane %v2273_v17, 4 }
  0xdf   :  { %7084 = vmatprep.mubr.msk.bf16.mxu0 %vm121_vm1, %v7612_v14  ;;  %v2188_v14 = vrot.slane %v2186_v58, 5  ;;  %v6511_v27 = vcombine.low %v2125_v3, %v2139_v7  ;;  %v6512_v56 = vcombine.low %v2153_v28, %v2167_v40  ;;  %v6500_v58 = vld [vmem:[%s10030_s0 + $0x6c] sm:$0x1]  ;;  %v2181_v3 = vsel %vm7849_vm4, %v2176_v41, %v2180_v29  ;;  %v6504_v7 = vld [vmem:[%s10030_s0 + $0x7c] sm:$0x1] }
  0xe0   :  { %v2223_v8 = vsel %vm7849_vm4, %v2218_v2, %v2222_v50  ;;  %v2248_v11 = vshll.u32 %v6500_v58, 16  ;;  %v2276_v18 = vshll.u32 %v6504_v7, 16  ;;  %v2304_v41 = vshll.u32 %v6508_v36, 16  ;;  %v2666_v7 = vld [vmem:[#allocation2 + $0x10] sm:$0x1] }
  0xe1   :  { %v2189_v30 = vor.u32 %v2188_v14, %v2185_v13  ;;  %v2284_v13 = vshll.u32 %v6505_v59, 16  ;;  %v2295_v14 = vshrl.u32 %v6507_v0, 16  ;;  %v2667_v10 = vsel %vm8462_vm8, 0, %v2666_v7 }
  0xe2   :  { %v2250_v25 = vrot.slane %v2248_v11, 5  ;;  %v2278_v34 = vrot.slane %v2276_v18, 5  ;;  %v2669_v11 = vld [vmem:[#allocation2 + $0x18] sm:$0x1]  ;;  %2668 = vst [vmem:[#allocation2 + $0x10] sm:$0x1] %v2667_v10 }
  0xe3   :  { %v2190_v47 = vrot.slane %v2189_v30, 4  ;;  %v2286_v28 = vrot.slane %v2284_v13, 5  ;;  %v2297_v29 = vrot.slane %v2295_v14, 4  ;;  %v2670_v13 = vsel %vm8462_vm8, 0, %v2669_v11  ;;  %v2737_v11 = vld [vmem:[#allocation2 + $0x2c] sm:$0x1] }
  0xe4   :  { %v2251_v38 = vsel %vm7849_vm4, %v2246_v24, %v2250_v25  ;;  %2671 = vst [vmem:[#allocation2 + $0x18] sm:$0x1] %v2670_v13 }
  0xe5   :  { %v2195_v4 = vsel %vm7849_vm4, %v2190_v47, %v2194_v42 }
  0xe6   :  { %7085 = vmatmul.mubr.msk.bf16.gmra.mrb[8].mxu0 %vm121_vm1, %v7613_v31  ;;  %v2203_v31 = vor.u32 %v2202_v15, %v2199_v20  ;;  %v2298_v20 = vshll.u32 %v6507_v0, 16  ;;  %v2259_v15 = vor.u32 %v2258_v62, %v2255_v60  ;;  %v6513_v19 = vcombine.low %v2181_v3, %v2195_v4 }
  0xe7   :  { %7088 = vmatprep.mubr.msk.bf16.mxu0 %vm121_vm1, %v7614_v37  ;;  %v2228_v37 = vshll.u32 %v6497_v21, 16  ;;  %v2236_v21 = vrot.slane %v2234_v6, 5 }
  0xe8   :  { %v2204_v49 = vrot.slane %v2203_v31, 4  ;;  %v2300_v30 = vrot.slane %v2298_v20, 5  ;;  %v2260_v31 = vrot.slane %v2259_v15, 4  ;;  %v2675_v20 = vld [vmem:[#allocation2 + $0x28] sm:$0x1] }
  0xe9   :  { %v2230_v53 = vrot.slane %v2228_v37, 5  ;;  %v2290_v37 = vshll.u32 %v6506_v26, 16  ;;  %v2678_v15 = vld [vmem:[#allocation2 + $0x30] sm:$0x1]  ;;  %v2676_v17 = vsel %vm8462_vm8, 0, %v2675_v20  ;;  %v2738_v20 = vsel %vm8518_vm10, 0, %v2737_v11 }
  0xea   :  { %v2209_v5 = vsel %vm7849_vm4, %v2204_v49, %v2208_v43  ;;  %v2301_v40 = vor.u32 %v2300_v30, %v2297_v29  ;;  %v2279_v43 = vsel %vm7849_vm4, %v2274_v33, %v2278_v34  ;;  %v2306_v49 = vrot.slane %v2304_v41, 5  ;;  %2677 = vst [vmem:[#allocation2 + $0x28] sm:$0x1] %v2676_v17  ;;  %v2693_v26 = vld [vmem:[#allocation2 + $0x58] sm:$0x1] }
  0xeb   :  { %v2231_v9 = vor.u32 %v2230_v53, %v2227_v51  ;;  %v6514_v22 = vcombine.low %v2209_v5, %v2223_v8  ;;  %v2292_v45 = vrot.slane %v2290_v37, 5  ;;  %v2679_v18 = vsel %vm8462_vm8, 0, %v2678_v15  ;;  %v2696_v30 = vld [vmem:[#allocation2 + $0x60] sm:$0x1]  ;;  %v2699_v34 = vld [vmem:[#allocation2 + $0x68] sm:$0x1] }
  0xec   :  { %v2302_v47 = vrot.slane %v2301_v40, 4  ;;  %2680 = vst [vmem:[#allocation2 + $0x30] sm:$0x1] %v2679_v18  ;;  %v2694_v29 = vsel %vm8462_vm8, 0, %v2693_v26  ;;  %v2697_v33 = vsel %vm8462_vm8, 0, %v2696_v30  ;;  %v7683_v11 = vmov 0  }
  0xed   :  { %v2232_v23 = vrot.slane %v2231_v9, 4  ;;  %2695 = vst [vmem:[#allocation2 + $0x58] sm:$0x1] %v2694_v29  ;;  %2698 = vst [vmem:[#allocation2 + $0x60] sm:$0x1] %v2697_v33 }
  0xee   :  { %7089 = vmatmul.mubr.msk.bf16.gmra.mrb[12].mxu0 %vm121_vm1, %v7615_v12  ;;  %v2281_v12 = vshrl.u32 %v6505_v59, 16  ;;  %v2307_v51 = vsel %vm7849_vm4, %v2302_v47, %v2306_v49  ;;  %v2714_v47 = vld [vmem:[#allocation2 + $0x90] sm:$0x1]  ;;  %v2740_v15 = vld [vmem:[#allocation2 + $0x34] sm:$0x1] }
  0xef   :  { %7094 = vmatprep.mubr.msk.bf16.mxu0 %vm121_vm1, %v6510_v16  ;;  %v2262_v16 = vshll.u32 %v6502_v1, 16  ;;  %v2237_v35 = vsel %vm7849_vm4, %v2232_v23, %v2236_v21  ;;  %v2663_v1 = vld [vmem:[#allocation2 + $0x8] sm:$0x1]  ;;  %v2684_v21 = vld [vmem:[#allocation2 + $0x40] sm:$0x1] }
  0xf0   :  { %v6515_v44 = vcombine.low %v2237_v35, %v2251_v38  ;;  %v2664_v9 = vsel %vm8462_vm8, 0, %v2663_v1  ;;  %v2685_v25 = vsel %vm8462_vm8, 0, %v2684_v21  ;;  %v2700_v38 = vsel %vm8462_vm8, 0, %v2699_v34  ;;  %v2734_v1 = vld [vmem:[#allocation2 + $0x24] sm:$0x1] }
  0xf1   :  { %v2264_v32 = vrot.slane %v2262_v16, 5  ;;  %2665 = vst [vmem:[#allocation2 + $0x8] sm:$0x1] %v2664_v9  ;;  %2686 = vst [vmem:[#allocation2 + $0x40] sm:$0x1] %v2685_v25  ;;  %v2735_v10 = vsel %vm8518_vm10, 0, %v2734_v1 }
  0xf2   :  { %2701 = vst [vmem:[#allocation2 + $0x68] sm:$0x1] %v2700_v38  ;;  %2736 = vst [vmem:[#allocation2 + $0x24] sm:$0x1] %v2735_v10  ;;  %v2746_v21 = vld [vmem:[#allocation2 + $0x44] sm:$0x1] }
  0xf3   :  { %v2265_v42 = vsel %vm7849_vm4, %v2260_v31, %v2264_v32  ;;  %2739 = vst [vmem:[#allocation2 + $0x2c] sm:$0x1] %v2738_v20  ;;  %v2747_v25 = vsel %vm8518_vm10, 0, %v2746_v21  ;;  %v2758_v30 = vld [vmem:[#allocation2 + $0x64] sm:$0x1] }
  0xf4   :  { %v6516_v46 = vcombine.low %v2265_v42, %v2279_v43  ;;  %v2705_v42 = vld [vmem:[#allocation2 + $0x78] sm:$0x1]  ;;  %v2708_v43 = vld [vmem:[#allocation2 + $0x80] sm:$0x1]  ;;  %2748 = vst [vmem:[#allocation2 + $0x44] sm:$0x1] %v2747_v25 }
  0xf5   :  { %v2759_v33 = vsel %vm8518_vm10, 0, %v2758_v30  ;;  %v2767_v38 = vld [vmem:[#allocation2 + $0x7c] sm:$0x1]  ;;  %v2725_v1 = vld [vmem:[#allocation2 + $0xc] sm:$0x1] }
  0xf6   :  { %7095 = vmatmul.mubr.msk.bf16.vlgmr.msra.gmra.mrb[0].mxu0 %vm121_vm1, %v6511_v27  ;;  %v2283_v27 = vrot.slane %v2281_v12, 4  ;;  %v2672_v12 = vld [vmem:[#allocation2 + $0x20] sm:$0x1]  ;;  %2760 = vst [vmem:[#allocation2 + $0x64] sm:$0x1] %v2759_v33 }
  0xf7   :  { %7098 = vmatprep.mubr.msk.bf16.mxu0 %vm121_vm1, %v6512_v56  ;;  %v2673_v14 = vsel %vm8462_vm8, 0, %v2672_v12  ;;  %2647 = vst.msk [vmem:[#allocation2] sm:$0xf] %vm2646_vm11, %v7683_v11  ;;  %2650 = vst.msk [vmem:[#allocation2 + $0x50] sm:$0xf] %vm2646_vm11, %v7683_v11 }
  0xf8   :  { %v2287_v39 = vor.u32 %v2286_v28, %v2283_v27  ;;  %2674 = vst [vmem:[#allocation2 + $0x20] sm:$0x1] %v2673_v14  ;;  %2649 = vst.msk [vmem:[#allocation2 + $0x4] sm:$0x1] %vm2648_vm6, %v7683_v11  ;;  %v6543_v21 = vld [vmem:[%s10037_s7 + $0x4] sm:$0xf] }
  0xf9   :  { %2651 = vst.msk [vmem:[#allocation2 + $0x54] sm:$0x1] %vm2648_vm6, %v7683_v11  ;;  %2654 = vst.msk [vmem:[#allocation2 + $0x4c] sm:$0x1] %vm2648_vm6, %v7683_v11  ;;  %7558 = vmatprep.subr.msk.bf16.mxu1 %vm3412_vm13, %v6543_v21 }
  0xfa   :  { %v2288_v48 = vrot.slane %v2287_v39, 4  ;;  %v2702_v39 = vld [vmem:[#allocation2 + $0x70] sm:$0x1]  ;;  %2653 = vst.msk [vmem:[#allocation2 + $0x48] sm:$0xf] %vm2646_vm11, %v7683_v11 }
  0xfb   :  { %v2703_v41 = vsel %vm8462_vm8, 0, %v2702_v39  ;;  %v2770_v39 = vld [vmem:[#allocation2 + $0x84] sm:$0x1]  ;;  %2655 = vst.msk [vmem:[#allocation2 + $0x98] sm:$0xf] %vm2646_vm11, %v7683_v11 }
  0xfc   :  { %v2293_v50 = vsel %vm7849_vm4, %v2288_v48, %v2292_v45  ;;  %2704 = vst [vmem:[#allocation2 + $0x70] sm:$0x1] %v2703_v41  ;;  %v2706_v45 = vsel %vm8462_vm8, 0, %v2705_v42  ;;  %v2711_v48 = vld [vmem:[#allocation2 + $0x88] sm:$0x1]  ;;  %v2768_v41 = vsel %vm8518_vm10, 0, %v2767_v38 }
  0xfd   :  { %v6517_v2 = vcombine.low %v2293_v50, %v2307_v51  ;;  %2707 = vst [vmem:[#allocation2 + $0x78] sm:$0x1] %v2706_v45  ;;  %v2712_v49 = vsel %vm8462_vm8, 0, %v2711_v48  ;;  %v2715_v50 = vsel %vm8462_vm8, 0, %v2714_v47  ;;  %v2728_v51 = vld [vmem:[#allocation2 + $0x14] sm:$0x1] }
  0xfe   :  { %7099 = vmatmul.mubr.msk.bf16.gmra.mrb[4].mxu0 %vm121_vm1, %v6513_v19  ;;  %v2681_v19 = vld [vmem:[#allocation2 + $0x38] sm:$0x1]  ;;  %2713 = vst [vmem:[#allocation2 + $0x88] sm:$0x1] %v2712_v49  ;;  %2716 = vst [vmem:[#allocation2 + $0x90] sm:$0x1] %v2715_v50 }
  0xff   :  { %7102 = vmatprep.mubr.msk.bf16.mxu0 %vm121_vm1, %v6514_v22  ;;  %v2682_v24 = vsel %vm8462_vm8, 0, %v2681_v19  ;;  %v2741_v19 = vsel %vm8518_vm10, 0, %v2740_v15  ;;  %v2771_v42 = vsel %vm8518_vm10, 0, %v2770_v39  ;;  %2769 = vst [vmem:[#allocation2 + $0x7c] sm:$0x1] %v2768_v41 }
 0x100   :  { %2683 = vst [vmem:[#allocation2 + $0x38] sm:$0x1] %v2682_v24  ;;  %2742 = vst [vmem:[#allocation2 + $0x34] sm:$0x1] %v2741_v19 }
 0x101   :  { %2772 = vst [vmem:[#allocation2 + $0x84] sm:$0x1] %v2771_v42  ;;  %2656 = vst.msk [vmem:[#allocation2 + $0x9c] sm:$0x1] %vm2648_vm6, %v7683_v11 }
 0x106   :  { %7103 = vmatmul.mubr.msk.bf16.gmra.mrb[8].mxu0 %vm121_vm1, %v6515_v44 }
 0x107   :  { %7106 = vmatprep.mubr.msk.bf16.mxu0 %vm121_vm1, %v6516_v46  ;;  %v2709_v46 = vsel %vm8462_vm8, 0, %v2708_v43  ;;  %v2773_v43 = vld [vmem:[#allocation2 + $0x8c] sm:$0x1] }
 0x108   :  { %v8431_v52 = vpop.f32.mrb[0].mxu1  ;;  %2710 = vst [vmem:[#allocation2 + $0x80] sm:$0x1] %v2709_v46  ;;  %v2774_v48 = vsel %vm8518_vm10, 0, %v2773_v43 }
 0x109   :  { %v8433_v53 = vpop.f32.mrb[1].mxu1  ;;  %2775 = vst [vmem:[#allocation2 + $0x8c] sm:$0x1] %v2774_v48 }
 0x10a   :  { %v8435_v54 = vpop.f32.mrb[2].mxu1 }
 0x10b   :  { %v8437_v55 = vpop.f32.mrb[3].mxu1 }
 0x10e   :  { %7107 = vmatmul.mubr.msk.bf16.gmra.mrb[12].mxu0 %vm121_vm1, %v6517_v2 }
 0x15b   :  { %v8439_v56 = vpop.f32.mrb[4].mxu1 }
 0x15c   :  { %v8441_v58 = vpop.f32.mrb[5].mxu1 }
 0x15d   :  { %v8443_v59 = vpop.f32.mrb[6].mxu1 }
 0x15e   :  { %v8445_v60 = vpop.f32.mrb[7].mxu1 }
 0x1c9   :  { %v8447_v62 = vpop.f32.mrb[0].mxu0 }
 0x1ca   :  { %v8449_v61 = vpop.f32.mrb[1].mxu0  ;;  %v2480_v0 = vsel %vm2476_vm5, %v8447_v62, 0.0 }
 0x1cb   :  { %v8451_v63 = vpop.f32.mrb[2].mxu0  ;;  %v2477_v4 = vsel %vm2476_vm5, %v8449_v61, 0.0 }
 0x1cc   :  { %v8455_v3 = vpop.f32.mrb[3].mxu0  ;;  %v2482_v22 = vsel %vm2476_vm5, %v8451_v63, 0.0 }
 0x1cd   :  { %v2478_v5 = vsel %vm2476_vm5, %v8455_v3, 0.0 }
 0x1ce   :  { %v2479_v8 = vadd.f32 %v2478_v5, %v2477_v4  ;;  %v10053_v4 = vmov 0  ;;  %v2731_v5 = vld [vmem:[#allocation2 + $0x1c] sm:$0x1] }
 0x1cf   :  { %v10054_v4 = vsel %vm8518_vm10, 4294967295, %v10053_v4  ;;  %v2732_v9 = vsel %vm8518_vm10, 0, %v2731_v5 }
 0x1d0   :  { %v2481_v16 = vadd.f32 %v2480_v0, %v2479_v8  ;;  %10055 = vst [vmem:[#allocation6_spill] sm:$0xff] %v10054_v4  ;;  %v2729_v8 = vsel %vm8518_vm10, 0, %v2728_v51  ;;  %2733 = vst [vmem:[#allocation2 + $0x1c] sm:$0x1] %v2732_v9 }
 0x1d1   :  { %v8480_v23 = vpop.f32.mrb[4].mxu0  ;;  %2730 = vst [vmem:[#allocation2 + $0x14] sm:$0x1] %v2729_v8 }
 0x1d2   :  { %v8486_v27 = vpop.f32.mrb[5].mxu0  ;;  %v2483_v28 = vadd.f32 %v2482_v22, %v2481_v16  ;;  %v2488_v36 = vsel %vm2476_vm5, %v8480_v23, 0.0  ;;  %v2743_v16 = vld [vmem:[#allocation2 + $0x3c] sm:$0x1] }
 0x1d3   :  { %v2484_v31 = vsel %vm2476_vm5, %v8486_v27, 0.0  ;;  %v8492_v32 = vpop.f32.mrb[6].mxu0 }
 0x1d4   :  { %v2485_v35 = vadd.f32 %v2484_v31, %v2483_v28  ;;  %v8498_v37 = vpop.f32.mrb[7].mxu0  ;;  %v2490_v2 = vsel %vm2476_vm5, %v8492_v32, 0.0 }
 0x1d5   :  { %v2486_v40 = vsel %vm2476_vm5, %v8498_v37, 0.0 }
 0x1d6   :  { %v2487_v44 = vadd.f32 %v2486_v40, %v2485_v35 }
 0x1d8   :  { %v2489_v0 = vadd.f32 %v2488_v36, %v2487_v44  ;;  %v2764_v36 = vld [vmem:[#allocation2 + $0x74] sm:$0x1] }
 0x1d9   :  { %v7104_v7 = vpop.f32.mrb[8].mxu0  ;;  %v2776_v44 = vld [vmem:[#allocation2 + $0x94] sm:$0x1] }
 0x1da   :  { %v8529_v12 = vadd.f32 %v7104_v7, %v8431_v52  ;;  %v2427_v13 = vpop.f32.mrb[9].mxu0  ;;  %v2491_v14 = vadd.f32 %v2490_v2, %v2489_v0  ;;  %v2744_v52 = vsel %vm8518_vm10, 0, %v2743_v16  ;;  %v2777_v47 = vsel %vm8518_vm10, 0, %v2776_v44 }
 0x1db   :  { %v8534_v17 = vadd.f32 %v2427_v13, %v8433_v53  ;;  %v7105_v18 = vpop.f32.mrb[10].mxu0  ;;  %2745 = vst [vmem:[#allocation2 + $0x3c] sm:$0x1] %v2744_v52  ;;  %v2755_v53 = vld [vmem:[#allocation2 + $0x5c] sm:$0x1] }
 0x1dc   :  { %v8541_v22 = vadd.f32 %v7105_v18, %v8435_v54  ;;  %v2430_v24 = vpop.f32.mrb[11].mxu0  ;;  %v2756_v29 = vsel %vm8518_vm10, 0, %v2755_v53  ;;  %v2761_v54 = vld [vmem:[#allocation2 + $0x6c] sm:$0x1]  ;;  %v2496_v45 = vsel %vm2476_vm5, %v8529_v12, 0.0  ;;  %v3414_v53 = vsel %vm3412_vm13, %v6543_v21, 0 }
 0x1dd   :  { %v2492_v26 = vsel %vm2476_vm5, %v8534_v17, 0.0  ;;  %v8548_v28 = vadd.f32 %v2430_v24, %v8437_v55  ;;  %2757 = vst [vmem:[#allocation2 + $0x5c] sm:$0x1] %v2756_v29  ;;  %v2762_v34 = vsel %vm8518_vm10, 0, %v2761_v54  ;;  %v2765_v55 = vsel %vm8518_vm10, 0, %v2764_v36  ;;  %7111 = vmatpush3.bf16.msra.mxu1 %v3414_v53 }
 0x1de   :  { %v2493_v31 = vadd.f32 %v2492_v26, %v2491_v14  ;;  %2763 = vst [vmem:[#allocation2 + $0x6c] sm:$0x1] %v2762_v34  ;;  %2766 = vst [vmem:[#allocation2 + $0x74] sm:$0x1] %v2765_v55  ;;  %v2498_v2 = vsel %vm2476_vm5, %v8541_v22, 0.0 }
 0x1df   :  { %v2494_v35 = vsel %vm2476_vm5, %v8548_v28, 0.0  ;;  %2778 = vst [vmem:[#allocation2 + $0x94] sm:$0x1] %v2777_v47  ;;  %v2660_v24 = vld [vmem:[#allocation2] sm:$0x1] }
 0x1e0   :  { %v2495_v40 = vadd.f32 %v2494_v35, %v2493_v31  ;;  %v2661_v26 = vsel %vm8462_vm8, 0, %v2660_v24  ;;  %v2722_v29 = vld [vmem:[#allocation2 + $0x4] sm:$0x1]  ;;  %v2690_v54 = vld [vmem:[#allocation2 + $0x50] sm:$0x1] }
 0x1e1   :  { %v7108_v46 = vpop.f32.mrb[12].mxu0  ;;  %2662 = vst [vmem:[#allocation2] sm:$0x1] %v2661_v26  ;;  %v2723_v30 = vsel %vm8518_vm10, 0, %v2722_v29  ;;  %v2691_v33 = vsel %vm8462_vm8, 0, %v2690_v54 }
 0x1e2   :  { %v2497_v49 = vadd.f32 %v2496_v45, %v2495_v40  ;;  %v8571_v50 = vadd.f32 %v7108_v46, %v8439_v56  ;;  %v2443_v51 = vpop.f32.mrb[13].mxu0  ;;  %2724 = vst [vmem:[#allocation2 + $0x4] sm:$0x1] %v2723_v30  ;;  %v2752_v34 = vld [vmem:[#allocation2 + $0x54] sm:$0x1] }
 0x1e3   :  { %v8576_v0 = vadd.f32 %v2443_v51, %v8441_v58  ;;  %v7109_v5 = vpop.f32.mrb[14].mxu0  ;;  %v2726_v58 = vsel %vm8518_vm10, 0, %v2725_v1  ;;  %2692 = vst [vmem:[#allocation2 + $0x50] sm:$0x1] %v2691_v33  ;;  %v2753_v36 = vsel %vm8518_vm10, 0, %v2752_v34 }
 0x1e4   :  { %v2499_v7 = vadd.f32 %v2498_v2, %v2497_v49  ;;  %v8579_v8 = vadd.f32 %v7109_v5, %v8443_v59  ;;  %v2446_v9 = vpop.f32.mrb[15].mxu0  ;;  %2727 = vst [vmem:[#allocation2 + $0xc] sm:$0x1] %v2726_v58  ;;  %v2504_v20 = vsel %vm2476_vm5, %v8571_v50, 0.0  ;;  %2754 = vst [vmem:[#allocation2 + $0x54] sm:$0x1] %v2753_v36 }
 0x1e5   :  { %v2500_v56 = vsel %vm2476_vm5, %v8576_v0, 0.0  ;;  %v7299_v10 = vadd.f32 %v2446_v9, %v8445_v60 }
 0x1e6   :  { %v2501_v59 = vadd.f32 %v2500_v56, %v2499_v7  ;;  %v2506_v16 = vsel %vm2476_vm5, %v8579_v8, 0.0 }
 0x1e7   :  { %v2502_v13 = vsel %vm2476_vm5, %v7299_v10, 0.0 }
 0x1e8   :  { %v2503_v14 = vadd.f32 %v2502_v13, %v2501_v59 }
 0x1ea   :  { %v2505_v15 = vadd.f32 %v2504_v20, %v2503_v14 }
 0x1ec   :  { %v2507_v18 = vadd.f32 %v2506_v16, %v2505_v15 }
 0x1ee   :  { %v2508_v19 = vrot.slane %v2507_v18, 4 }
 0x1f0   :  { %v2509_v52 = vadd.f32 %v2508_v19, %v2507_v18 }
 0x1f2   :  { %v2510_v25 = vrot.slane %v2509_v52, 2 }
 0x1f4   :  { %v2511_v31 = vadd.f32 %v2510_v25, %v2509_v52 }
 0x1f6   :  { %v2512_v35 = vrot.slane %v2511_v31, 1 }
 0x1f8   :  { %v2513_v55 = vadd.f32 %v2512_v35, %v2511_v31 }
 0x1fa   :  { %v2514_v38 = vmul.f32 0.0078125, %v2513_v55 }
 0x1fc   :  { %v8619_v39 = vsub.f32 %v8449_v61, %v2514_v38  ;;  %v8622_v40 = vsub.f32 %v8455_v3, %v2514_v38  ;;  %v8625_v41 = vsub.f32 %v8447_v62, %v2514_v38  ;;  %v8628_v42 = vsub.f32 %v8451_v63, %v2514_v38 }
 0x1fd   :  { %v8631_v43 = vsub.f32 %v8486_v27, %v2514_v38  ;;  %v8634_v44 = vsub.f32 %v8498_v37, %v2514_v38  ;;  %v8637_v45 = vsub.f32 %v8480_v23, %v2514_v38  ;;  %v8640_v61 = vsub.f32 %v8492_v32, %v2514_v38  ;;  %v8657_v23 = vld [vmem:[%s10037_s7] sm:$0xf] }
 0x1fe   :  { %v8643_v3 = vsub.f32 %v8534_v17, %v2514_v38  ;;  %v8646_v62 = vsub.f32 %v8548_v28, %v2514_v38  ;;  %v8649_v63 = vsub.f32 %v8529_v12, %v2514_v38  ;;  %v8652_v27 = vsub.f32 %v8541_v22, %v2514_v38  ;;  %7559 = vmatprep.subr.msk.bf16.mxu1 %vm3412_vm13, %v8657_v23 }
 0x1ff   :  { %v8660_v32 = vsub.f32 %v8576_v0, %v2514_v38  ;;  %v8662_v37 = vsub.f32 %v7299_v10, %v2514_v38  ;;  %v8665_v17 = vsub.f32 %v8571_v50, %v2514_v38  ;;  %v8668_v28 = vsub.f32 %v8579_v8, %v2514_v38 }
 0x200   :  { %v2531_v12 = vmul.f32 %v8619_v39, %v8619_v39  ;;  %v2532_v22 = vmul.f32 %v8622_v40, %v8622_v40  ;;  %v2533_v46 = vmul.f32 %v8625_v41, %v8625_v41  ;;  %v2534_v48 = vmul.f32 %v8628_v42, %v8628_v42 }
 0x201   :  { %v2535_v51 = vmul.f32 %v8631_v43, %v8631_v43  ;;  %v2536_v5 = vmul.f32 %v8634_v44, %v8634_v44  ;;  %v2537_v8 = vmul.f32 %v8637_v45, %v8637_v45  ;;  %v2538_v10 = vmul.f32 %v8640_v61, %v8640_v61 }
 0x202   :  { %v2547_v47 = vsel %vm2476_vm5, %v2531_v12, 0.0  ;;  %v2548_v49 = vsel %vm2476_vm5, %v2532_v22, 0.0  ;;  %v2550_v2 = vsel %vm2476_vm5, %v2533_v46, 0.0  ;;  %v2552_v1 = vsel %vm2476_vm5, %v2534_v48, 0.0 }
 0x203   :  { %v2549_v50 = vadd.f32 %v2548_v49, %v2547_v47  ;;  %v2554_v9 = vsel %vm2476_vm5, %v2535_v51, 0.0  ;;  %v2556_v11 = vsel %vm2476_vm5, %v2536_v5, 0.0  ;;  %v2539_v59 = vmul.f32 %v8643_v3, %v8643_v3  ;;  %v8720_v5 = vld [vmem:[#allocation2] sm:$0xf] }
 0x204   :  { %v2558_v13 = vsel %vm2476_vm5, %v2537_v8, 0.0  ;;  %v2540_v20 = vmul.f32 %v8646_v62, %v8646_v62  ;;  %v2560_v15 = vsel %vm2476_vm5, %v2538_v10, 0.0  ;;  %v2541_v18 = vmul.f32 %v8649_v63, %v8649_v63  ;;  %10058 = vst [vmem:[#allocation7_spill] sm:$0xff] %v8720_v5 }
 0x205   :  { %v2551_v0 = vadd.f32 %v2550_v2, %v2549_v50  ;;  %v2562_v19 = vsel %vm2476_vm5, %v2539_v59, 0.0  ;;  %v2542_v21 = vmul.f32 %v8652_v27, %v8652_v27  ;;  %v2543_v53 = vmul.f32 %v8660_v32, %v8660_v32 }
 0x206   :  { %v2564_v24 = vsel %vm2476_vm5, %v2540_v20, 0.0  ;;  %v2566_v26 = vsel %vm2476_vm5, %v2541_v18, 0.0  ;;  %v2544_v30 = vmul.f32 %v8662_v37, %v8662_v37  ;;  %v2545_v33 = vmul.f32 %v8665_v17, %v8665_v17  ;;  %v2474_v18 = vld [vmem:[%s10035_s5] sm:$0x1] }
 0x207   :  { %v2553_v7 = vadd.f32 %v2552_v1, %v2551_v0  ;;  %v2568_v54 = vsel %vm2476_vm5, %v2542_v21, 0.0  ;;  %v2570_v34 = vsel %vm2476_vm5, %v2543_v53, 0.0  ;;  %v2546_v35 = vmul.f32 %v8668_v28, %v8668_v28 }
 0x208   :  { %v2572_v55 = vsel %vm2476_vm5, %v2544_v30, 0.0  ;;  %v2574_v12 = vsel %vm2476_vm5, %v2545_v33, 0.0  ;;  %v3139_v8 = vshrl.u32 %v8720_v5, 16  ;;  %v8747_v33 = vsel %vm3412_vm13, %v8657_v23, 0 }
 0x209   :  { %v2555_v56 = vadd.f32 %v2554_v9, %v2553_v7  ;;  %v2576_v46 = vsel %vm2476_vm5, %v2546_v35, 0.0  ;;  %v3142_v9 = vshll.u32 %v8720_v5, 16 }
 0x20a   :  { %v3141_v10 = vrot.slane %v3139_v8, 4 }
 0x20b   :  { %v2557_v58 = vadd.f32 %v2556_v11, %v2555_v56  ;;  %v2588_v56 = vlaneseq  ;;  %v3144_v11 = vrot.slane %v3142_v9, 5 }
 0x20d   :  { %v2559_v14 = vadd.f32 %v2558_v13, %v2557_v58  ;;  %v3113_v58 = vld [vmem:[#allocation2 + $0x50] sm:$0xf]  ;;  %v2589_v59 = vshrl.u32 %v2588_v56, 7  ;;  %v3122_v13 = vld [vmem:[#allocation2 + $0x4] sm:$0x1] }
 0x20e   :  { %v3148_v20 = vshll.u32 %v3122_v13, 16 }
 0x20f   :  { %v2561_v16 = vadd.f32 %v2560_v15, %v2559_v14  ;;  %v3145_v14 = vor.u32 %v3144_v11, %v3141_v10  ;;  %v3251_v15 = vshrl.u32 %v3113_v58, 16 }
 0x210   :  { %v8734_v53 = vrot.slane %v3148_v20, 5 }
 0x211   :  { %v2563_v52 = vadd.f32 %v2562_v19, %v2561_v16  ;;  %v3254_v16 = vshll.u32 %v3113_v58, 16  ;;  %v8727_v19 = vld [vmem:[#allocation2 + $0x54] sm:$0x1] }
 0x212   :  { %v3260_v21 = vshll.u32 %v8727_v19, 16 }
 0x213   :  { %v2565_v25 = vadd.f32 %v2564_v24, %v2563_v52  ;;  %v8729_v52 = vsub.s32 0, %v2589_v59 }
 0x215   :  { %v2567_v29 = vadd.f32 %v2566_v26, %v2565_v25  ;;  %10059 = vst [vmem:[#allocation8_spill] sm:$0xff] %v8729_v52  ;;  %v8732_v25 = vrot.slane %v3145_v14, 4  ;;  %v8736_v26 = vrot.slane %v3251_v15, 4 }
 0x217   :  { %v2569_v31 = vadd.f32 %v2568_v54, %v2567_v29  ;;  %v8738_v29 = vrot.slane %v3254_v16, 5 }
 0x219   :  { %v2571_v36 = vadd.f32 %v2570_v34, %v2569_v31 }
 0x21b   :  { %v2573_v38 = vadd.f32 %v2572_v55, %v2571_v36  ;;  %v8751_v36 = vrot.slane %v3260_v21, 5 }
 0x21d   :  { %v2575_v22 = vadd.f32 %v2574_v12, %v2573_v38 }
 0x21f   :  { %v2577_v48 = vadd.f32 %v2576_v46, %v2575_v22  ;;  %v6526_v22 = vld [vmem:[%s10036_s6] ss:$0 sm:$0xff] }
 0x221   :  { %v2578_v47 = vrot.slane %v2577_v48, 4 }
 0x223   :  { %v2579_v49 = vadd.f32 %v2578_v47, %v2577_v48 }
 0x225   :  { %v2580_v50 = vrot.slane %v2579_v49, 2 }
 0x227   :  { %v2581_v51 = vadd.f32 %v2580_v50, %v2579_v49 }
 0x229   :  { %v2582_v2 = vrot.slane %v2581_v51, 1 }
 0x22b   :  { %v2583_v0 = vadd.f32 %v2582_v2, %v2581_v51 }
 0x22d   :  { %v2584_v1 = vmul.f32 0.0078125, %v2583_v0 }
 0x22f   :  { %v2585_v7 = vadd.f32 1e-05, %v2584_v1 }
 0x231   :  { %7651 = vrsqrt.f32 %v2585_v7 }
 0x23b   :  { %v7652_v24 = vpop.eup %7651 }
 0x23c   :  { %v2587_v30 = vmul.f32 %v7652_v24, %v2474_v18 }
 0x23e   :  { %v2591_v54 = vrot.slane %v2587_v30, %v8729_v52  ;;  %v3054_v52 = vld [vmem:[#allocation2 + $0x44] sm:$0x1] }
 0x240   :  { %v2592_v35 = vmul.f32 %v2591_v54, %v8619_v39  ;;  %v2593_v55 = vmul.f32 %v2591_v54, %v8622_v40  ;;  %v2594_v38 = vmul.f32 %v2591_v54, %v8625_v41  ;;  %v2595_v12 = vmul.f32 %v2591_v54, %v8628_v42 }
 0x241   :  { %v2596_v23 = vmul.f32 %v2591_v54, %v8631_v43  ;;  %v2597_v46 = vmul.f32 %v2591_v54, %v8634_v44  ;;  %v2598_v48 = vmul.f32 %v2591_v54, %v8637_v45  ;;  %v2599_v47 = vmul.f32 %v2591_v54, %v8640_v61 }
 0x242   :  { %v2600_v39 = vmul.f32 %v2591_v54, %v8643_v3  ;;  %v2601_v40 = vmul.f32 %v2591_v54, %v8646_v62  ;;  %v2602_v41 = vmul.f32 %v2591_v54, %v8649_v63  ;;  %v2603_v42 = vmul.f32 %v2591_v54, %v8652_v27 }
 0x243   :  { %v2604_v49 = vmul.f32 %v2591_v54, %v8660_v32  ;;  %v2605_v50 = vmul.f32 %v2591_v54, %v8662_v37  ;;  %v2606_v43 = vmul.f32 %v2591_v54, %v8665_v17  ;;  %v2607_v44 = vmul.f32 %v2591_v54, %v8668_v28 }
 0x244   :  { %v2614_v51 = vadd.f32 %v6526_v22, %v2592_v35  ;;  %v2615_v45 = vadd.f32 %v6526_v22, %v2593_v55  ;;  %v2616_v2 = vadd.f32 %v6526_v22, %v2594_v38  ;;  %v2617_v61 = vadd.f32 %v6526_v22, %v2595_v12 }
 0x245   :  { %v2618_v0 = vadd.f32 %v6526_v22, %v2596_v23  ;;  %v2619_v3 = vadd.f32 %v6526_v22, %v2597_v46  ;;  %v2620_v1 = vadd.f32 %v6526_v22, %v2598_v48  ;;  %v2621_v62 = vadd.f32 %v6526_v22, %v2599_v47 }
 0x246   :  { %v2622_v7 = vadd.f32 %v6526_v22, %v2600_v39  ;;  %v2623_v63 = vadd.f32 %v6526_v22, %v2601_v40  ;;  %v2624_v8 = vadd.f32 %v6526_v22, %v2602_v41  ;;  %v2625_v27 = vadd.f32 %v6526_v22, %v2603_v42 }
 0x247   :  { %v2626_v9 = vadd.f32 %v6526_v22, %v2604_v49  ;;  %v2627_v32 = vadd.f32 %v6526_v22, %v2605_v50  ;;  %v2628_v56 = vadd.f32 %v6526_v22, %v2606_v43  ;;  %v2629_v37 = vadd.f32 %v6526_v22, %v2607_v44 }
 0x248   :  { %v2630_v10 = vmax.f32 %v2614_v51, 0.0  ;;  %v2631_v17 = vmax.f32 %v2615_v45, 0.0  ;;  %v2632_v11 = vmax.f32 %v2616_v2, 0.0  ;;  %v2633_v28 = vmax.f32 %v2617_v61, 0.0 }
 0x249   :  { %v2634_v58 = vmax.f32 %v2618_v0, 0.0  ;;  %v2635_v59 = vmax.f32 %v2619_v3, 0.0  ;;  %v2636_v13 = vmax.f32 %v2620_v1, 0.0  ;;  %v2637_v14 = vmax.f32 %v2621_v62, 0.0 }
 0x24a   :  { %v2638_v20 = vmax.f32 %v2622_v7, 0.0  ;;  %v2639_v15 = vmax.f32 %v2623_v63, 0.0  ;;  %v2640_v16 = vmax.f32 %v2624_v8, 0.0  ;;  %v2641_v18 = vmax.f32 %v2625_v27, 0.0 }
 0x24b   :  { %v2642_v21 = vmax.f32 %v2626_v9, 0.0  ;;  %v2643_v24 = vmax.f32 %v2627_v32, 0.0  ;;  %v2644_v30 = vmax.f32 %v2628_v56, 0.0  ;;  %v2645_v54 = vmax.f32 %v2629_v37, 0.0 }
 0x24c   :  { %v6761_v35 = vpack.c.bf16 %v2630_v10, %v2630_v10  ;;  %v6762_v55 = vpack.c.bf16 %v2631_v17, %v2631_v17  ;;  %v6763_v38 = vpack.c.bf16 %v2632_v11, %v2632_v11  ;;  %v6764_v12 = vpack.c.bf16 %v2633_v28, %v2633_v28 }
 0x24d   :  { %v6765_v22 = vpack.c.bf16 %v2634_v58, %v2634_v58  ;;  %v6766_v23 = vpack.c.bf16 %v2635_v59, %v2635_v59  ;;  %v6767_v46 = vpack.c.bf16 %v2636_v13, %v2636_v13  ;;  %v6768_v48 = vpack.c.bf16 %v2637_v14, %v2637_v14  ;;  %v3045_v13 = vld [vmem:[#allocation2 + $0x38] sm:$0xf] }
 0x24e   :  { %v6769_v47 = vpack.c.bf16 %v2638_v20, %v2638_v20  ;;  %v8772_v39 = vpack.c.bf16 %v2639_v15, %v2639_v15  ;;  %v8774_v40 = vpack.c.bf16 %v2640_v16, %v2640_v16  ;;  %v8776_v41 = vpack.c.bf16 %v2641_v18, %v2641_v18 }
 0x24f   :  { %v8778_v42 = vpack.c.bf16 %v2642_v21, %v2642_v21  ;;  %v8780_v49 = vpack.c.bf16 %v2643_v24, %v2643_v24  ;;  %v8782_v50 = vpack.c.bf16 %v2644_v30, %v2644_v30  ;;  %v8784_v43 = vpack.c.bf16 %v2645_v54, %v2645_v54 }
 0x250   :  { %v2847_v44 = vshrl.u32 %v6761_v35, 16  ;;  %v2850_v51 = vshll.u32 %v6761_v35, 16  ;;  %v2855_v45 = vshrl.u32 %v6762_v55, 16  ;;  %v2858_v2 = vshll.u32 %v6762_v55, 16  ;;  %v3042_v35 = vld [vmem:[#allocation2 + $0x34] sm:$0x1] }
 0x251   :  { %v2863_v61 = vshrl.u32 %v6763_v38, 16  ;;  %v2866_v0 = vshll.u32 %v6763_v38, 16  ;;  %v2871_v3 = vshrl.u32 %v6764_v12, 16  ;;  %v2874_v1 = vshll.u32 %v6764_v12, 16  ;;  %v3039_v38 = vld [vmem:[#allocation2 + $0x30] sm:$0xf] }
 0x252   :  { %v8786_v62 = vrot.slane %v2847_v44, 7  ;;  %v8788_v7 = vrot.slane %v2855_v45, 7  ;;  %v2879_v63 = vshrl.u32 %v6765_v22, 16  ;;  %v2882_v8 = vshll.u32 %v6765_v22, 16 }
 0x253   :  { %v8790_v27 = vrot.slane %v2863_v61, 7  ;;  %v8792_v9 = vrot.slane %v2871_v3, 7  ;;  %v2887_v32 = vshrl.u32 %v6766_v23, 16  ;;  %v2890_v56 = vshll.u32 %v6766_v23, 16 }
 0x254   :  { %v8795_v37 = vor.u32 %v2850_v51, %v8786_v62  ;;  %v8799_v17 = vor.u32 %v2858_v2, %v8788_v7  ;;  %v8810_v14 = vrot.slane %v2879_v63, 7  ;;  %v2895_v15 = vshrl.u32 %v6767_v46, 16 }
 0x255   :  { %v8803_v28 = vor.u32 %v2866_v0, %v8790_v27  ;;  %v8807_v59 = vor.u32 %v2874_v1, %v8792_v9  ;;  %v8812_v20 = vrot.slane %v2887_v32, 7  ;;  %v2898_v16 = vshll.u32 %v6767_v46, 16 }
 0x256   :  { %v2903_v18 = vshrl.u32 %v6768_v48, 16  ;;  %v2906_v21 = vshll.u32 %v6768_v48, 16  ;;  %v2911_v24 = vshrl.u32 %v6769_v47, 16  ;;  %v2914_v30 = vshll.u32 %v6769_v47, 16 }
 0x257   :  { %v8815_v54 = vor.u32 %v2882_v8, %v8810_v14  ;;  %v8819_v55 = vor.u32 %v2890_v56, %v8812_v20  ;;  %v8822_v12 = vrot.slane %v2895_v15, 7  ;;  %v2919_v46 = vshrl.u32 %v8772_v39, 16  ;;  %v3009_v15 = vld [vmem:[#allocation2 + $0x8] sm:$0xf] }
 0x258   :  { %v8824_v22 = vrot.slane %v2903_v18, 7  ;;  %v8826_v23 = vrot.slane %v2911_v24, 7  ;;  %v2922_v48 = vshll.u32 %v8772_v39, 16  ;;  %v2927_v47 = vshrl.u32 %v8774_v40, 16  ;;  %v3024_v24 = vld [vmem:[#allocation2 + $0x1c] sm:$0x1] }
 0x259   :  { %v2930_v44 = vshll.u32 %v8774_v40, 16  ;;  %v2935_v51 = vshrl.u32 %v8776_v41, 16  ;;  %v8834_v45 = vor.u32 %v2898_v16, %v8822_v12  ;;  %v8845_v1 = vrot.slane %v2919_v46, 7  ;;  %v3018_v46 = vld [vmem:[#allocation2 + $0x14] sm:$0x1] }
 0x25a   :  { %v8838_v61 = vor.u32 %v2906_v21, %v8824_v22  ;;  %v8842_v3 = vor.u32 %v2914_v30, %v8826_v23  ;;  %v8847_v40 = vrot.slane %v2927_v47, 7  ;;  %v2938_v8 = vshll.u32 %v8776_v41, 16  ;;  %v3015_v30 = vld [vmem:[#allocation2 + $0x10] sm:$0xf]  ;;  %v3027_v18 = vld [vmem:[#allocation2 + $0x20] sm:$0xf] }
 0x25b   :  { %v8849_v63 = vrot.slane %v2935_v51, 7  ;;  %v2943_v32 = vshrl.u32 %v8778_v42, 16  ;;  %v2946_v56 = vshll.u32 %v8778_v42, 16  ;;  %v8855_v16 = vor.u32 %v2922_v48, %v8845_v1  ;;  %v3021_v48 = vld [vmem:[#allocation2 + $0x18] sm:$0xf] }
 0x25c   :  { %v8859_v21 = vor.u32 %v2930_v44, %v8847_v40  ;;  %v2951_v42 = vshrl.u32 %v8780_v49, 16  ;;  %v2954_v31 = vshll.u32 %v8780_v49, 16  ;;  %v2959_v34 = vshrl.u32 %v8782_v50, 16  ;;  %v3030_v39 = vld [vmem:[#allocation2 + $0x24] sm:$0x1] }
 0x25d   :  { %v8863_v47 = vor.u32 %v2938_v8, %v8849_v63  ;;  %v8866_v51 = vrot.slane %v2943_v32, 7  ;;  %v2962_v44 = vshll.u32 %v8782_v50, 16  ;;  %v2967_v10 = vshrl.u32 %v8784_v43, 16  ;;  %v3033_v8 = vld [vmem:[#allocation2 + $0x28] sm:$0xf] }
 0x25e   :  { %v8877_v41 = vrot.slane %v2951_v42, 7  ;;  %v2970_v2 = vshll.u32 %v8784_v43, 16  ;;  %v3036_v49 = vld [vmem:[#allocation2 + $0x2c] sm:$0x1]  ;;  %v8880_v50 = vrot.slane %v2959_v34, 7  ;;  %v3010_v11 = vsel %vm8596_vm12, %v8795_v37, %v3009_v15 }
 0x25f   :  { %v8874_v0 = vor.u32 %v2946_v56, %v8866_v51  ;;  %v8882_v58 = vrot.slane %v2967_v10, 7  ;;  %v3016_v56 = vsel %vm8596_vm12, %v8799_v17, %v3015_v30  ;;  %v3048_v42 = vld [vmem:[#allocation2 + $0x3c] sm:$0x1]  ;;  %v3051_v32 = vld [vmem:[#allocation2 + $0x40] sm:$0xf]  ;;  %v10060_v10 = vrot.slane %v8788_v7, 4 }
 0x260   :  { %v3057_v43 = vld [vmem:[#allocation2 + $0x58] sm:$0xf]  ;;  %v8891_v4 = vor.u32 %v2954_v31, %v8877_v41  ;;  %3017 = vst [vmem:[#allocation2 + $0x10] sm:$0xf] %v3016_v56  ;;  %v3022_v37 = vsel %vm8596_vm12, %v8803_v28, %v3021_v48  ;;  %v3060_v17 = vld [vmem:[#allocation2 + $0x5c] sm:$0x1]  ;;  %v8902_v30 = vor.u32 %v2962_v44, %v8880_v50 }
 0x261   :  { %v3019_v5 = vsel %vm8462_vm8, %v10060_v10, %v3018_v46  ;;  %v3063_v15 = vld [vmem:[#allocation2 + $0x60] sm:$0xf]  ;;  %3011 = vst [vmem:[#allocation2 + $0x8] sm:$0xf] %v3010_v11  ;;  %v2965_v31 = vrot.slane %v8880_v50, 4  ;;  %v8906_v34 = vor.u32 %v2970_v2, %v8882_v58  ;;  %v10061_v10 = vrot.slane %v8790_v27, 4 }
 0x262   :  { %3020 = vst [vmem:[#allocation2 + $0x14] sm:$0x1] %v3019_v5  ;;  %3023 = vst [vmem:[#allocation2 + $0x18] sm:$0xf] %v3022_v37  ;;  %v3066_v46 = vld [vmem:[#allocation2 + $0x64] sm:$0x1]  ;;  %v3028_v11 = vsel %vm8596_vm12, %v8807_v59, %v3027_v18  ;;  %v3034_v5 = vsel %vm8596_vm12, %v8815_v54, %v3033_v8  ;;  %v3046_v18 = vsel %vm8596_vm12, %v8834_v45, %v3045_v13 }
 0x263   :  { %v3069_v56 = vld [vmem:[#allocation2 + $0x68] sm:$0xf]  ;;  %v3025_v28 = vsel %vm8462_vm8, %v10061_v10, %v3024_v24  ;;  %v10062_v48 = vrot.slane %v8792_v9, 4  ;;  %v3072_v44 = vld [vmem:[#allocation2 + $0x6c] sm:$0x1]  ;;  %v10063_v27 = vrot.slane %v8810_v14, 4  ;;  %v3040_v9 = vsel %vm8596_vm12, %v8819_v55, %v3039_v38 }
 0x264   :  { %v3075_v37 = vld [vmem:[#allocation2 + $0x70] sm:$0xf]  ;;  %v3078_v7 = vld [vmem:[#allocation2 + $0x74] sm:$0x1]  ;;  %3026 = vst [vmem:[#allocation2 + $0x1c] sm:$0x1] %v3025_v28  ;;  %v3058_v38 = vsel %vm8596_vm12, %v8842_v3, %v3057_v43 }
 0x265   :  { %v3031_v2 = vsel %vm8462_vm8, %v10062_v48, %v3030_v39  ;;  %3029 = vst [vmem:[#allocation2 + $0x20] sm:$0xf] %v3028_v11  ;;  %3035 = vst [vmem:[#allocation2 + $0x28] sm:$0xf] %v3034_v5  ;;  %v3037_v59 = vsel %vm8462_vm8, %v10063_v27, %v3036_v49  ;;  %v10064_v39 = vrot.slane %v8812_v20, 4  ;;  %v10065_v14 = vrot.slane %v8822_v12, 4 }
 0x266   :  { %v3081_v24 = vld [vmem:[#allocation2 + $0x78] sm:$0xf]  ;;  %v3084_v8 = vld [vmem:[#allocation2 + $0x7c] sm:$0x1]  ;;  %v3087_v10 = vld [vmem:[#allocation2 + $0x80] sm:$0xf]  ;;  %v3052_v20 = vsel %vm8596_vm12, %v8838_v61, %v3051_v32  ;;  %v3070_v32 = vsel %vm8596_vm12, %v8859_v21, %v3069_v56 }
 0x267   :  { %v3043_v54 = vsel %vm8462_vm8, %v10064_v39, %v3042_v35  ;;  %3032 = vst [vmem:[#allocation2 + $0x24] sm:$0x1] %v3031_v2  ;;  %3041 = vst [vmem:[#allocation2 + $0x30] sm:$0xf] %v3040_v9  ;;  %v3049_v55 = vsel %vm8462_vm8, %v10065_v14, %v3048_v42  ;;  %v10066_v35 = vrot.slane %v8824_v22, 4  ;;  %v10067_v12 = vrot.slane %v8826_v23, 4 }
 0x268   :  { %3047 = vst [vmem:[#allocation2 + $0x38] sm:$0xf] %v3046_v18  ;;  %v3090_v45 = vld [vmem:[#allocation2 + $0x84] sm:$0x1]  ;;  %v3093_v49 = vld [vmem:[#allocation2 + $0x88] sm:$0xf]  ;;  %v10075_v9 = vor.u32 %v8738_v29, %v8736_v26 }
 0x269   :  { %v3055_v13 = vsel %vm8462_vm8, %v10066_v35, %v3054_v52  ;;  %v3096_v28 = vld [vmem:[#allocation2 + $0x8c] sm:$0x1]  ;;  %3038 = vst [vmem:[#allocation2 + $0x2c] sm:$0x1] %v3037_v59  ;;  %3044 = vst [vmem:[#allocation2 + $0x34] sm:$0x1] %v3043_v54  ;;  %v3061_v22 = vsel %vm8462_vm8, %v10067_v12, %v3060_v17  ;;  %v3064_v52 = vsel %vm8596_vm12, %v8855_v16, %v3063_v15 }
 0x26a   :  { %3050 = vst [vmem:[#allocation2 + $0x3c] sm:$0x1] %v3049_v55  ;;  %3056 = vst [vmem:[#allocation2 + $0x44] sm:$0x1] %v3055_v13  ;;  %v10068_v61 = vrot.slane %v8845_v1, 4  ;;  %v10069_v17 = vrot.slane %v8847_v40, 4  ;;  %v3076_v16 = vsel %vm8596_vm12, %v8863_v47, %v3075_v37 }
 0x26b   :  { %3059 = vst [vmem:[#allocation2 + $0x58] sm:$0xf] %v3058_v38  ;;  %v3099_v42 = vld [vmem:[#allocation2 + $0x90] sm:$0xf]  ;;  %v3102_v43 = vld [vmem:[#allocation2 + $0x94] sm:$0x1] }
 0x26c   :  { %v3067_v3 = vsel %vm8462_vm8, %v10068_v61, %v3066_v46  ;;  %3053 = vst [vmem:[#allocation2 + $0x40] sm:$0xf] %v3052_v20  ;;  %v3012_v23 = vld [vmem:[#allocation2 + $0xc] sm:$0x1]  ;;  %3062 = vst [vmem:[#allocation2 + $0x5c] sm:$0x1] %v3061_v22  ;;  %v3073_v1 = vsel %vm8462_vm8, %v10069_v17, %v3072_v44  ;;  %v3082_v46 = vsel %vm8596_vm12, %v8874_v0, %v3081_v24 }
 0x26d   :  { %3065 = vst [vmem:[#allocation2 + $0x60] sm:$0xf] %v3064_v52  ;;  %3068 = vst [vmem:[#allocation2 + $0x64] sm:$0x1] %v3067_v3  ;;  %v10070_v15 = vrot.slane %v8849_v63, 4  ;;  %v10071_v40 = vrot.slane %v8866_v51, 4  ;;  %v3088_v63 = vsel %vm8596_vm12, %v8891_v4, %v3087_v10  ;;  %v3094_v0 = vsel %vm8596_vm12, %v8902_v30, %v3093_v49 }
 0x26e   :  { %3071 = vst [vmem:[#allocation2 + $0x68] sm:$0xf] %v3070_v32  ;;  %3074 = vst [vmem:[#allocation2 + $0x6c] sm:$0x1] %v3073_v1  ;;  %v10072_v47 = vrot.slane %v8877_v41, 4  ;;  %v3097_v4 = vsel %vm8462_vm8, %v2965_v31, %v3096_v28  ;;  %v3100_v41 = vsel %vm8596_vm12, %v8906_v34, %v3099_v42  ;;  %v10073_v51 = vrot.slane %v8882_v58, 4 }
 0x26f   :  { %v3079_v21 = vsel %vm8462_vm8, %v10070_v15, %v3078_v7  ;;  %3077 = vst [vmem:[#allocation2 + $0x70] sm:$0xf] %v3076_v16  ;;  %3083 = vst [vmem:[#allocation2 + $0x78] sm:$0xf] %v3082_v46  ;;  %v3085_v56 = vsel %vm8462_vm8, %v10071_v40, %v3084_v8  ;;  %v8993_v11 = vld [vmem:[#allocation2 + $0x8] sm:$0xf] }
 0x270   :  { %3080 = vst [vmem:[#allocation2 + $0x74] sm:$0x1] %v3079_v21  ;;  %v3091_v7 = vsel %vm8462_vm8, %v10072_v47, %v3090_v45  ;;  %v8995_v48 = vld [vmem:[#allocation2 + $0x10] sm:$0xf]  ;;  %3086 = vst [vmem:[#allocation2 + $0x7c] sm:$0x1] %v3085_v56  ;;  %v3103_v30 = vsel %vm8462_vm8, %v10073_v51, %v3102_v43 }
 0x271   :  { %3089 = vst [vmem:[#allocation2 + $0x80] sm:$0xf] %v3088_v63  ;;  %3092 = vst [vmem:[#allocation2 + $0x84] sm:$0x1] %v3091_v7  ;;  %v10074_v2 = vrot.slane %v8786_v62, 4  ;;  %v3153_v60 = vshrl.u32 %v8993_v11, 16 }
 0x272   :  { %3095 = vst [vmem:[#allocation2 + $0x88] sm:$0xf] %v3094_v0  ;;  %v9012_v44 = vld [vmem:[#allocation2 + $0x18] sm:$0xf]  ;;  %v9014_v50 = vld [vmem:[#allocation2 + $0x14] sm:$0x1] }
 0x273   :  { %v3013_v5 = vsel %vm8462_vm8, %v10074_v2, %v3012_v23  ;;  %3098 = vst [vmem:[#allocation2 + $0x8c] sm:$0x1] %v3097_v4  ;;  %3101 = vst [vmem:[#allocation2 + $0x90] sm:$0xf] %v3100_v41  ;;  %v3156_v58 = vshll.u32 %v8993_v11, 16  ;;  %v3167_v34 = vshrl.u32 %v8995_v48, 16 }
 0x274   :  { %3104 = vst [vmem:[#allocation2 + $0x94] sm:$0x1] %v3103_v30  ;;  %3014 = vst [vmem:[#allocation2 + $0xc] sm:$0x1] %v3013_v5  ;;  %v3170_v31 = vshll.u32 %v8995_v48, 16  ;;  %v3176_v37 = vshll.u32 %v9014_v50, 16 }
 0x275   :  { %v9020_v62 = vld [vmem:[#allocation2 + $0x1c] sm:$0x1]  ;;  %v3181_v27 = vshrl.u32 %v9012_v44, 16  ;;  %v3184_v59 = vshll.u32 %v9012_v44, 16  ;;  %v9028_v39 = vrot.slane %v10075_v9, 4  ;;  %v3155_v54 = vrot.slane %v3153_v60, 4 }
 0x276   :  { %v3158_v18 = vrot.slane %v3156_v58, 5  ;;  %v3169_v24 = vrot.slane %v3167_v34, 4  ;;  %v3172_v8 = vrot.slane %v3170_v31, 5  ;;  %v9030_v10 = vld [vmem:[#allocation2 + $0x20] sm:$0xf]  ;;  %v3178_v14 = vrot.slane %v3176_v37, 5 }
 0x277   :  { %v3183_v55 = vrot.slane %v3181_v27, 4  ;;  %v3186_v20 = vrot.slane %v3184_v59, 5  ;;  %v3190_v35 = vshll.u32 %v9020_v62, 16  ;;  %v9033_v13 = vld [vmem:[#allocation2 + $0x28] sm:$0xf]  ;;  %v3195_v26 = vshrl.u32 %v9030_v10, 16 }
 0x278   :  { %v3159_v38 = vor.u32 %v3158_v18, %v3155_v54  ;;  %v3173_v45 = vor.u32 %v3172_v8, %v3169_v24  ;;  %v9035_v49 = vld [vmem:[#allocation2 + $0x24] sm:$0x1]  ;;  %v3198_v29 = vshll.u32 %v9030_v10, 16  ;;  %v9039_v22 = vld [vmem:[#allocation2 + $0x2c] sm:$0x1]  ;;  %v3209_v61 = vshrl.u32 %v9033_v13, 16 }
 0x279   :  { %v3187_v28 = vor.u32 %v3186_v20, %v3183_v55  ;;  %v3192_v12 = vrot.slane %v3190_v35, 5  ;;  %v3204_v52 = vshll.u32 %v9035_v49, 16  ;;  %v3197_v42 = vrot.slane %v3195_v26, 4  ;;  %v9043_v23 = vld [vmem:[#allocation2 + $0x30] sm:$0xf] }
 0x27a   :  { %v3160_v3 = vrot.slane %v3159_v38, 4  ;;  %v3174_v32 = vrot.slane %v3173_v45, 4  ;;  %v3200_v43 = vrot.slane %v3198_v29, 5  ;;  %v3211_v15 = vrot.slane %v3209_v61, 4  ;;  %v9052_v47 = vld [vmem:[#allocation2 + $0x34] sm:$0x1] }
 0x27b   :  { %v9045_v17 = vld [vmem:[#allocation2 + $0xc] sm:$0x1]  ;;  %v3188_v1 = vrot.slane %v3187_v28, 4  ;;  %v3206_v16 = vrot.slane %v3204_v52, 5  ;;  %v3212_v21 = vshll.u32 %v9033_v13, 16  ;;  %v3218_v63 = vshll.u32 %v9039_v22, 16 }
 0x27c   :  { %v3162_v46 = vshll.u32 %v9045_v17, 16  ;;  %v3179_v40 = vsel %vm7849_vm4, %v3174_v32, %v3178_v14  ;;  %v3201_v56 = vor.u32 %v3200_v43, %v3197_v42  ;;  %v9056_v4 = vld [vmem:[#allocation2 + $0x38] sm:$0xf]  ;;  %v3223_v41 = vshrl.u32 %v9043_v23, 16  ;;  %v9060_v58 = vld [vmem:[#allocation2 + $0x3c] sm:$0x1] }
 0x27d   :  { %v3193_v7 = vsel %vm7849_vm4, %v3188_v1, %v3192_v12  ;;  %v3214_v0 = vrot.slane %v3212_v21, 5  ;;  %v3226_v51 = vshll.u32 %v9043_v23, 16  ;;  %v3220_v60 = vrot.slane %v3218_v63, 5  ;;  %v9063_v59 = vld [vmem:[#allocation2 + $0x58] sm:$0xf] }
 0x27e   :  { %v3164_v30 = vrot.slane %v3162_v46, 5  ;;  %v6545_v2 = vcombine.low %v3179_v40, %v3193_v7  ;;  %v3202_v5 = vrot.slane %v3201_v56, 4  ;;  %v3225_v31 = vrot.slane %v3223_v41, 4  ;;  %v9071_v8 = vld [vmem:[#allocation2 + $0x5c] sm:$0x1] }
 0x27f   :  { %v3215_v34 = vor.u32 %v3214_v0, %v3211_v15  ;;  %v3228_v37 = vrot.slane %v3226_v51, 5  ;;  %v3232_v27 = vshll.u32 %v9052_v47, 16  ;;  %v3237_v18 = vshrl.u32 %v9056_v4, 16  ;;  %v9078_v45 = vld [vmem:[#allocation2 + $0x60] sm:$0xf] }
 0x280   :  { %v3165_v9 = vsel %vm7849_vm4, %v3160_v3, %v3164_v30  ;;  %v3207_v54 = vsel %vm7849_vm4, %v3202_v5, %v3206_v16  ;;  %v3240_v24 = vshll.u32 %v9056_v4, 16  ;;  %v10076_v14 = vsel %vm7849_vm4, %v8732_v25, %v8734_v53  ;;  %v9083_v26 = vld [vmem:[%s10037_s7 + $0x8] sm:$0xf]  ;;  %v9094_v42 = vld [vmem:[#allocation2 + $0x64] sm:$0x1] }
 0x281   :  { %v6544_v55 = vcombine.low %v10076_v14, %v3165_v9  ;;  %v3216_v20 = vrot.slane %v3215_v34, 4  ;;  %v3229_v35 = vor.u32 %v3228_v37, %v3225_v31  ;;  %v3234_v38 = vrot.slane %v3232_v27, 5  ;;  %v9087_v61 = vld [vmem:[#allocation2 + $0x68] sm:$0xf]  ;;  %v9104_v56 = vld [vmem:[#allocation2 + $0x6c] sm:$0x1] }
 0x282   :  { %v3239_v29 = vrot.slane %v3237_v18, 4  ;;  %v3242_v28 = vrot.slane %v3240_v24, 5  ;;  %v3246_v12 = vshll.u32 %v9060_v58, 16  ;;  %v3265_v52 = vshrl.u32 %v9063_v59, 16  ;;  %v9116_v5 = vld [vmem:[#allocation2 + $0x74] sm:$0x1] }
 0x283   :  { %7112 = vmatprep.mubr.msk.bf16.mxu1 %vm2476_vm5, %v6544_v55  ;;  %v3221_v25 = vsel %vm7849_vm4, %v3216_v20, %v3220_v60  ;;  %v3230_v53 = vrot.slane %v3229_v35, 4  ;;  %v3268_v3 = vshll.u32 %v9063_v59, 16  ;;  %v3274_v32 = vshll.u32 %v9071_v8, 16  ;;  %v9121_v27 = vld [vmem:[#allocation2 + $0x78] sm:$0xf] }
 0x284   :  { %7113 = vmatmul.mubr.msk.bf16.vlgmr.msra.gmra.mrb[8].mxu1 %vm2476_vm5, %v6545_v2  ;;  %v6546_v43 = vcombine.low %v3207_v54, %v3221_v25  ;;  %v3243_v1 = vor.u32 %v3242_v28, %v3239_v29  ;;  %v3263_v16 = vsel %vm7849_vm4, %v9028_v39, %v8751_v36  ;;  %v3267_v15 = vrot.slane %v3265_v52, 4  ;;  %v9111_v39 = vld [vmem:[#allocation2 + $0x70] sm:$0xf] }
 0x285   :  { %7129 = vmatpush3.bf16.msra.mxu1 %v8747_v33  ;;  %v3235_v21 = vsel %vm7849_vm4, %v3230_v53, %v3234_v38  ;;  %v3248_v46 = vrot.slane %v3246_v12, 5  ;;  %v3270_v40 = vrot.slane %v3268_v3, 5  ;;  %v3279_v63 = vshrl.u32 %v9078_v45, 16  ;;  %v3685_v38 = vld [vmem:[#allocation2 + $0x50] sm:$0xe] }
 0x286   :  { %7116 = vmatprep.mubr.msk.bf16.mxu1 %vm2476_vm5, %v6546_v43  ;;  %v3244_v7 = vrot.slane %v3243_v1, 4  ;;  %v3282_v0 = vshll.u32 %v9078_v45, 16  ;;  %v3288_v41 = vshll.u32 %v9094_v42, 16  ;;  %v3293_v36 = vshrl.u32 %v9087_v61, 16  ;;  %7560 = vmatprep.subr.msk.bf16.mxu1 %vm3412_vm13, %v9083_v26  ;;  %v9128_v12 = vld [vmem:[#allocation2 + $0x7c] sm:$0x1] }
 0x287   :  { %v3271_v33 = vor.u32 %v3270_v40, %v3267_v15  ;;  %v3276_v51 = vrot.slane %v3274_v32, 5  ;;  %v3281_v30 = vrot.slane %v3279_v63, 4  ;;  %v3296_v2 = vshll.u32 %v9087_v61, 16  ;;  %v9132_v53 = vld [vmem:[#allocation2 + $0x80] sm:$0xf] }
 0x288   :  { %v3249_v60 = vsel %vm7849_vm4, %v3244_v7, %v3248_v46  ;;  %v3284_v34 = vrot.slane %v3282_v0, 5  ;;  %v3295_v31 = vrot.slane %v3293_v36, 4  ;;  %v3302_v37 = vshll.u32 %v9104_v56, 16  ;;  %v9137_v0 = vld [vmem:[#allocation2 + $0x88] sm:$0xf] }
 0x289   :  { %v6547_v9 = vcombine.low %v3235_v21, %v3249_v60  ;;  %v3272_v54 = vrot.slane %v3271_v33, 4  ;;  %v3290_v18 = vrot.slane %v3288_v41, 5  ;;  %v3298_v24 = vrot.slane %v3296_v2, 5  ;;  %v9146_v2 = vld [vmem:[#allocation2 + $0x8c] sm:$0x1] }
 0x28a   :  { %v3285_v14 = vor.u32 %v3284_v34, %v3281_v30  ;;  %v3307_v55 = vshrl.u32 %v9111_v39, 16  ;;  %v3310_v20 = vshll.u32 %v9111_v39, 16  ;;  %v3316_v35 = vshll.u32 %v9116_v5, 16  ;;  %v9144_v30 = vld [vmem:[#allocation2 + $0x84] sm:$0x1] }
 0x28b   :  { %v3277_v29 = vsel %vm7849_vm4, %v3272_v54, %v3276_v51  ;;  %v3299_v28 = vor.u32 %v3298_v24, %v3295_v31  ;;  %v3321_v52 = vshrl.u32 %v9121_v27, 16  ;;  %v3324_v25 = vshll.u32 %v9121_v27, 16 }
 0x28c   :  { %7117 = vmatmul.mubr.msk.bf16.gmra.mrb[12].mxu1 %vm2476_vm5, %v6547_v9  ;;  %v6548_v3 = vcombine.low %v3263_v16, %v3277_v29  ;;  %v3286_v32 = vrot.slane %v3285_v14, 4  ;;  %v3309_v43 = vrot.slane %v3307_v55, 4  ;;  %v3312_v1 = vrot.slane %v3310_v20, 5 }
 0x28d   :  { %v3300_v15 = vrot.slane %v3299_v28, 4  ;;  %v3304_v21 = vrot.slane %v3302_v37, 5  ;;  %v3323_v46 = vrot.slane %v3321_v52, 4  ;;  %v3326_v40 = vrot.slane %v3324_v25, 5  ;;  %v3679_v28 = vld [vmem:[#allocation2 + $0x10] sm:$0xe] }
 0x28e   :  { %7120 = vmatprep.mubr.msk.bf16.mxu1 %vm2476_vm5, %v6548_v3  ;;  %v3313_v63 = vor.u32 %v3312_v1, %v3309_v43  ;;  %v3330_v7 = vshll.u32 %v9128_v12, 16  ;;  %v3335_v41 = vshrl.u32 %v9132_v53, 16  ;;  %v6584_v36 = vrot.slane %v3685_v38, 9  ;;  %v3680_v52 = vld [vmem:[#allocation2 + $0x18] sm:$0xe] }
 0x28f   :  { %v3291_v16 = vsel %vm7849_vm4, %v3286_v32, %v3290_v18  ;;  %v3305_v33 = vsel %vm7849_vm4, %v3300_v15, %v3304_v21  ;;  %v3327_v51 = vor.u32 %v3326_v40, %v3323_v46  ;;  %v3338_v60 = vshll.u32 %v9132_v53, 16  ;;  %v3681_v43 = vld [vmem:[#allocation2 + $0x20] sm:$0xe]  ;;  %v3682_v46 = vld [vmem:[#allocation2 + $0x28] sm:$0xe] }
 0x290   :  { %v3314_v34 = vrot.slane %v3313_v63, 4  ;;  %v3318_v31 = vrot.slane %v3316_v35, 5  ;;  %v3337_v37 = vrot.slane %v3335_v41, 4  ;;  %v3762_v9 = vrot.slane %v8727_v19, 5 }
 0x291   :  { %v3328_v54 = vrot.slane %v3327_v51, 4  ;;  %v3332_v24 = vrot.slane %v3330_v7, 5  ;;  %v3340_v14 = vrot.slane %v3338_v60, 5  ;;  %v3349_v18 = vshrl.u32 %v9137_v0, 16  ;;  %v3683_v7 = vld [vmem:[#allocation2 + $0x30] sm:$0xe] }
 0x292   :  { %v6549_v55 = vcombine.low %v3291_v16, %v3305_v33  ;;  %v3319_v20 = vsel %vm7849_vm4, %v3314_v34, %v3318_v31  ;;  %v3344_v38 = vshll.u32 %v9144_v30, 16  ;;  %v3352_v29 = vshll.u32 %v9137_v0, 16  ;;  %v3684_v34 = vld [vmem:[#allocation2 + $0x38] sm:$0xe] }
 0x293   :  { %v3333_v35 = vsel %vm7849_vm4, %v3328_v54, %v3332_v24  ;;  %v3341_v25 = vor.u32 %v3340_v14, %v3337_v37  ;;  %v3351_v19 = vrot.slane %v3349_v18, 4  ;;  %v3358_v3 = vshll.u32 %v9146_v2, 16  ;;  %v3686_v31 = vld [vmem:[#allocation2 + $0x58] sm:$0xe]  ;;  %v3687_v18 = vld [vmem:[#allocation2 + $0x60] sm:$0xe] }
 0x294   :  { %7121 = vmatmul.mubr.msk.bf16.gmra.mrb[16].mxu1 %vm2476_vm5, %v6549_v55  ;;  %v6550_v1 = vcombine.low %v3319_v20, %v3333_v35  ;;  %v3354_v15 = vrot.slane %v3352_v29, 5  ;;  %v3346_v40 = vrot.slane %v3344_v38, 5  ;;  %v9168_v41 = vsel %vm9160_vm2, %v6584_v36, %v3762_v9  ;;  %v10079_v55 = vld [vmem:[#allocation7_spill] sm:$0xff]  ;;  %v3689_v35 = vld [vmem:[#allocation2 + $0x70] sm:$0xe] }
 0x295   :  { %v3342_v21 = vrot.slane %v3341_v25, 4  ;;  %v3360_v16 = vrot.slane %v3358_v3, 5  ;;  %v6578_v33 = vrot.slane %v3679_v28, 9  ;;  %v3738_v51 = vrot.slane %v9014_v50, 5  ;;  %v3688_v38 = vld [vmem:[#allocation2 + $0x68] sm:$0xe] }
 0x296   :  { %7124 = vmatprep.mubr.msk.bf16.mxu1 %vm2476_vm5, %v6550_v1  ;;  %v3355_v63 = vor.u32 %v3354_v15, %v3351_v19  ;;  %v6579_v60 = vrot.slane %v3680_v52, 9  ;;  %v3742_v24 = vrot.slane %v9020_v62, 5  ;;  %v6580_v14 = vrot.slane %v3681_v43, 9  ;;  %v3690_v15 = vld [vmem:[#allocation2 + $0x78] sm:$0xe] }
 0x297   :  { %v3347_v37 = vsel %vm7849_vm4, %v3342_v21, %v3346_v40  ;;  %v6560_v20 = vcombine.low %v10079_v55, %v8993_v11  ;;  %v9178_v36 = vsel %vm9160_vm2, %v6578_v33, %v3738_v51  ;;  %v3746_v50 = vrot.slane %v9035_v49, 5  ;;  %v3691_v33 = vld [vmem:[#allocation2 + $0x80] sm:$0xe] }
 0x298   :  { %v3356_v54 = vrot.slane %v3355_v63, 4  ;;  %v6581_v9 = vrot.slane %v3682_v46, 9  ;;  %v9185_v28 = vsel %vm9160_vm2, %v6579_v60, %v3742_v24  ;;  %v3750_v62 = vrot.slane %v9039_v22, 5 }
 0x299   :  { %v6582_v52 = vrot.slane %v3683_v7, 9  ;;  %v6594_v25 = vcombine.low %v9178_v36, %v9185_v28  ;;  %v9192_v49 = vsel %vm9160_vm2, %v6580_v14, %v3746_v50  ;;  %v3754_v19 = vrot.slane %v9052_v47, 5  ;;  %v7641_v36 = vld [vmem:[%s10033_s3 + $0x68] ss:$8 sps:$4 sm:$0xff]   ;;  %v7642_v28 = vld [vmem:[%s10033_s3 + $0x78] ss:$8 sps:$4 sm:$0xff]  }
 0x29a   :  { %v3361_v29 = vsel %vm7849_vm4, %v3356_v54, %v3360_v16  ;;  %v9197_v3 = vsel %vm9160_vm2, %v6581_v9, %v3750_v62  ;;  %v6583_v43 = vrot.slane %v3684_v34, 9  ;;  %v3758_v1 = vrot.slane %v9060_v58, 5 }
 0x29b   :  { %v6551_v11 = vcombine.low %v3347_v37, %v3361_v29  ;;  %v6585_v22 = vrot.slane %v3686_v31, 9  ;;  %v6595_v21 = vcombine.low %v9192_v49, %v9197_v3  ;;  %v9205_v46 = vsel %vm9160_vm2, %v6582_v52, %v3754_v19  ;;  %v3692_v31 = vld [vmem:[#allocation2 + $0x88] sm:$0xe]  ;;  %v5926_v52 = vld [vmem:[%s10040_s10] sm:$0x3] }
 0x29c   :  { %v3766_v47 = vrot.slane %v9071_v8, 5  ;;  %v6586_v40 = vrot.slane %v3687_v18, 9  ;;  %v9211_v63 = vsel %vm9160_vm2, %v6583_v43, %v3758_v1  ;;  %v3770_v58 = vrot.slane %v9094_v42, 5  ;;  %7567 = vmatprep.subr.msk.bf16.mxu0 %vm146_vm0, %v5926_v52  ;;  %v7658_v43 = vld [vmem:[#allocation2 + $0x4] sm:$0x1] }
 0x29d   :  { %7125 = vmatmul.mubr.msk.bf16.gmra.mrb[20].mxu1 %vm2476_vm5, %v6551_v11  ;;  %v6587_v7 = vrot.slane %v3688_v38, 9  ;;  %v3774_v16 = vrot.slane %v9104_v56, 5  ;;  %v6596_v51 = vcombine.low %v9205_v46, %v9211_v63  ;;  %v6588_v8 = vrot.slane %v3689_v35, 9  ;;  %v3677_v35 = vld [vmem:[#allocation2] sm:$0xe] }
 0x29e   :  { %7130 = vmatprep.mubr.msk.bf16.mxu1 %vm2476_vm5, %v6560_v20  ;;  %v9219_v60 = vsel %vm9160_vm2, %v6585_v22, %v3766_v47  ;;  %v3778_v34 = vrot.slane %v9116_v5, 5  ;;  %v9226_v42 = vsel %vm9160_vm2, %v6586_v40, %v3770_v58  ;;  %v6589_v54 = vrot.slane %v3690_v15, 9  ;;  %v3678_v11 = vld [vmem:[#allocation2 + $0x8] sm:$0xe]  ;;  %v7638_v58 = vld [vmem:[%s10033_s3 + $0x30] ss:$8 sps:$4 sm:$0xff]  }
 0x29f   :  { %v6597_v37 = vcombine.low %v9168_v41, %v9219_v60  ;;  %v9230_v56 = vsel %vm9160_vm2, %v6587_v7, %v3774_v16  ;;  %v3782_v5 = vrot.slane %v9128_v12, 5  ;;  %v6590_v18 = vrot.slane %v3691_v33, 9  ;;  %v6609_v12 = vld [vmem:[%s10037_s7 + $0xc] sm:$0xf]  ;;  %v7637_v47 = vld [vmem:[%s10033_s3 + $0x20] ss:$8 sps:$4 sm:$0xff]  }
 0x2a0   :  { %v6598_v24 = vcombine.low %v9226_v42, %v9230_v56  ;;  %v9236_v14 = vsel %vm9160_vm2, %v6588_v8, %v3778_v34  ;;  %v3786_v55 = vrot.slane %v9144_v30, 5  ;;  %v6591_v20 = vrot.slane %v3692_v31, 9  ;;  %v7640_v16 = vld [vmem:[%s10033_s3 + $0x58] ss:$8 sps:$4 sm:$0xff]   ;;  %v2749_v3 = vld [vmem:[#allocation2 + $0x4c] sm:$0x1] }
 0x2a1   :  { %v3790_v50 = vrot.slane %v9146_v2, 5  ;;  %v6561_v9 = vcombine.low %v8995_v48, %v9012_v44  ;;  %v3843_v38 = vsel %vm3412_vm13, %v9083_v26, 0  ;;  %v9247_v29 = vsel %vm9160_vm2, %v6589_v54, %v3782_v5  ;;  %v7657_v26 = vld [vmem:[#allocation2 + $0x50] sm:$0xf]  ;;  %v2717_v49 = vld [vmem:[#allocation2 + $0x98] sm:$0x1] }
 0x2a2   :  { %v6562_v62 = vcombine.low %v9030_v10, %v9033_v13  ;;  %v6599_v30 = vcombine.low %v9236_v14, %v9247_v29  ;;  %v9258_v48 = vsel %vm9160_vm2, %v6590_v18, %v3786_v55  ;;  %v6563_v13 = vcombine.low %v9043_v23, %v9056_v4  ;;  %v7635_v23 = vld [vmem:[%s10033_s3] ss:$8 sps:$4 sm:$0xff]   ;;  %v4160_v42 = vld [vmem:[#allocation2 + $0x18] sm:$0xf]  ;;  %v9367_v54 = vld [vmem:[%s10037_s7 + $0x14] sm:$0xf] }
 0x2a3   :  { %v9262_v44 = vsel %vm9160_vm2, %v6591_v20, %v3790_v50  ;;  %v6564_v2 = vcombine.low %v7657_v26, %v9063_v59  ;;  %v6565_v19 = vcombine.low %v9078_v45, %v9087_v61  ;;  %v6566_v4 = vcombine.low %v9111_v39, %v9121_v27  ;;  %7274 = vmatprep.mubr.msk.bf16.mxu0 %vm121_vm1, %v7635_v23  ;;  %v7636_v27 = vld [vmem:[%s10033_s3 + $0x10] ss:$8 sps:$4 sm:$0xff]   ;;  %v4162_v56 = vld [vmem:[#allocation2 + $0x20] sm:$0xf]  ;;  %v4164_v29 = vld [vmem:[#allocation2 + $0x28] sm:$0xf] }
 0x2a4   :  { %v6600_v10 = vcombine.low %v9258_v48, %v9262_v44  ;;  %v6576_v59 = vrot.slane %v3677_v35, 9  ;;  %v3730_v1 = vrot.slane %v7658_v43, 5  ;;  %v6577_v22 = vrot.slane %v3678_v11, 9  ;;  %v7627_v33 = vld [vmem:[#allocation2 + $0x8] ss:$8 sps:$4 sm:$0xff]  }
 0x2a5   :  { %7131 = vmatmul.mubr.msk.bf16.vlgmr.msra.gmra.mrb[8].mxu1 %vm2476_vm5, %v6561_v9  ;;  %v3734_v15 = vrot.slane %v9045_v17, 5  ;;  %v5992_v39 = vsel %vm146_vm0, %v5926_v52, 0  ;;  %v6567_v17 = vcombine.low %v9132_v53, %v9137_v0  ;;  %v4041_v7 = vsel %vm3412_vm13, %v6609_v12, 0  ;;  %v7639_v53 = vld [vmem:[%s10033_s3 + $0x48] ss:$8 sps:$4 sm:$0xff]  }
 0x2a6   :  { %7134 = vmatprep.mubr.msk.bf16.mxu1 %vm2476_vm5, %v6562_v62  ;;  %7147 = vmatpush3.bf16.msra.mxu1 %v3843_v38  ;;  %v3731_v45 = vsel %vm9160_vm2, %v6576_v59, %v3730_v1  ;;  %v6626_v0 = vld [vmem:[%s10037_s7 + $0x10] sm:$0xf]  ;;  %v2750_v63 = vsel %vm8518_vm10, 0, %v2749_v3  ;;  %v7628_v60 = vld [vmem:[#allocation2 + $0x18] ss:$8 sps:$4 sm:$0xff]   ;;  %v4217_v55 = vshrl.u32 %v4160_v42, 16 }
 0x2a7   :  { %7561 = vmatprep.subr.msk.bf16.mxu1 %vm3412_vm13, %v6609_v12  ;;  %v3735_v61 = vsel %vm9160_vm2, %v6577_v22, %v3734_v15  ;;  %7273 = vmatpush3.bf16.msra.mxu0 %v5992_v39  ;;  %2751 = vst [vmem:[#allocation2 + $0x4c] sm:$0x1] %v2750_v63  ;;  %v7629_v31 = vld [vmem:[#allocation2 + $0x28] ss:$8 sps:$4 sm:$0xff]   ;;  %v4463_v6 = vsel %vm3412_vm13, %v6626_v0, 0  ;;  %v4220_v20 = vshll.u32 %v4160_v42, 16 }
 0x2a8   :  { %v6593_v40 = vcombine.low %v3731_v45, %v3735_v61  ;;  %v4231_v50 = vshrl.u32 %v4162_v56, 16  ;;  %v4234_v9 = vshll.u32 %v4162_v56, 16  ;;  %v7630_v38 = vld [vmem:[#allocation2 + $0x38] ss:$8 sps:$4 sm:$0xff]   ;;  %v9373_v62 = vld [vmem:[#allocation2 + $0xc] sm:$0x1] }
 0x2a9   :  { %v9375_v12 = vld [vmem:[#allocation2 + $0x14] sm:$0x1]  ;;  %v4222_v26 = vrot.slane %v4220_v20, 5  ;;  %v7631_v35 = vld [vmem:[#allocation2 + $0x58] ss:$8 sps:$4 sm:$0xff]   ;;  %v4245_v11 = vshrl.u32 %v4164_v29, 16 }
 0x2aa   :  { %7275 = vmatmul.mubr.msk.bf16.vlgmr.msra.gmra.mrb[16].mxu0 %vm121_vm1, %v7636_v27  ;;  %v4236_v52 = vrot.slane %v4234_v9, 5  ;;  %v4198_v23 = vshll.u32 %v9373_v62, 16  ;;  %v4212_v59 = vshll.u32 %v9375_v12, 16  ;;  %v9386_v15 = vld [vmem:[#allocation2 + $0x24] sm:$0x1]  ;;  %v4741_v46 = vsel %vm3412_vm13, %v9367_v54, 0 }
 0x2ab   :  { %7278 = vmatprep.mubr.msk.bf16.mxu0 %vm121_vm1, %v7637_v47  ;;  %v4247_v39 = vrot.slane %v4245_v11, 4  ;;  %v4172_v63 = vld [vmem:[#allocation2 + $0x58] sm:$0xf]  ;;  %v7634_v11 = vld [vmem:[#allocation2 + $0x88] ss:$8 sps:$4 sm:$0xff]  }
 0x2ad   :  { %7135 = vmatmul.mubr.msk.bf16.gmra.mrb[12].mxu1 %vm2476_vm5, %v6563_v13  ;;  %v4219_v13 = vrot.slane %v4217_v55, 4 }
 0x2ae   :  { %7138 = vmatprep.mubr.msk.bf16.mxu1 %vm2476_vm5, %v6564_v2  ;;  %v4233_v2 = vrot.slane %v4231_v50, 4 }
 0x2af   :  { %v4223_v45 = vor.u32 %v4222_v26, %v4219_v13  ;;  %v9408_v13 = vld [vmem:[#allocation2 + $0x44] sm:$0x1] }
 0x2b0   :  { %v4237_v61 = vor.u32 %v4236_v52, %v4233_v2 }
 0x2b1   :  { %v4224_v3 = vrot.slane %v4223_v45, 4  ;;  %v4176_v45 = vld [vmem:[#allocation2 + $0x68] sm:$0xf] }
 0x2b2   :  { %7279 = vmatmul.mubr.msk.bf16.gmra.mrb[20].mxu0 %vm121_vm1, %v7638_v58  ;;  %v4200_v58 = vrot.slane %v4198_v23, 5 }
 0x2b3   :  { %7282 = vmatprep.mubr.msk.bf16.mxu0 %vm121_vm1, %v7639_v53  ;;  %v7633_v53 = vld [vmem:[#allocation2 + $0x78] ss:$8 sps:$4 sm:$0xff]  }
 0x2b5   :  { %7139 = vmatmul.mubr.msk.bf16.gmra.mrb[16].mxu1 %vm2476_vm5, %v6565_v19  ;;  %v4248_v19 = vshll.u32 %v4164_v29, 16 }
 0x2b6   :  { %7142 = vmatprep.mubr.msk.bf16.mxu1 %vm2476_vm5, %v6566_v4  ;;  %v4166_v4 = vld [vmem:[#allocation2 + $0x30] sm:$0xf] }
 0x2b7   :  { %v4250_v27 = vrot.slane %v4248_v19, 5  ;;  %v4262_v47 = vshll.u32 %v4166_v4, 16 }
 0x2ba   :  { %7283 = vmatmul.mubr.msk.bf16.gmra.mrb[24].mxu0 %vm121_vm1, %v7640_v16  ;;  %v4240_v16 = vshll.u32 %v9386_v15, 16 }
 0x2bb   :  { %7286 = vmatprep.mubr.msk.bf16.mxu0 %vm121_vm1, %v7641_v36  ;;  %v9391_v36 = vld [vmem:[#allocation2 + $0x34] sm:$0x1] }
 0x2bc   :  { %v4242_v56 = vrot.slane %v4240_v16, 5  ;;  %v4268_v20 = vshll.u32 %v9391_v36, 16  ;;  %v9421_v16 = vld [vmem:[#allocation2 + $0x64] sm:$0x1] }
 0x2bd   :  { %7143 = vmatmul.mubr.msk.bf16.gmra.mrb[20].mxu1 %vm2476_vm5, %v6567_v17  ;;  %v4259_v17 = vshrl.u32 %v4166_v4, 16 }
 0x2be   :  { %7148 = vmatprep.mubr.msk.bf16.mxu1 %vm2476_vm5, %v6593_v40  ;;  %v7632_v40 = vld [vmem:[#allocation2 + $0x68] ss:$8 sps:$4 sm:$0xff]  }
 0x2c2   :  { %7287 = vmatmul.mubr.msk.bf16.gmra.mrb[28].mxu0 %vm121_vm1, %v7642_v28  ;;  %v4168_v28 = vld [vmem:[#allocation2 + $0x38] sm:$0xf] }
 0x2c5   :  { %7149 = vmatmul.mubr.msk.bf16.vlgmr.msra.gmra.mrb[8].mxu1 %vm2476_vm5, %v6594_v25  ;;  %v2687_v25 = vld [vmem:[#allocation2 + $0x48] sm:$0x1] }
 0x2c6   :  { %7152 = vmatprep.mubr.msk.bf16.mxu1 %vm2476_vm5, %v6595_v21  ;;  %7165 = vmatpush3.bf16.msra.mxu1 %v4041_v7  ;;  %v2688_v41 = vsel %vm8462_vm8, 0, %v2687_v25  ;;  %v2718_v21 = vsel %vm8462_vm8, 0, %v2717_v49  ;;  %v9388_v7 = vld [vmem:[#allocation2 + $0x2c] sm:$0x1]  ;;  %v4170_v25 = vld [vmem:[#allocation2 + $0x40] sm:$0xf] }
 0x2c7   :  { %7562 = vmatprep.subr.msk.bf16.mxu1 %vm3412_vm13, %v6626_v0  ;;  %2689 = vst [vmem:[#allocation2 + $0x48] sm:$0x1] %v2688_v41  ;;  %2719 = vst [vmem:[#allocation2 + $0x98] sm:$0x1] %v2718_v21  ;;  %v4214_v0 = vrot.slane %v4212_v59, 5  ;;  %v4287_v42 = vshrl.u32 %v4170_v25, 16 }
 0x2cd   :  { %7153 = vmatmul.mubr.msk.bf16.gmra.mrb[12].mxu1 %vm2476_vm5, %v6596_v51  ;;  %v4156_v51 = vld [vmem:[#allocation2 + $0x8] sm:$0xf] }
 0x2ce   :  { %7156 = vmatprep.mubr.msk.bf16.mxu1 %vm2476_vm5, %v6597_v37  ;;  %v4189_v8 = vshrl.u32 %v4156_v51, 16  ;;  %v4192_v34 = vshll.u32 %v4156_v51, 16  ;;  %v4158_v37 = vld [vmem:[#allocation2 + $0x10] sm:$0xf]  ;;  %v4251_v51 = vor.u32 %v4250_v27, %v4247_v39  ;;  %v4270_v27 = vrot.slane %v4268_v20, 5 }
 0x2cf   :  { %v4203_v5 = vshrl.u32 %v4158_v37, 16  ;;  %v4206_v18 = vshll.u32 %v4158_v37, 16  ;;  %v4276_v37 = vshll.u32 %v4168_v28, 16 }
 0x2d0   :  { %v4194_v14 = vrot.slane %v4192_v34, 5  ;;  %v4174_v34 = vld [vmem:[#allocation2 + $0x60] sm:$0xf] }
 0x2d1   :  { %v4205_v48 = vrot.slane %v4203_v5, 4  ;;  %v4208_v44 = vrot.slane %v4206_v18, 5  ;;  %v4301_v5 = vshrl.u32 %v4172_v63, 16  ;;  %v4304_v18 = vshll.u32 %v4172_v63, 16 }
 0x2d2   :  { %v4315_v50 = vshrl.u32 %v4174_v34, 16  ;;  %v4318_v9 = vshll.u32 %v4174_v34, 16  ;;  %v4278_v2 = vrot.slane %v4276_v37, 5 }
 0x2d3   :  { %v4209_v22 = vor.u32 %v4208_v44, %v4205_v48  ;;  %v4252_v48 = vrot.slane %v4251_v51, 4  ;;  %v4303_v23 = vrot.slane %v4301_v5, 4  ;;  %v4306_v4 = vrot.slane %v4304_v18, 5 }
 0x2d5   :  { %7157 = vmatmul.mubr.msk.bf16.gmra.mrb[16].mxu1 %vm2476_vm5, %v6598_v24  ;;  %v4191_v24 = vrot.slane %v4189_v8, 4  ;;  %v4210_v41 = vrot.slane %v4209_v22, 4  ;;  %v4264_v8 = vrot.slane %v4262_v47, 5  ;;  %v4320_v22 = vrot.slane %v4318_v9, 5  ;;  %v4178_v47 = vld [vmem:[#allocation2 + $0x70] sm:$0xf] }
 0x2d6   :  { %7160 = vmatprep.mubr.msk.bf16.mxu1 %vm2476_vm5, %v6599_v30  ;;  %v4343_v51 = vshrl.u32 %v4178_v47, 16 }
 0x2d7   :  { %v4195_v30 = vor.u32 %v4194_v14, %v4191_v24  ;;  %v9399_v24 = vld [vmem:[#allocation2 + $0x3c] sm:$0x1]  ;;  %v4290_v14 = vshll.u32 %v4170_v25, 16  ;;  %v4215_v55 = vsel %vm7849_vm4, %v4210_v41, %v4214_v0  ;;  %v4329_v41 = vshrl.u32 %v4176_v45, 16 }
 0x2d8   :  { %v4282_v52 = vshll.u32 %v9399_v24, 16  ;;  %v9419_v0 = vld [vmem:[#allocation2 + $0x5c] sm:$0x1]  ;;  %v4345_v9 = vrot.slane %v4343_v51, 4 }
 0x2d9   :  { %v9384_v1 = vrot.slane %v4195_v30, 4  ;;  %v4292_v19 = vrot.slane %v4290_v14, 5  ;;  %v4310_v34 = vshll.u32 %v9419_v0, 16 }
 0x2db   :  { %v4201_v49 = vsel %vm7849_vm4, %v9384_v1, %v4200_v58  ;;  %v4317_v1 = vrot.slane %v4315_v50, 4 }
 0x2dd   :  { %7161 = vmatmul.mubr.msk.bf16.gmra.mrb[20].mxu1 %vm2476_vm5, %v6600_v10  ;;  %v9377_v10 = vld [vmem:[#allocation2 + $0x1c] sm:$0x1]  ;;  %v4321_v63 = vor.u32 %v4320_v22, %v4317_v1  ;;  %v9443_v1 = vld [vmem:[#allocation2 + $0x6c] sm:$0x1]  ;;  %v9445_v22 = vld [vmem:[#allocation2 + $0x74] sm:$0x1] }
 0x2de   :  { %7166 = vmatprep.mubr.msk.bf16.mxu1 %vm2476_vm5, %v7627_v33  ;;  %v4226_v43 = vshll.u32 %v9377_v10, 16  ;;  %v4238_v33 = vrot.slane %v4237_v61, 4  ;;  %v6627_v61 = vcombine.low %v4201_v49, %v4215_v55  ;;  %v4307_v49 = vor.u32 %v4306_v4, %v4303_v23 }
 0x2df   :  { %v4331_v55 = vrot.slane %v4329_v41, 4  ;;  %v4322_v20 = vrot.slane %v4321_v63, 4 }
 0x2e0   :  { %v4228_v21 = vrot.slane %v4226_v43, 5  ;;  %v4243_v30 = vsel %vm7849_vm4, %v4238_v33, %v4242_v56  ;;  %v4332_v33 = vshll.u32 %v4176_v45, 16  ;;  %v4308_v18 = vrot.slane %v4307_v49, 4 }
 0x2e1   :  { %v4352_v49 = vshll.u32 %v9445_v22, 16 }
 0x2e2   :  { %v4229_v29 = vsel %vm7849_vm4, %v4224_v3, %v4228_v21  ;;  %v4180_v3 = vld [vmem:[#allocation2 + $0x78] sm:$0xf]  ;;  %v4182_v21 = vld [vmem:[#allocation2 + $0x80] sm:$0xf]  ;;  %v4334_v50 = vrot.slane %v4332_v33, 5 }
 0x2e3   :  { %v4360_v37 = vshll.u32 %v4180_v3, 16  ;;  %v4374_v56 = vshll.u32 %v4182_v21, 16 }
 0x2e4   :  { %v4335_v45 = vor.u32 %v4334_v50, %v4331_v55 }
 0x2e5   :  { %7167 = vmatmul.mubr.msk.bf16.vlgmr.msra.gmra.mrb[8].mxu1 %vm2476_vm5, %v7628_v60  ;;  %v4261_v60 = vrot.slane %v4259_v17, 4  ;;  %v4296_v17 = vshll.u32 %v9408_v13, 16 }
 0x2e6   :  { %7170 = vmatprep.mubr.msk.bf16.mxu1 %vm2476_vm5, %v7629_v31  ;;  %7183 = vmatpush3.bf16.msra.mxu1 %v4463_v6  ;;  %v4254_v31 = vshll.u32 %v9388_v7, 16  ;;  %v4273_v6 = vshrl.u32 %v4168_v28, 16 }
 0x2e7   :  { %7563 = vmatprep.subr.msk.bf16.mxu1 %vm3412_vm13, %v9367_v54  ;;  %v4265_v44 = vor.u32 %v4264_v8, %v4261_v60  ;;  %v4346_v60 = vshll.u32 %v4178_v47, 16  ;;  %v4298_v8 = vrot.slane %v4296_v17, 5 }
 0x2e8   :  { %v4275_v26 = vrot.slane %v4273_v6, 4  ;;  %v4256_v43 = vrot.slane %v4254_v31, 5  ;;  %v4324_v31 = vshll.u32 %v9421_v16, 16  ;;  %v4357_v6 = vshrl.u32 %v4180_v3, 16 }
 0x2e9   :  { %v4266_v39 = vrot.slane %v4265_v44, 4  ;;  %v4184_v44 = vld [vmem:[#allocation2 + $0x88] sm:$0xf] }
 0x2ea   :  { %v4257_v58 = vsel %vm7849_vm4, %v4252_v48, %v4256_v43  ;;  %v4279_v28 = vor.u32 %v4278_v2, %v4275_v26  ;;  %v4326_v48 = vrot.slane %v4324_v31, 5  ;;  %v9431_v26 = vld [vmem:[%s10037_s7 + $0x18] sm:$0xf]  ;;  %v4359_v2 = vrot.slane %v4357_v6, 4 }
 0x2eb   :  { %v4271_v54 = vsel %vm7849_vm4, %v4266_v39, %v4270_v27  ;;  %v9447_v39 = vld [vmem:[#allocation2 + $0x7c] sm:$0x1]  ;;  %v9451_v27 = vld [vmem:[#allocation2 + $0x84] sm:$0x1]  ;;  %v4385_v17 = vshrl.u32 %v4184_v44, 16  ;;  %v4388_v47 = vshll.u32 %v4184_v44, 16 }
 0x2ec   :  { %v4280_v14 = vrot.slane %v4279_v28, 4  ;;  %v4327_v43 = vsel %vm7849_vm4, %v4322_v20, %v4326_v48  ;;  %v4366_v41 = vshll.u32 %v9447_v39, 16  ;;  %v4380_v33 = vshll.u32 %v9451_v27, 16  ;;  %v4578_v48 = vld [vmem:[#allocation2 + $0x8] sm:$0xe] }
 0x2ed   :  { %7171 = vmatmul.mubr.msk.bf16.gmra.mrb[12].mxu1 %vm2476_vm5, %v7630_v38  ;;  %v2779_v38 = vld [vmem:[#allocation2 + $0x9c] sm:$0x1]  ;;  %v4387_v51 = vrot.slane %v4385_v17, 4  ;;  %v4579_v44 = vld [vmem:[#allocation2 + $0x10] sm:$0xe] }
 0x2ee   :  { %7174 = vmatprep.mubr.msk.bf16.mxu1 %vm2476_vm5, %v7631_v35  ;;  %v4289_v35 = vrot.slane %v4287_v42, 4  ;;  %v2780_v59 = vsel %vm8518_vm10, 0, %v2779_v38  ;;  %v4371_v42 = vshrl.u32 %v4182_v21, 16  ;;  %v4348_v38 = vrot.slane %v4346_v60, 5 }
 0x2ef   :  { %2781 = vst [vmem:[#allocation2 + $0x9c] sm:$0x1] %v2780_v59  ;;  %v4336_v21 = vrot.slane %v4335_v45, 4  ;;  %v4390_v60 = vrot.slane %v4388_v47, 5  ;;  %v4580_v47 = vld [vmem:[#allocation2 + $0x18] sm:$0xe] }
 0x2f0   :  { %v4293_v25 = vor.u32 %v4292_v19, %v4289_v35  ;;  %v4373_v35 = vrot.slane %v4371_v42, 4  ;;  %v4186_v19 = vld [vmem:[#allocation2 + $0x90] sm:$0xf]  ;;  %v4368_v42 = vrot.slane %v4366_v41, 5 }
 0x2f1   :  { %v4391_v20 = vor.u32 %v4390_v60, %v4387_v51  ;;  %v4648_v51 = vrot.slane %v9391_v36, 5  ;;  %v4940_v36 = vsel %vm3412_vm13, %v9431_v26, 0 }
 0x2f2   :  { %v4294_v5 = vrot.slane %v4293_v25, 4  ;;  %v4338_v25 = vshll.u32 %v9443_v1, 16 }
 0x2f4   :  { %v4299_v4 = vsel %vm7849_vm4, %v4294_v5, %v4298_v8  ;;  %v4340_v6 = vrot.slane %v4338_v25, 5  ;;  %v9461_v5 = vld [vmem:[#allocation2 + $0x94] sm:$0x1] }
 0x2f5   :  { %7175 = vmatmul.mubr.msk.bf16.gmra.mrb[16].mxu1 %vm2476_vm5, %v7632_v40  ;;  %v6628_v40 = vcombine.low %v4229_v29, %v4243_v30  ;;  %v6629_v29 = vcombine.low %v4257_v58, %v4271_v54  ;;  %v4312_v30 = vrot.slane %v4310_v34, 5  ;;  %v4402_v58 = vshll.u32 %v4186_v19, 16 }
 0x2f6   :  { %7178 = vmatprep.mubr.msk.bf16.mxu1 %vm2476_vm5, %v7633_v53  ;;  %v4284_v53 = vrot.slane %v4282_v52, 5  ;;  %v4362_v52 = vrot.slane %v4360_v37, 5  ;;  %v4354_v37 = vrot.slane %v4352_v49, 5  ;;  %v4636_v49 = vrot.slane %v9377_v10, 5  ;;  %v4584_v10 = vld [vmem:[#allocation2 + $0x38] sm:$0xe] }
 0x2f7   :  { %v4313_v59 = vsel %vm7849_vm4, %v4308_v18, %v4312_v30  ;;  %v4404_v8 = vrot.slane %v4402_v58, 5  ;;  %v4341_v18 = vsel %vm7849_vm4, %v4336_v21, %v4340_v6  ;;  %v4408_v30 = vshll.u32 %v9461_v5, 16  ;;  %v4581_v58 = vld [vmem:[#allocation2 + $0x20] sm:$0xe] }
 0x2f8   :  { %v4285_v23 = vsel %vm7849_vm4, %v4280_v14, %v4284_v53  ;;  %v6631_v3 = vcombine.low %v4313_v59, %v4327_v43  ;;  %v9459_v14 = vld [vmem:[#allocation2 + $0x8c] sm:$0x1]  ;;  %v4632_v59 = vrot.slane %v9375_v12, 5  ;;  %v4583_v12 = vld [vmem:[#allocation2 + $0x30] sm:$0xe]  ;;  %v6646_v41 = vrot.slane %v4581_v58, 9 }
 0x2f9   :  { %v6630_v28 = vcombine.low %v4285_v23, %v4299_v4  ;;  %v4628_v23 = vrot.slane %v9373_v62, 5  ;;  %v6644_v4 = vrot.slane %v4579_v44, 9  ;;  %v4410_v45 = vrot.slane %v4408_v30, 5  ;;  %v4591_v44 = vld [vmem:[#allocation2 + $0x80] sm:$0xe] }
 0x2fb   :  { %v4633_v62 = vsel %vm9160_vm2, %v6644_v4, %v4632_v59  ;;  %v4676_v59 = vrot.slane %v9447_v39, 5 }
 0x2fd   :  { %7179 = vmatmul.mubr.msk.bf16.gmra.mrb[20].mxu1 %vm2476_vm5, %v7634_v11  ;;  %v4376_v11 = vrot.slane %v4374_v56, 5  ;;  %v4382_v56 = vrot.slane %v4380_v33, 5  ;;  %v6648_v33 = vrot.slane %v4583_v12, 9  ;;  %v4688_v12 = vrot.slane %v9461_v5, 5  ;;  %v5055_v5 = vld [vmem:[#allocation2 + $0x10] sm:$0xf] }
 0x2fe   :  { %7184 = vmatprep.mubr.msk.bf16.mxu1 %vm2476_vm5, %v6627_v61  ;;  %v4349_v61 = vor.u32 %v4348_v38, %v4345_v9 }
 0x2ff   :  { %v4377_v53 = vor.u32 %v4376_v11, %v4373_v35  ;;  %v4392_v35 = vrot.slane %v4391_v20, 4  ;;  %v6693_v20 = vld [vmem:[%s10037_s7 + $0x1c] sm:$0xf] }
 0x300   :  { %v4350_v63 = vrot.slane %v4349_v61, 4 }
 0x301   :  { %v4378_v31 = vrot.slane %v4377_v53, 4 }
 0x302   :  { %v4355_v55 = vsel %vm7849_vm4, %v4350_v63, %v4354_v37  ;;  %v4644_v63 = vrot.slane %v9388_v7, 5  ;;  %v4586_v7 = vld [vmem:[#allocation2 + $0x58] sm:$0xe]  ;;  %v6649_v37 = vrot.slane %v4584_v10, 9 }
 0x303   :  { %v4383_v38 = vsel %vm7849_vm4, %v4378_v31, %v4382_v56  ;;  %v4587_v31 = vld [vmem:[#allocation2 + $0x60] sm:$0xe]  ;;  %v4652_v56 = vrot.slane %v9399_v24, 5 }
 0x305   :  { %7185 = vmatmul.mubr.msk.bf16.vlgmr.msra.gmra.mrb[8].mxu1 %vm2476_vm5, %v6628_v40  ;;  %v4399_v40 = vshrl.u32 %v4186_v19, 16  ;;  %v6643_v19 = vrot.slane %v4578_v48, 9  ;;  %v4653_v24 = vsel %vm9160_vm2, %v6649_v37, %v4652_v56  ;;  %v4589_v48 = vld [vmem:[#allocation2 + $0x70] sm:$0xe] }
 0x306   :  { %7188 = vmatprep.mubr.msk.bf16.mxu1 %vm2476_vm5, %v6629_v29  ;;  %7201 = vmatpush3.bf16.msra.mxu1 %v4741_v46  ;;  %v4363_v46 = vor.u32 %v4362_v52, %v4359_v2  ;;  %v4394_v29 = vshll.u32 %v9459_v14, 16  ;;  %v6632_v2 = vcombine.low %v4341_v18, %v4355_v55  ;;  %v4656_v55 = vrot.slane %v9408_v13, 5 }
 0x307   :  { %7564 = vmatprep.subr.msk.bf16.mxu1 %vm3412_vm13, %v9431_v26  ;;  %v4401_v54 = vrot.slane %v4399_v40, 4  ;;  %v4629_v40 = vsel %vm9160_vm2, %v6643_v19, %v4628_v23  ;;  %v4588_v26 = vld [vmem:[#allocation2 + $0x68] sm:$0xe]  ;;  %v6654_v19 = vrot.slane %v4589_v48, 9  ;;  %v4672_v23 = vrot.slane %v9445_v22, 5 }
 0x308   :  { %v4364_v34 = vrot.slane %v4363_v46, 4  ;;  %v4396_v43 = vrot.slane %v4394_v29, 5  ;;  %v4582_v46 = vld [vmem:[#allocation2 + $0x28] sm:$0xe]  ;;  %v6660_v25 = vcombine.low %v4629_v40, %v4633_v62  ;;  %v4664_v29 = vrot.slane %v9421_v16, 5 }
 0x309   :  { %v4405_v50 = vor.u32 %v4404_v8, %v4401_v54  ;;  %v6647_v21 = vrot.slane %v4582_v46, 9  ;;  %v4649_v8 = vsel %vm9160_vm2, %v6648_v33, %v4648_v51  ;;  %v4590_v16 = vld [vmem:[#allocation2 + $0x78] sm:$0xe]  ;;  %v4593_v40 = vld [vmem:[#allocation2 + $0x90] sm:$0xe]  ;;  %v5088_v51 = vshrl.u32 %v5055_v5, 16 }
 0x30a   :  { %v4369_v9 = vsel %vm7849_vm4, %v4364_v34, %v4368_v42  ;;  %v4397_v61 = vsel %vm7849_vm4, %v4392_v35, %v4396_v43  ;;  %v4585_v34 = vld [vmem:[#allocation2 + $0x40] sm:$0xe]  ;;  %v6655_v4 = vrot.slane %v4590_v16, 9  ;;  %v6656_v43 = vrot.slane %v4591_v44, 9 }
 0x30b   :  { %v6633_v52 = vcombine.low %v4369_v9, %v4383_v38  ;;  %v4406_v11 = vrot.slane %v4405_v50, 4  ;;  %v6650_v18 = vrot.slane %v4585_v34, 9  ;;  %v6651_v50 = vrot.slane %v4586_v7, 9  ;;  %v9547_v33 = vld [vmem:[%s10037_s7 + $0x20] sm:$0xf] }
 0x30c   :  { %v4660_v9 = vrot.slane %v9419_v0, 5  ;;  %v6652_v38 = vrot.slane %v4587_v31, 9  ;;  %v4677_v22 = vsel %vm9160_vm2, %v6655_v4, %v4676_v59  ;;  %v6658_v46 = vrot.slane %v4593_v40, 9  ;;  %v9553_v7 = vld [vmem:[#allocation2 + $0x14] sm:$0x1] }
 0x30d   :  { %7189 = vmatmul.mubr.msk.bf16.gmra.mrb[12].mxu1 %vm2476_vm5, %v6630_v28  ;;  %v4411_v17 = vsel %vm7849_vm4, %v4406_v11, %v4410_v45  ;;  %v6645_v28 = vrot.slane %v4580_v47, 9  ;;  %v4657_v13 = vsel %vm9160_vm2, %v6650_v18, %v4656_v55  ;;  %v4668_v11 = vrot.slane %v9443_v1, 5  ;;  %v4592_v1 = vld [vmem:[#allocation2 + $0x88] sm:$0xe]  ;;  %v5063_v18 = vld [vmem:[#allocation2 + $0x30] sm:$0xf] }
 0x30e   :  { %7192 = vmatprep.mubr.msk.bf16.mxu1 %vm2476_vm5, %v6631_v3  ;;  %v6634_v53 = vcombine.low %v4397_v61, %v4411_v17  ;;  %v4640_v3 = vrot.slane %v9386_v15, 5  ;;  %v4645_v15 = vsel %vm9160_vm2, %v6647_v21, %v4644_v63  ;;  %v4661_v30 = vsel %vm9160_vm2, %v6651_v50, %v4660_v9  ;;  %v7645_v21 = vld [vmem:[#allocation2 + $0x30] ss:$8 sps:$4 sm:$0xff]   ;;  %v5059_v63 = vld [vmem:[#allocation2 + $0x20] sm:$0xf] }
 0x30f   :  { %v4637_v60 = vsel %vm9160_vm2, %v6645_v28, %v4636_v49  ;;  %v6662_v42 = vcombine.low %v4645_v15, %v4649_v8  ;;  %v4665_v0 = vsel %vm9160_vm2, %v6652_v38, %v4664_v29  ;;  %v4680_v45 = vrot.slane %v9451_v27, 5  ;;  %v7643_v49 = vld [vmem:[#allocation2 + $0x10] ss:$8 sps:$4 sm:$0xff]   ;;  %v5061_v15 = vld [vmem:[#allocation2 + $0x28] sm:$0xf] }
 0x310   :  { %v4641_v54 = vsel %vm9160_vm2, %v6646_v41, %v4640_v3  ;;  %v6664_v35 = vcombine.low %v4661_v30, %v4665_v0  ;;  %v4673_v17 = vsel %vm9160_vm2, %v6654_v19, %v4672_v23  ;;  %v6657_v62 = vrot.slane %v4592_v1, 9  ;;  %v5057_v3 = vld [vmem:[#allocation2 + $0x18] sm:$0xf]  ;;  %v7646_v55 = vld [vmem:[#allocation2 + $0x40] ss:$8 sps:$4 sm:$0xff]  }
 0x311   :  { %v6661_v6 = vcombine.low %v4637_v60, %v4641_v54  ;;  %v4681_v47 = vsel %vm9160_vm2, %v6656_v43, %v4680_v45  ;;  %v4684_v27 = vrot.slane %v9459_v14, 5  ;;  %v4689_v28 = vsel %vm9160_vm2, %v6658_v46, %v4688_v12  ;;  %v7644_v14 = vld [vmem:[#allocation2 + $0x20] ss:$8 sps:$4 sm:$0xff]   ;;  %v9557_v29 = vld [vmem:[#allocation2 + $0x24] sm:$0x1] }
 0x312   :  { %v6666_v58 = vcombine.low %v4677_v22, %v4681_v47  ;;  %v5362_v41 = vsel %vm3412_vm13, %v6693_v20, 0  ;;  %v5091_v60 = vshll.u32 %v5055_v5, 16  ;;  %v5102_v54 = vshrl.u32 %v5057_v3, 16  ;;  %v7647_v38 = vld [vmem:[#allocation2 + $0x60] ss:$8 sps:$4 sm:$0xff]  }
 0x313   :  { %v5105_v10 = vshll.u32 %v5057_v3, 16  ;;  %v5116_v8 = vshrl.u32 %v5059_v63, 16  ;;  %v5119_v34 = vshll.u32 %v5059_v63, 16  ;;  %v5130_v31 = vshrl.u32 %v5061_v15, 16  ;;  %v7648_v4 = vld [vmem:[#allocation2 + $0x70] ss:$8 sps:$4 sm:$0xff]  }
 0x314   :  { %v5093_v37 = vrot.slane %v5091_v60, 5  ;;  %v5144_v30 = vshrl.u32 %v5063_v18, 16  ;;  %v5147_v0 = vshll.u32 %v5063_v18, 16  ;;  %v5097_v16 = vshll.u32 %v9553_v7, 16  ;;  %v5069_v46 = vld [vmem:[#allocation2 + $0x48] sm:$0xf] }
 0x315   :  { %7193 = vmatmul.mubr.msk.bf16.gmra.mrb[16].mxu1 %vm2476_vm5, %v6632_v2  ;;  %v6663_v2 = vcombine.low %v4653_v24, %v4657_v13  ;;  %v5107_v56 = vrot.slane %v5105_v10, 5  ;;  %v5118_v50 = vrot.slane %v5116_v8, 4  ;;  %v5121_v9 = vrot.slane %v5119_v34, 5  ;;  %v9572_v3 = vld [vmem:[#allocation2 + $0x3c] sm:$0x1] }
 0x316   :  { %7196 = vmatprep.mubr.msk.bf16.mxu1 %vm2476_vm5, %v6633_v52  ;;  %v6653_v52 = vrot.slane %v4588_v26, 9  ;;  %v5132_v24 = vrot.slane %v5130_v31, 4  ;;  %v5065_v26 = vld [vmem:[#allocation2 + $0x38] sm:$0xf]  ;;  %v5146_v45 = vrot.slane %v5144_v30, 4  ;;  %v5099_v22 = vrot.slane %v5097_v16, 5 }
 0x317   :  { %v5158_v19 = vshrl.u32 %v5065_v26, 16  ;;  %v5161_v23 = vshll.u32 %v5065_v26, 16  ;;  %v5189_v60 = vshll.u32 %v5069_v46, 16 }
 0x318   :  { %v4669_v61 = vsel %vm9160_vm2, %v6653_v52, %v4668_v11  ;;  %v9563_v52 = vld [vmem:[#allocation2 + $0x2c] sm:$0x1]  ;;  %v5125_v11 = vshll.u32 %v9557_v29, 16 }
 0x319   :  { %v6665_v39 = vcombine.low %v4669_v61, %v4673_v17  ;;  %v5139_v43 = vshll.u32 %v9563_v52, 16  ;;  %v5149_v61 = vrot.slane %v5147_v0, 5  ;;  %v7649_v17 = vld [vmem:[#allocation2 + $0x80] ss:$8 sps:$4 sm:$0xff]   ;;  %v5160_v12 = vrot.slane %v5158_v19, 4 }
 0x31a   :  { %v5191_v26 = vrot.slane %v5189_v60, 5 }
 0x31d   :  { %7197 = vmatmul.mubr.msk.bf16.gmra.mrb[20].mxu1 %vm2476_vm5, %v6634_v53  ;;  %v4685_v53 = vsel %vm9160_vm2, %v6657_v62, %v4684_v27  ;;  %v5067_v27 = vld [vmem:[#allocation2 + $0x40] sm:$0xf] }
 0x31e   :  { %7202 = vmatprep.mubr.msk.bf16.mxu1 %vm2476_vm5, %v6660_v25  ;;  %v6667_v25 = vcombine.low %v4685_v53, %v4689_v28  ;;  %v5163_v53 = vrot.slane %v5161_v23, 5  ;;  %v5071_v28 = vld [vmem:[#allocation2 + $0x60] sm:$0xf]  ;;  %v5175_v63 = vshll.u32 %v5067_v27, 16  ;;  %v5077_v23 = vld [vmem:[#allocation2 + $0x78] sm:$0xf] }
 0x31f   :  { %v5203_v10 = vshll.u32 %v5071_v28, 16 }
 0x321   :  { %v5205_v0 = vrot.slane %v5203_v10, 5 }
 0x325   :  { %7203 = vmatmul.mubr.msk.bf16.vlgmr.msra.gmra.mrb[8].mxu1 %vm2476_vm5, %v6661_v6  ;;  %v5133_v6 = vshll.u32 %v5061_v15, 16 }
 0x326   :  { %7206 = vmatprep.mubr.msk.bf16.mxu1 %vm2476_vm5, %v6662_v42  ;;  %7219 = vmatpush3.bf16.msra.mxu1 %v4940_v36  ;;  %v5090_v36 = vrot.slane %v5088_v51, 4  ;;  %v5104_v42 = vrot.slane %v5102_v54, 4  ;;  %v5186_v51 = vshrl.u32 %v5069_v46, 16  ;;  %v5200_v54 = vshrl.u32 %v5071_v28, 16 }
 0x327   :  { %7565 = vmatprep.subr.msk.bf16.mxu1 %vm3412_vm13, %v6693_v20  ;;  %v9555_v20 = vld [vmem:[#allocation2 + $0x1c] sm:$0x1]  ;;  %v5135_v13 = vrot.slane %v5133_v6, 5  ;;  %v5242_v46 = vshrl.u32 %v5077_v23, 16 }
 0x328   :  { %v5094_v48 = vor.u32 %v5093_v37, %v5090_v36  ;;  %v5108_v44 = vor.u32 %v5107_v56, %v5104_v42  ;;  %v5164_v36 = vor.u32 %v5163_v53, %v5160_v12  ;;  %v7650_v37 = vld [vmem:[#allocation2 + $0x90] ss:$8 sps:$4 sm:$0xff]   ;;  %v5202_v30 = vrot.slane %v5200_v54, 4 }
 0x329   :  { %v5136_v59 = vor.u32 %v5135_v13, %v5132_v24  ;;  %v5177_v24 = vrot.slane %v5175_v63, 5  ;;  %v5188_v13 = vrot.slane %v5186_v51, 4  ;;  %v5245_v12 = vshll.u32 %v5077_v23, 16 }
 0x32a   :  { %v5095_v1 = vrot.slane %v5094_v48, 4  ;;  %v5109_v47 = vrot.slane %v5108_v44, 4  ;;  %v5075_v44 = vld [vmem:[#allocation2 + $0x70] sm:$0xf] }
 0x32c   :  { %v5100_v34 = vsel %vm7849_vm4, %v5095_v1, %v5099_v22  ;;  %v5228_v22 = vshrl.u32 %v5075_v44, 16 }
 0x32d   :  { %7207 = vmatmul.mubr.msk.bf16.gmra.mrb[12].mxu1 %vm2476_vm5, %v6663_v2  ;;  %v5111_v2 = vshll.u32 %v9555_v20, 16 }
 0x32e   :  { %7210 = vmatprep.mubr.msk.bf16.mxu1 %vm2476_vm5, %v6664_v35  ;;  %v5122_v35 = vor.u32 %v5121_v9, %v5118_v50  ;;  %v9583_v50 = vld [vmem:[#allocation2 + $0x44] sm:$0x1]  ;;  %v9585_v9 = vld [vmem:[#allocation2 + $0x4c] sm:$0x1]  ;;  %v5230_v60 = vrot.slane %v5228_v22, 4 }
 0x32f   :  { %v5113_v40 = vrot.slane %v5111_v2, 5  ;;  %v5195_v19 = vshll.u32 %v9585_v9, 16 }
 0x330   :  { %v5123_v62 = vrot.slane %v5122_v35, 4  ;;  %v5165_v35 = vrot.slane %v5164_v36, 4 }
 0x331   :  { %v5114_v31 = vsel %vm7849_vm4, %v5109_v47, %v5113_v40  ;;  %v5231_v47 = vshll.u32 %v5075_v44, 16  ;;  %v5079_v40 = vld [vmem:[#allocation2 + $0x80] sm:$0xf]  ;;  %v5197_v28 = vrot.slane %v5195_v19, 5  ;;  %v9615_v44 = vld [vmem:[#allocation2 + $0x7c] sm:$0x1] }
 0x332   :  { %v6694_v2 = vcombine.low %v5100_v34, %v5114_v31  ;;  %v5247_v34 = vrot.slane %v5245_v12, 5 }
 0x333   :  { %v5233_v54 = vrot.slane %v5231_v47, 5  ;;  %v5251_v47 = vshll.u32 %v9615_v44, 16 }
 0x335   :  { %7211 = vmatmul.mubr.msk.bf16.gmra.mrb[16].mxu1 %vm2476_vm5, %v6665_v39  ;;  %v9567_v39 = vld [vmem:[#allocation2 + $0x34] sm:$0x1] }
 0x336   :  { %7214 = vmatprep.mubr.msk.bf16.mxu1 %vm2476_vm5, %v6666_v58  ;;  %v5127_v58 = vrot.slane %v5125_v11, 5  ;;  %v5153_v5 = vshll.u32 %v9567_v39, 16  ;;  %v5640_v11 = vsel %vm3412_vm13, %v9547_v33, 0 }
 0x338   :  { %v5128_v6 = vsel %vm7849_vm4, %v5123_v62, %v5127_v58  ;;  %v5155_v18 = vrot.slane %v5153_v5, 5  ;;  %v5081_v62 = vld [vmem:[#allocation2 + $0x88] sm:$0xf]  ;;  %v5206_v58 = vor.u32 %v5205_v0, %v5202_v30  ;;  %v5234_v30 = vor.u32 %v5233_v54, %v5230_v60  ;;  %v9631_v60 = vld [vmem:[#allocation2 + $0x9c] sm:$0x1] }
 0x339   :  { %v5270_v5 = vshrl.u32 %v5081_v62, 16 }
 0x33a   :  { %v5207_v10 = vrot.slane %v5206_v58, 4  ;;  %v5235_v22 = vrot.slane %v5234_v30, 4 }
 0x33d   :  { %7215 = vmatmul.mubr.msk.bf16.gmra.mrb[20].mxu1 %vm2476_vm5, %v6667_v25  ;;  %v5073_v25 = vld [vmem:[#allocation2 + $0x68] sm:$0xf] }
 0x33e   :  { %7220 = vmatprep.mubr.msk.bf16.mxu1 %vm2476_vm5, %v7643_v49  ;;  %v5137_v49 = vrot.slane %v5136_v59, 4  ;;  %v5214_v15 = vshrl.u32 %v5073_v25, 16  ;;  %v5217_v8 = vshll.u32 %v5073_v25, 16 }
 0x340   :  { %v5216_v48 = vrot.slane %v5214_v15, 4  ;;  %v5219_v16 = vrot.slane %v5217_v8, 5  ;;  %v5244_v8 = vrot.slane %v5242_v46, 4 }
 0x345   :  { %7221 = vmatmul.mubr.msk.bf16.vlgmr.msra.gmra.mrb[8].mxu1 %vm2476_vm5, %v7644_v14  ;;  %v5141_v14 = vrot.slane %v5139_v43, 5 }
 0x346   :  { %7224 = vmatprep.mubr.msk.bf16.mxu1 %vm2476_vm5, %v7645_v21  ;;  %7237 = vmatpush3.bf16.msra.mxu1 %v5362_v41  ;;  %v5150_v41 = vor.u32 %v5149_v61, %v5146_v45  ;;  %v5172_v21 = vshrl.u32 %v5067_v27, 16  ;;  %v5181_v45 = vshll.u32 %v9583_v50, 16  ;;  %v9594_v61 = vld [vmem:[#allocation2 + $0x64] sm:$0x1]  ;;  %v5220_v27 = vor.u32 %v5219_v16, %v5216_v48 }
 0x347   :  { %7566 = vmatprep.subr.msk.bf16.mxu1 %vm3412_vm13, %v9547_v33  ;;  %v5142_v42 = vsel %vm7849_vm4, %v5137_v49, %v5141_v14  ;;  %v5192_v33 = vor.u32 %v5191_v26, %v5188_v13  ;;  %v5209_v25 = vshll.u32 %v9594_v61, 16  ;;  %v5256_v14 = vshrl.u32 %v5079_v40, 16  ;;  %v9607_v26 = vld [vmem:[#allocation2 + $0x74] sm:$0x1] }
 0x348   :  { %v5151_v56 = vrot.slane %v5150_v41, 4  ;;  %v5259_v41 = vshll.u32 %v5079_v40, 16  ;;  %v5221_v15 = vrot.slane %v5220_v27, 4 }
 0x349   :  { %v5193_v51 = vrot.slane %v5192_v33, 4  ;;  %v5211_v36 = vrot.slane %v5209_v25, 5 }
 0x34a   :  { %v5156_v59 = vsel %vm7849_vm4, %v5151_v56, %v5155_v18  ;;  %v5258_v56 = vrot.slane %v5256_v14, 4  ;;  %v5261_v18 = vrot.slane %v5259_v41, 5  ;;  %v5253_v41 = vrot.slane %v5251_v47, 5 }
 0x34b   :  { %v5198_v0 = vsel %vm7849_vm4, %v5193_v51, %v5197_v28  ;;  %v5212_v48 = vsel %vm7849_vm4, %v5207_v10, %v5211_v36  ;;  %v9629_v51 = vld [vmem:[#allocation2 + $0x94] sm:$0x1]  ;;  %v5477_v36 = vld [vmem:[#allocation2 + $0x10] sm:$0xe]  ;;  %v5539_v47 = vrot.slane %v9563_v52, 5 }
 0x34d   :  { %7225 = vmatmul.mubr.msk.bf16.gmra.mrb[12].mxu1 %vm2476_vm5, %v7646_v55  ;;  %v5167_v55 = vshll.u32 %v9572_v3, 16 }
 0x34e   :  { %7228 = vmatprep.mubr.msk.bf16.mxu1 %vm2476_vm5, %v7647_v38  ;;  %v5174_v38 = vrot.slane %v5172_v21, 4  ;;  %v5273_v21 = vshll.u32 %v5081_v62, 16 }
 0x34f   :  { %v5169_v43 = vrot.slane %v5167_v55, 5  ;;  %v5272_v55 = vrot.slane %v5270_v5, 4 }
 0x350   :  { %v5178_v1 = vor.u32 %v5177_v24, %v5174_v38  ;;  %v5275_v38 = vrot.slane %v5273_v21, 5  ;;  %v5085_v24 = vld [vmem:[#allocation2 + $0x98] sm:$0xf] }
 0x351   :  { %v5170_v53 = vsel %vm7849_vm4, %v5165_v35, %v5169_v43  ;;  %v9617_v35 = vld [vmem:[#allocation2 + $0x84] sm:$0x1]  ;;  %v5237_v43 = vshll.u32 %v9607_v26, 16 }
 0x352   :  { %v5179_v63 = vrot.slane %v5178_v1, 4  ;;  %v6696_v31 = vcombine.low %v5156_v59, %v5170_v53  ;;  %v5301_v59 = vshll.u32 %v5085_v24, 16  ;;  %v5276_v1 = vor.u32 %v5275_v38, %v5272_v55 }
 0x353   :  { %v5265_v58 = vshll.u32 %v9617_v35, 16  ;;  %v5239_v25 = vrot.slane %v5237_v43, 5  ;;  %v5482_v43 = vld [vmem:[#allocation2 + $0x38] sm:$0xe] }
 0x354   :  { %v5303_v28 = vrot.slane %v5301_v59, 5  ;;  %v5277_v14 = vrot.slane %v5276_v1, 4  ;;  %v5481_v59 = vld [vmem:[#allocation2 + $0x30] sm:$0xe] }
 0x355   :  { %7229 = vmatmul.mubr.msk.bf16.gmra.mrb[16].mxu1 %vm2476_vm5, %v7648_v4  ;;  %v6695_v4 = vcombine.low %v5128_v6, %v5142_v42  ;;  %v5183_v6 = vrot.slane %v5181_v45, 5  ;;  %v5083_v42 = vld [vmem:[#allocation2 + $0x90] sm:$0xf]  ;;  %v5262_v45 = vor.u32 %v5261_v18, %v5258_v56  ;;  %v5240_v5 = vsel %vm7849_vm4, %v5235_v22, %v5239_v25 }
 0x356   :  { %7232 = vmatprep.mubr.msk.bf16.mxu1 %vm2476_vm5, %v7649_v17  ;;  %v9596_v17 = vld [vmem:[#allocation2 + $0x6c] sm:$0x1]  ;;  %v5284_v19 = vshrl.u32 %v5083_v42, 16  ;;  %v5287_v23 = vshll.u32 %v5083_v42, 16  ;;  %v5267_v21 = vrot.slane %v5265_v58, 5  ;;  %v6714_v57 = vrot.slane %v5481_v59, 9 }
 0x357   :  { %v5223_v49 = vshll.u32 %v9596_v17, 16  ;;  %v5184_v13 = vsel %vm7849_vm4, %v5179_v63, %v5183_v6  ;;  %v5293_v6 = vshll.u32 %v9629_v51, 16  ;;  %v5547_v58 = vrot.slane %v9572_v3, 5 }
 0x358   :  { %v6697_v33 = vcombine.low %v5184_v13, %v5198_v0  ;;  %v5286_v46 = vrot.slane %v5284_v19, 4  ;;  %v5289_v12 = vrot.slane %v5287_v23, 5  ;;  %v5527_v13 = vrot.slane %v9553_v7, 5  ;;  %v5479_v19 = vld [vmem:[#allocation2 + $0x20] sm:$0xe] }
 0x359   :  { %v5531_v0 = vrot.slane %v9555_v20, 5  ;;  %v5480_v7 = vld [vmem:[#allocation2 + $0x28] sm:$0xe] }
 0x35a   :  { %v5290_v10 = vor.u32 %v5289_v12, %v5286_v46  ;;  %v6713_v22 = vrot.slane %v5480_v7, 9  ;;  %v5583_v7 = vrot.slane %v9629_v51, 5 }
 0x35c   :  { %v5291_v18 = vrot.slane %v5290_v10, 4  ;;  %v5540_v46 = vsel %vm9160_vm2, %v6713_v22, %v5539_v47  ;;  %v5563_v10 = vrot.slane %v9596_v17, 5 }
 0x35d   :  { %7233 = vmatmul.mubr.msk.bf16.gmra.mrb[20].mxu1 %vm2476_vm5, %v7650_v37  ;;  %v5225_v37 = vrot.slane %v5223_v49, 5  ;;  %v5263_v49 = vrot.slane %v5262_v45, 4  ;;  %v6712_v45 = vrot.slane %v5479_v19, 9 }
 0x35e   :  { %7238 = vmatprep.mubr.msk.bf16.mxu1 %vm2476_vm5, %v6694_v2  ;;  %v5248_v2 = vor.u32 %v5247_v34, %v5244_v8  ;;  %v5307_v8 = vshll.u32 %v9631_v60, 16 }
 0x35f   :  { %v5226_v16 = vsel %vm7849_vm4, %v5221_v15, %v5225_v37  ;;  %v5268_v34 = vsel %vm7849_vm4, %v5263_v49, %v5267_v21  ;;  %v5478_v37 = vld [vmem:[#allocation2 + $0x18] sm:$0xe] }
 0x360   :  { %v6698_v40 = vcombine.low %v5212_v48, %v5226_v16  ;;  %v5249_v62 = vrot.slane %v5248_v2, 4  ;;  %v5309_v38 = vrot.slane %v5307_v8, 5  ;;  %v6711_v30 = vrot.slane %v5478_v37, 9 }
 0x361   :  { %v5295_v48 = vrot.slane %v5293_v6, 5  ;;  %v5490_v6 = vld [vmem:[#allocation2 + $0x88] sm:$0xe] }
 0x362   :  { %v5254_v54 = vsel %vm7849_vm4, %v5249_v62, %v5253_v41  ;;  %v6715_v62 = vrot.slane %v5482_v43, 9 }
 0x363   :  { %v6699_v42 = vcombine.low %v5240_v5, %v5254_v54  ;;  %v5296_v16 = vsel %vm7849_vm4, %v5291_v18, %v5295_v48  ;;  %v5555_v5 = vrot.slane %v9585_v9, 5  ;;  %v5571_v18 = vrot.slane %v9615_v44, 5  ;;  %v5492_v48 = vld [vmem:[#allocation2 + $0x98] sm:$0xe] }
 0x364   :  { %v5548_v12 = vsel %vm9160_vm2, %v6715_v62, %v5547_v58  ;;  %v6725_v59 = vrot.slane %v5492_v48, 9 }
 0x365   :  { %7239 = vmatmul.mubr.msk.bf16.vlgmr.msra.gmra.mrb[8].mxu1 %vm2476_vm5, %v6695_v4  ;;  %v5298_v4 = vshrl.u32 %v5085_v24, 16  ;;  %v6710_v24 = vrot.slane %v5477_v36, 9 }
 0x366   :  { %7242 = vmatprep.mubr.msk.bf16.mxu1 %vm2476_vm5, %v6696_v31  ;;  %7255 = vmatpush3.bf16.msra.mxu1 %v5640_v11  ;;  %v9619_v11 = vld [vmem:[#allocation2 + $0x8c] sm:$0x1] }
 0x367   :  { %v5279_v27 = vshll.u32 %v9619_v11, 16  ;;  %v5300_v53 = vrot.slane %v5298_v4, 4  ;;  %v5528_v23 = vsel %vm9160_vm2, %v6710_v24, %v5527_v13  ;;  %v5532_v4 = vsel %vm9160_vm2, %v6711_v30, %v5531_v0 }
 0x368   :  { %v6727_v1 = vcombine.low %v5528_v23, %v5532_v4  ;;  %v6723_v24 = vrot.slane %v5490_v6, 9  ;;  %v5579_v13 = vrot.slane %v9619_v11, 5 }
 0x369   :  { %v5281_v63 = vrot.slane %v5279_v27, 5  ;;  %v5304_v15 = vor.u32 %v5303_v28, %v5300_v53  ;;  %v5484_v53 = vld [vmem:[#allocation2 + $0x48] sm:$0xe] }
 0x36a   :  { %v5486_v28 = vld [vmem:[#allocation2 + $0x68] sm:$0xe]  ;;  %v6717_v41 = vrot.slane %v5484_v53, 9 }
 0x36b   :  { %v5282_v31 = vsel %vm7849_vm4, %v5277_v14, %v5281_v63  ;;  %v5305_v55 = vrot.slane %v5304_v15, 4  ;;  %v5551_v14 = vrot.slane %v9583_v50, 5  ;;  %v5559_v63 = vrot.slane %v9594_v61, 5  ;;  %v5487_v50 = vld [vmem:[#allocation2 + $0x70] sm:$0xe] }
 0x36c   :  { %v6700_v56 = vcombine.low %v5268_v34, %v5282_v31  ;;  %v6719_v54 = vrot.slane %v5486_v28, 9  ;;  %v5556_v8 = vsel %vm9160_vm2, %v6717_v41, %v5555_v5  ;;  %v5488_v31 = vld [vmem:[#allocation2 + $0x78] sm:$0xe]  ;;  %v5489_v61 = vld [vmem:[#allocation2 + $0x80] sm:$0xe]  ;;  %v6720_v17 = vrot.slane %v5487_v50, 9 }
 0x36d   :  { %7243 = vmatmul.mubr.msk.bf16.gmra.mrb[12].mxu1 %vm2476_vm5, %v6697_v33  ;;  %v5310_v2 = vsel %vm7849_vm4, %v5305_v55, %v5309_v38  ;;  %v5535_v33 = vrot.slane %v9557_v29, 5  ;;  %v5483_v29 = vld [vmem:[#allocation2 + $0x40] sm:$0xe]  ;;  %v6722_v55 = vrot.slane %v5489_v61, 9  ;;  %v5575_v38 = vrot.slane %v9617_v35, 5 }
 0x36e   :  { %7246 = vmatprep.mubr.msk.bf16.mxu1 %vm2476_vm5, %v6698_v40  ;;  %v6701_v20 = vcombine.low %v5296_v16, %v5310_v2  ;;  %v5543_v40 = vrot.slane %v9567_v39, 5  ;;  %v5485_v39 = vld [vmem:[#allocation2 + $0x60] sm:$0xe]  ;;  %v6716_v3 = vrot.slane %v5483_v29, 9  ;;  %v5564_v34 = vsel %vm9160_vm2, %v6719_v54, %v5563_v10 }
 0x36f   :  { %v5536_v27 = vsel %vm9160_vm2, %v6712_v45, %v5535_v33  ;;  %v6718_v21 = vrot.slane %v5485_v39, 9  ;;  %v5576_v44 = vsel %vm9160_vm2, %v6722_v55, %v5575_v38  ;;  %v5580_v35 = vsel %vm9160_vm2, %v6723_v24, %v5579_v13 }
 0x370   :  { %v5544_v52 = vsel %vm9160_vm2, %v6714_v57, %v5543_v40  ;;  %v6728_v25 = vcombine.low %v5536_v27, %v5540_v46  ;;  %v5552_v15 = vsel %vm9160_vm2, %v6716_v3, %v5551_v14  ;;  %v5587_v45 = vrot.slane %v9631_v60, 5 }
 0x371   :  { %v6729_v49 = vcombine.low %v5544_v52, %v5548_v12  ;;  %v5560_v9 = vsel %vm9160_vm2, %v6718_v21, %v5559_v63  ;;  %v6730_v36 = vcombine.low %v5552_v15, %v5556_v8 }
 0x372   :  { %v6731_v37 = vcombine.low %v5560_v9, %v5564_v34  ;;  %v5588_v60 = vsel %vm9160_vm2, %v6725_v59, %v5587_v45 }
 0x375   :  { %7247 = vmatmul.mubr.msk.bf16.gmra.mrb[16].mxu1 %vm2476_vm5, %v6699_v42  ;;  %v5567_v42 = vrot.slane %v9607_v26, 5  ;;  %v5491_v26 = vld [vmem:[#allocation2 + $0x90] sm:$0xe] }
 0x376   :  { %7250 = vmatprep.mubr.msk.bf16.mxu1 %vm2476_vm5, %v6700_v56  ;;  %v6721_v56 = vrot.slane %v5488_v31, 9  ;;  %v6724_v4 = vrot.slane %v5491_v26, 9 }
 0x377   :  { %v5568_v30 = vsel %vm9160_vm2, %v6720_v17, %v5567_v42 }
 0x378   :  { %v5572_v0 = vsel %vm9160_vm2, %v6721_v56, %v5571_v18  ;;  %v5584_v51 = vsel %vm9160_vm2, %v6724_v4, %v5583_v7 }
 0x379   :  { %v6732_v23 = vcombine.low %v5568_v30, %v5572_v0  ;;  %v6734_v29 = vcombine.low %v5584_v51, %v5588_v60 }
 0x37d   :  { %7251 = vmatmul.mubr.msk.bf16.gmra.mrb[20].mxu1 %vm2476_vm5, %v6701_v20  ;;  %v9691_v16 = vpop.f32.mrb[16].mxu0  ;;  %v6733_v20 = vcombine.low %v5576_v44, %v5580_v35 }
 0x37e   :  { %7256 = vmatprep.mubr.msk.bf16.mxu1 %vm2476_vm5, %v6727_v1  ;;  %v9697_v2 = vpop.f32.mrb[17].mxu0  ;;  %v6096_v1 = vsel %vm2476_vm5, %v9691_v16, 0.0 }
 0x37f   :  { %v6093_v11 = vsel %vm2476_vm5, %v9697_v2, 0.0  ;;  %v9701_v19 = vpop.f32.mrb[18].mxu0 }
 0x380   :  { %v6031_v43 = vpop.f32.mrb[19].mxu0  ;;  %v6098_v47 = vsel %vm2476_vm5, %v9701_v19, 0.0 }
 0x381   :  { %v6094_v33 = vsel %vm2476_vm5, %v6031_v43, 0.0 }
 0x382   :  { %v6095_v22 = vadd.f32 %v6094_v33, %v6093_v11 }
 0x384   :  { %v6097_v57 = vadd.f32 %v6096_v1, %v6095_v22 }
 0x385   :  { %7257 = vmatmul.mubr.msk.bf16.vlgmr.msra.gmra.mrb[8].mxu1 %vm2476_vm5, %v6728_v25  ;;  %v7280_v40 = vpop.f32.mrb[20].mxu0 }
 0x386   :  { %7260 = vmatprep.mubr.msk.bf16.mxu1 %vm2476_vm5, %v6729_v49  ;;  %v6044_v62 = vpop.f32.mrb[21].mxu0  ;;  %v6099_v58 = vadd.f32 %v6098_v47, %v6097_v57  ;;  %v6104_v53 = vsel %vm2476_vm5, %v7280_v40, 0.0 }
 0x387   :  { %v6100_v27 = vsel %vm2476_vm5, %v6044_v62, 0.0  ;;  %v7281_v46 = vpop.f32.mrb[22].mxu0 }
 0x388   :  { %v6101_v52 = vadd.f32 %v6100_v27, %v6099_v58  ;;  %v6047_v12 = vpop.f32.mrb[23].mxu0  ;;  %v6106_v25 = vsel %vm2476_vm5, %v7281_v46, 0.0 }
 0x389   :  { %v6102_v39 = vsel %vm2476_vm5, %v6047_v12, 0.0 }
 0x38a   :  { %v6103_v28 = vadd.f32 %v6102_v39, %v6101_v52 }
 0x38c   :  { %v6105_v32 = vadd.f32 %v6104_v53, %v6103_v28 }
 0x38d   :  { %7261 = vmatmul.mubr.msk.bf16.gmra.mrb[12].mxu1 %vm2476_vm5, %v6730_v36  ;;  %v7284_v3 = vpop.f32.mrb[24].mxu0 }
 0x38e   :  { %7264 = vmatprep.mubr.msk.bf16.mxu1 %vm2476_vm5, %v6731_v37  ;;  %v6060_v49 = vpop.f32.mrb[25].mxu0  ;;  %v6107_v14 = vadd.f32 %v6106_v25, %v6105_v32  ;;  %v6112_v54 = vsel %vm2476_vm5, %v7284_v3, 0.0 }
 0x38f   :  { %v6108_v41 = vsel %vm2476_vm5, %v6060_v49, 0.0  ;;  %v7285_v5 = vpop.f32.mrb[26].mxu0 }
 0x390   :  { %v6109_v21 = vadd.f32 %v6108_v41, %v6107_v14  ;;  %v6063_v63 = vpop.f32.mrb[27].mxu0  ;;  %v6114_v8 = vsel %vm2476_vm5, %v7285_v5, 0.0 }
 0x391   :  { %v6110_v10 = vsel %vm2476_vm5, %v6063_v63, 0.0 }
 0x392   :  { %v6111_v15 = vadd.f32 %v6110_v10, %v6109_v21 }
 0x394   :  { %v6113_v50 = vadd.f32 %v6112_v54, %v6111_v15 }
 0x395   :  { %7265 = vmatmul.mubr.msk.bf16.gmra.mrb[16].mxu1 %vm2476_vm5, %v6732_v23  ;;  %v7288_v9 = vpop.f32.mrb[28].mxu0 }
 0x396   :  { %7268 = vmatprep.mubr.msk.bf16.mxu1 %vm2476_vm5, %v6733_v20  ;;  %v6076_v34 = vpop.f32.mrb[29].mxu0  ;;  %v6115_v31 = vadd.f32 %v6114_v8, %v6113_v50  ;;  %v6120_v37 = vsel %vm2476_vm5, %v7288_v9, 0.0 }
 0x397   :  { %v6116_v61 = vsel %vm2476_vm5, %v6076_v34, 0.0  ;;  %v7289_v6 = vpop.f32.mrb[30].mxu0 }
 0x398   :  { %v6117_v36 = vadd.f32 %v6116_v61, %v6115_v31  ;;  %v6079_v17 = vpop.f32.mrb[31].mxu0  ;;  %v6122_v18 = vsel %vm2476_vm5, %v7289_v6, 0.0 }
 0x399   :  { %v6118_v42 = vsel %vm2476_vm5, %v6079_v17, 0.0 }
 0x39a   :  { %v6119_v56 = vadd.f32 %v6118_v42, %v6117_v36 }
 0x39c   :  { %v6121_v55 = vadd.f32 %v6120_v37, %v6119_v56 }
 0x39d   :  { %7269 = vmatmul.mubr.msk.bf16.gmra.mrb[20].mxu1 %vm2476_vm5, %v6734_v29 }
 0x39e   :  { %v6123_v38 = vadd.f32 %v6122_v18, %v6121_v55 }
 0x3a0   :  { %v6124_v24 = vrot.slane %v6123_v38, 4 }
 0x3a2   :  { %v6125_v13 = vadd.f32 %v6124_v24, %v6123_v38 }
 0x3a4   :  { %v6126_v30 = vrot.slane %v6125_v13, 2 }
 0x3a6   :  { %v6127_v0 = vadd.f32 %v6126_v30, %v6125_v13 }
 0x3a8   :  { %v6128_v26 = vrot.slane %v6127_v0, 1 }
 0x3aa   :  { %v6129_v48 = vadd.f32 %v6128_v26, %v6127_v0 }
 0x3ac   :  { %v6130_v44 = vmul.f32 0.0078125, %v6129_v48 }
 0x3ae   :  { %v9730_v35 = vsub.f32 %v9697_v2, %v6130_v44  ;;  %v9732_v11 = vsub.f32 %v6031_v43, %v6130_v44  ;;  %v9735_v23 = vsub.f32 %v9691_v16, %v6130_v44  ;;  %v9738_v4 = vsub.f32 %v9701_v19, %v6130_v44 }
 0x3af   :  { %v9740_v7 = vsub.f32 %v6044_v62, %v6130_v44  ;;  %v9742_v59 = vsub.f32 %v6047_v12, %v6130_v44  ;;  %v9744_v20 = vsub.f32 %v7280_v40, %v6130_v44  ;;  %v9746_v45 = vsub.f32 %v7281_v46, %v6130_v44 }
 0x3b0   :  { %v9748_v1 = vsub.f32 %v6060_v49, %v6130_v44  ;;  %v9750_v2 = vsub.f32 %v6063_v63, %v6130_v44  ;;  %v9752_v43 = vsub.f32 %v7284_v3, %v6130_v44  ;;  %v9754_v33 = vsub.f32 %v7285_v5, %v6130_v44 }
 0x3b1   :  { %v9756_v16 = vsub.f32 %v6076_v34, %v6130_v44  ;;  %v9758_v19 = vsub.f32 %v6079_v17, %v6130_v44  ;;  %v9760_v22 = vsub.f32 %v7288_v9, %v6130_v44  ;;  %v9762_v47 = vsub.f32 %v7289_v6, %v6130_v44 }
 0x3b2   :  { %v6147_v57 = vmul.f32 %v9730_v35, %v9730_v35  ;;  %v6148_v51 = vmul.f32 %v9732_v11, %v9732_v11  ;;  %v6149_v60 = vmul.f32 %v9735_v23, %v9735_v23  ;;  %v6150_v40 = vmul.f32 %v9738_v4, %v9738_v4 }
 0x3b3   :  { %v6151_v62 = vmul.f32 %v9740_v7, %v9740_v7  ;;  %v6152_v52 = vmul.f32 %v9742_v59, %v9742_v59  ;;  %v6153_v39 = vmul.f32 %v9744_v20, %v9744_v20  ;;  %v6154_v32 = vmul.f32 %v9746_v45, %v9746_v45 }
 0x3b4   :  { %v6163_v58 = vsel %vm2476_vm5, %v6147_v57, 0.0  ;;  %v6164_v27 = vsel %vm2476_vm5, %v6148_v51, 0.0  ;;  %v6166_v46 = vsel %vm2476_vm5, %v6149_v60, 0.0  ;;  %v6168_v12 = vsel %vm2476_vm5, %v6150_v40, 0.0 }
 0x3b5   :  { %v6165_v29 = vadd.f32 %v6164_v27, %v6163_v58  ;;  %v6170_v28 = vsel %vm2476_vm5, %v6151_v62, 0.0  ;;  %v6172_v3 = vsel %vm2476_vm5, %v6152_v52, 0.0  ;;  %v6155_v14 = vmul.f32 %v9748_v1, %v9748_v1 }
 0x3b6   :  { %v6174_v41 = vsel %vm2476_vm5, %v6153_v39, 0.0  ;;  %v6156_v21 = vmul.f32 %v9750_v2, %v9750_v2  ;;  %v6176_v63 = vsel %vm2476_vm5, %v6154_v32, 0.0  ;;  %v6157_v10 = vmul.f32 %v9752_v43, %v9752_v43 }
 0x3b7   :  { %v6167_v53 = vadd.f32 %v6166_v46, %v6165_v29  ;;  %v6178_v15 = vsel %vm2476_vm5, %v6155_v14, 0.0  ;;  %v6158_v50 = vmul.f32 %v9754_v33, %v9754_v33  ;;  %v6159_v31 = vmul.f32 %v9756_v16, %v9756_v16  ;;  %v6091_v46 = vld [vmem:[%s10041_s11] sm:$0x1] }
 0x3b8   :  { %v6180_v9 = vsel %vm2476_vm5, %v6156_v21, 0.0  ;;  %v6182_v61 = vsel %vm2476_vm5, %v6157_v10, 0.0  ;;  %v6160_v36 = vmul.f32 %v9758_v19, %v9758_v19  ;;  %v6161_v42 = vmul.f32 %v9760_v22, %v9760_v22 }
 0x3b9   :  { %v6169_v25 = vadd.f32 %v6168_v12, %v6167_v53  ;;  %v6184_v17 = vsel %vm2476_vm5, %v6158_v50, 0.0  ;;  %v6186_v56 = vsel %vm2476_vm5, %v6159_v31, 0.0  ;;  %v6162_v55 = vmul.f32 %v9762_v47, %v9762_v47  ;;  %v10081_v12 = vld [vmem:[#allocation8_spill] sm:$0xff] }
 0x3ba   :  { %v6188_v38 = vsel %vm2476_vm5, %v6160_v36, 0.0  ;;  %v6190_v13 = vsel %vm2476_vm5, %v6161_v42, 0.0 }
 0x3bb   :  { %v6171_v49 = vadd.f32 %v6170_v28, %v6169_v25  ;;  %v6192_v0 = vsel %vm2476_vm5, %v6162_v55, 0.0 }
 0x3bd   :  { %v6173_v5 = vadd.f32 %v6172_v3, %v6171_v49 }
 0x3bf   :  { %v6175_v54 = vadd.f32 %v6174_v41, %v6173_v5 }
 0x3c1   :  { %v6177_v8 = vadd.f32 %v6176_v63, %v6175_v54 }
 0x3c3   :  { %v6179_v34 = vadd.f32 %v6178_v15, %v6177_v8 }
 0x3c5   :  { %v6181_v6 = vadd.f32 %v6180_v9, %v6179_v34 }
 0x3c7   :  { %v6183_v37 = vadd.f32 %v6182_v61, %v6181_v6 }
 0x3c9   :  { %v6185_v18 = vadd.f32 %v6184_v17, %v6183_v37 }
 0x3cb   :  { %v6187_v24 = vadd.f32 %v6186_v56, %v6185_v18 }
 0x3cd   :  { %v6189_v30 = vadd.f32 %v6188_v38, %v6187_v24 }
 0x3cf   :  { %v6191_v26 = vadd.f32 %v6190_v13, %v6189_v30 }
 0x3d1   :  { %v6193_v48 = vadd.f32 %v6192_v0, %v6191_v26 }
 0x3d3   :  { %v6194_v44 = vrot.slane %v6193_v48, 4 }
 0x3d5   :  { %v6195_v57 = vadd.f32 %v6194_v44, %v6193_v48 }
 0x3d7   :  { %v6196_v51 = vrot.slane %v6195_v57, 2 }
 0x3d9   :  { %v6197_v60 = vadd.f32 %v6196_v51, %v6195_v57 }
 0x3db   :  { %v6198_v40 = vrot.slane %v6197_v60, 1 }
 0x3dd   :  { %v6199_v62 = vadd.f32 %v6198_v40, %v6197_v60 }
 0x3df   :  { %v6200_v58 = vmul.f32 0.0078125, %v6199_v62 }
 0x3e1   :  { %v6201_v27 = vadd.f32 1e-05, %v6200_v58 }
 0x3e3   :  { %7653 = vrsqrt.f32 %v6201_v27 }
 0x3ed   :  { %v7654_v29 = vpop.eup %7653 }
 0x3ee   :  { %v6203_v52 = vmul.f32 %v7654_v29, %v6091_v46 }
 0x3f0   :  { %v6207_v53 = vrot.slane %v6203_v52, %v10081_v12 }
 0x3f2   :  { %v9817_v39 = vmul.f32 %v6207_v53, %v9730_v35  ;;  %v9820_v28 = vmul.f32 %v6207_v53, %v9732_v11  ;;  %v9823_v25 = vmul.f32 %v6207_v53, %v9735_v23  ;;  %v9826_v32 = vmul.f32 %v6207_v53, %v9738_v4 }
 0x3f3   :  { %v9829_v3 = vmul.f32 %v6207_v53, %v9740_v7  ;;  %v9832_v49 = vmul.f32 %v6207_v53, %v9742_v59  ;;  %v9835_v14 = vmul.f32 %v6207_v53, %v9744_v20  ;;  %v9838_v35 = vmul.f32 %v6207_v53, %v9746_v45 }
 0x3f4   :  { %v9841_v11 = vmul.f32 %v6207_v53, %v9748_v1  ;;  %v9844_v23 = vmul.f32 %v6207_v53, %v9750_v2  ;;  %v9847_v4 = vmul.f32 %v6207_v53, %v9752_v43  ;;  %v9850_v7 = vmul.f32 %v6207_v53, %v9754_v33 }
 0x3f5   :  { %v9853_v59 = vmul.f32 %v6207_v53, %v9756_v16  ;;  %v9856_v20 = vmul.f32 %v6207_v53, %v9758_v19  ;;  %v9859_v45 = vmul.f32 %v6207_v53, %v9760_v22  ;;  %v9862_v1 = vmul.f32 %v6207_v53, %v9762_v47 }
 0x458   :  { %v7258_v2 = vpop.f32.mrb[8].mxu1 }
 0x459   :  { %v5676_v41 = vpop.f32.mrb[9].mxu1  ;;  %v5760_v16 = vsel %vm2476_vm5, %v7258_v2, 0.0 }
 0x45a   :  { %v7259_v5 = vpop.f32.mrb[10].mxu1  ;;  %v5757_v21 = vsel %vm2476_vm5, %v5676_v41, 0.0 }
 0x45b   :  { %v5679_v43 = vpop.f32.mrb[11].mxu1  ;;  %v5762_v19 = vsel %vm2476_vm5, %v7259_v5, 0.0 }
 0x45c   :  { %v5758_v33 = vsel %vm2476_vm5, %v5679_v43, 0.0 }
 0x45d   :  { %v5759_v63 = vadd.f32 %v5758_v33, %v5757_v21 }
 0x45f   :  { %v5761_v54 = vadd.f32 %v5760_v16, %v5759_v63 }
 0x460   :  { %v7262_v10 = vpop.f32.mrb[12].mxu1 }
 0x461   :  { %v5692_v22 = vpop.f32.mrb[13].mxu1  ;;  %v5763_v15 = vadd.f32 %v5762_v19, %v5761_v54  ;;  %v5768_v61 = vsel %vm2476_vm5, %v7262_v10, 0.0 }
 0x462   :  { %v5764_v47 = vsel %vm2476_vm5, %v5692_v22, 0.0  ;;  %v7263_v8 = vpop.f32.mrb[14].mxu1 }
 0x463   :  { %v5765_v50 = vadd.f32 %v5764_v47, %v5763_v15  ;;  %v5695_v9 = vpop.f32.mrb[15].mxu1  ;;  %v5770_v36 = vsel %vm2476_vm5, %v7263_v8, 0.0 }
 0x464   :  { %v5766_v34 = vsel %vm2476_vm5, %v5695_v9, 0.0 }
 0x465   :  { %v5767_v31 = vadd.f32 %v5766_v34, %v5765_v50 }
 0x467   :  { %v5769_v6 = vadd.f32 %v5768_v61, %v5767_v31 }
 0x468   :  { %v7266_v17 = vpop.f32.mrb[16].mxu1 }
 0x469   :  { %v5708_v37 = vpop.f32.mrb[17].mxu1  ;;  %v5771_v42 = vadd.f32 %v5770_v36, %v5769_v6  ;;  %v5776_v30 = vsel %vm2476_vm5, %v7266_v17, 0.0 }
 0x46a   :  { %v5772_v56 = vsel %vm2476_vm5, %v5708_v37, 0.0  ;;  %v7267_v18 = vpop.f32.mrb[18].mxu1 }
 0x46b   :  { %v5773_v55 = vadd.f32 %v5772_v56, %v5771_v42  ;;  %v5711_v38 = vpop.f32.mrb[19].mxu1  ;;  %v5778_v26 = vsel %vm2476_vm5, %v7267_v18, 0.0 }
 0x46c   :  { %v5774_v24 = vsel %vm2476_vm5, %v5711_v38, 0.0 }
 0x46d   :  { %v5775_v13 = vadd.f32 %v5774_v24, %v5773_v55 }
 0x46f   :  { %v5777_v0 = vadd.f32 %v5776_v30, %v5775_v13 }
 0x470   :  { %v7270_v48 = vpop.f32.mrb[20].mxu1 }
 0x471   :  { %v5724_v44 = vpop.f32.mrb[21].mxu1  ;;  %v5779_v57 = vadd.f32 %v5778_v26, %v5777_v0  ;;  %v5784_v46 = vsel %vm2476_vm5, %v7270_v48, 0.0 }
 0x472   :  { %v5780_v51 = vsel %vm2476_vm5, %v5724_v44, 0.0  ;;  %v7271_v60 = vpop.f32.mrb[22].mxu1 }
 0x473   :  { %v5781_v40 = vadd.f32 %v5780_v51, %v5779_v57  ;;  %v5727_v62 = vpop.f32.mrb[23].mxu1  ;;  %v5786_v52 = vsel %vm2476_vm5, %v7271_v60, 0.0 }
 0x474   :  { %v5782_v58 = vsel %vm2476_vm5, %v5727_v62, 0.0 }
 0x475   :  { %v5783_v27 = vadd.f32 %v5782_v58, %v5781_v40 }
 0x477   :  { %v5785_v29 = vadd.f32 %v5784_v46, %v5783_v27 }
 0x479   :  { %v5787_v53 = vadd.f32 %v5786_v52, %v5785_v29 }
 0x47b   :  { %v5788_v21 = vrot.slane %v5787_v53, 4 }
 0x47d   :  { %v5789_v33 = vadd.f32 %v5788_v21, %v5787_v53 }
 0x47f   :  { %v5790_v63 = vrot.slane %v5789_v33, 2 }
 0x481   :  { %v5791_v16 = vadd.f32 %v5790_v63, %v5789_v33 }
 0x483   :  { %v5792_v54 = vrot.slane %v5791_v16, 1 }
 0x485   :  { %v5793_v19 = vadd.f32 %v5792_v54, %v5791_v16 }
 0x487   :  { %v5794_v15 = vmul.f32 0.0078125, %v5793_v19 }
 0x489   :  { %v9880_v47 = vsub.f32 %v5676_v41, %v5794_v15  ;;  %v9882_v50 = vsub.f32 %v5679_v43, %v5794_v15  ;;  %v9884_v34 = vsub.f32 %v7258_v2, %v5794_v15  ;;  %v9886_v31 = vsub.f32 %v7259_v5, %v5794_v15 }
 0x48a   :  { %v9888_v61 = vsub.f32 %v5692_v22, %v5794_v15  ;;  %v9890_v6 = vsub.f32 %v5695_v9, %v5794_v15  ;;  %v9892_v36 = vsub.f32 %v7262_v10, %v5794_v15  ;;  %v9894_v42 = vsub.f32 %v7263_v8, %v5794_v15 }
 0x48b   :  { %v9896_v56 = vsub.f32 %v5708_v37, %v5794_v15  ;;  %v9898_v55 = vsub.f32 %v5711_v38, %v5794_v15  ;;  %v9900_v41 = vsub.f32 %v7266_v17, %v5794_v15  ;;  %v9902_v43 = vsub.f32 %v7267_v18, %v5794_v15 }
 0x48c   :  { %v9904_v2 = vsub.f32 %v5724_v44, %v5794_v15  ;;  %v9906_v5 = vsub.f32 %v5727_v62, %v5794_v15  ;;  %v9908_v22 = vsub.f32 %v7270_v48, %v5794_v15  ;;  %v9910_v9 = vsub.f32 %v7271_v60, %v5794_v15 }
 0x48d   :  { %v5811_v10 = vmul.f32 %v9880_v47, %v9880_v47  ;;  %v5812_v8 = vmul.f32 %v9882_v50, %v9882_v50  ;;  %v5813_v17 = vmul.f32 %v9884_v34, %v9884_v34  ;;  %v5814_v37 = vmul.f32 %v9886_v31, %v9886_v31 }
 0x48e   :  { %v5815_v13 = vmul.f32 %v9888_v61, %v9888_v61  ;;  %v5816_v26 = vmul.f32 %v9890_v6, %v9890_v6  ;;  %v5817_v57 = vmul.f32 %v9892_v36, %v9892_v36  ;;  %v5818_v40 = vmul.f32 %v9894_v42, %v9894_v42 }
 0x48f   :  { %v5827_v18 = vsel %vm2476_vm5, %v5811_v10, 0.0  ;;  %v5828_v38 = vsel %vm2476_vm5, %v5812_v8, 0.0  ;;  %v5830_v30 = vsel %vm2476_vm5, %v5813_v17, 0.0  ;;  %v5832_v48 = vsel %vm2476_vm5, %v5814_v37, 0.0 }
 0x490   :  { %v5829_v24 = vadd.f32 %v5828_v38, %v5827_v18  ;;  %v5834_v51 = vsel %vm2476_vm5, %v5815_v13, 0.0  ;;  %v5836_v62 = vsel %vm2476_vm5, %v5816_v26, 0.0  ;;  %v5819_v27 = vmul.f32 %v9896_v56, %v9896_v56 }
 0x491   :  { %v5838_v46 = vsel %vm2476_vm5, %v5817_v57, 0.0  ;;  %v5820_v52 = vmul.f32 %v9898_v55, %v9898_v55  ;;  %v5840_v53 = vsel %vm2476_vm5, %v5818_v40, 0.0  ;;  %v5821_v33 = vmul.f32 %v9900_v41, %v9900_v41 }
 0x492   :  { %v5831_v0 = vadd.f32 %v5830_v30, %v5829_v24  ;;  %v5842_v63 = vsel %vm2476_vm5, %v5819_v27, 0.0  ;;  %v5822_v54 = vmul.f32 %v9902_v43, %v9902_v43  ;;  %v5823_v10 = vmul.f32 %v9904_v2, %v9904_v2 }
 0x493   :  { %v5844_v19 = vsel %vm2476_vm5, %v5820_v52, 0.0  ;;  %v5846_v8 = vsel %vm2476_vm5, %v5821_v33, 0.0  ;;  %v5824_v37 = vmul.f32 %v9906_v5, %v9906_v5  ;;  %v5825_v24 = vmul.f32 %v9908_v22, %v9908_v22  ;;  %v5755_v33 = vld [vmem:[%s10038_s8] sm:$0x1] }
 0x494   :  { %v5833_v44 = vadd.f32 %v5832_v48, %v5831_v0  ;;  %v5848_v18 = vsel %vm2476_vm5, %v5822_v54, 0.0  ;;  %v5850_v13 = vsel %vm2476_vm5, %v5823_v10, 0.0  ;;  %v5826_v0 = vmul.f32 %v9910_v9, %v9910_v9 }
 0x495   :  { %v5852_v26 = vsel %vm2476_vm5, %v5824_v37, 0.0 }
 0x496   :  { %v5835_v60 = vadd.f32 %v5834_v51, %v5833_v44  ;;  %v5854_v44 = vsel %vm2476_vm5, %v5825_v24, 0.0  ;;  %v5856_v51 = vsel %vm2476_vm5, %v5826_v0, 0.0 }
 0x498   :  { %v5837_v58 = vadd.f32 %v5836_v62, %v5835_v60 }
 0x49a   :  { %v5839_v29 = vadd.f32 %v5838_v46, %v5837_v58 }
 0x49c   :  { %v5841_v21 = vadd.f32 %v5840_v53, %v5839_v29 }
 0x49e   :  { %v5843_v16 = vadd.f32 %v5842_v63, %v5841_v21  ;;  %v6760_v21 = vld [vmem:[%s10042_s12] ss:$0 sm:$0xff] }
 0x49f   :  { %v6231_v54 = vadd.f32 %v6760_v21, %v9820_v28  ;;  %v6234_v10 = vadd.f32 %v6760_v21, %v9829_v3  ;;  %v6236_v37 = vadd.f32 %v6760_v21, %v9835_v14  ;;  %v6239_v24 = vadd.f32 %v6760_v21, %v9844_v23 }
 0x4a0   :  { %v5845_v15 = vadd.f32 %v5844_v19, %v5843_v16  ;;  %v6230_v16 = vadd.f32 %v6760_v21, %v9817_v39  ;;  %v6232_v19 = vadd.f32 %v6760_v21, %v9823_v25  ;;  %v6240_v39 = vadd.f32 %v6760_v21, %v9847_v4 }
 0x4a1   :  { %v6241_v28 = vadd.f32 %v6760_v21, %v9850_v7  ;;  %v6243_v3 = vadd.f32 %v6760_v21, %v9856_v20  ;;  %v6245_v14 = vadd.f32 %v6760_v21, %v9862_v1 }
 0x4a2   :  { %v5847_v17 = vadd.f32 %v5846_v8, %v5845_v15  ;;  %v6233_v15 = vadd.f32 %v6760_v21, %v9826_v32  ;;  %v6242_v32 = vadd.f32 %v6760_v21, %v9853_v59 }
 0x4a4   :  { %v5849_v38 = vadd.f32 %v5848_v18, %v5847_v17  ;;  %v6235_v17 = vadd.f32 %v6760_v21, %v9832_v49  ;;  %v6237_v18 = vadd.f32 %v6760_v21, %v9838_v35  ;;  %v6244_v49 = vadd.f32 %v6760_v21, %v9859_v45 }
 0x4a6   :  { %v5851_v30 = vadd.f32 %v5850_v13, %v5849_v38  ;;  %v6238_v38 = vadd.f32 %v6760_v21, %v9841_v11 }
 0x4a8   :  { %v5853_v48 = vadd.f32 %v5852_v26, %v5851_v30 }
 0x4aa   :  { %v5855_v57 = vadd.f32 %v5854_v44, %v5853_v48 }
 0x4ac   :  { %v5857_v60 = vadd.f32 %v5856_v51, %v5855_v57 }
 0x4ae   :  { %v5858_v40 = vrot.slane %v5857_v60, 4 }
 0x4b0   :  { %v5859_v62 = vadd.f32 %v5858_v40, %v5857_v60 }
 0x4b2   :  { %v5860_v58 = vrot.slane %v5859_v62, 2 }
 0x4b4   :  { %v5861_v27 = vadd.f32 %v5860_v58, %v5859_v62 }
 0x4b6   :  { %v5862_v46 = vrot.slane %v5861_v27, 1 }
 0x4b8   :  { %v5863_v29 = vadd.f32 %v5862_v46, %v5861_v27 }
 0x4ba   :  { %v5864_v52 = vmul.f32 0.0078125, %v5863_v29 }
 0x4bc   :  { %v5865_v53 = vadd.f32 1e-05, %v5864_v52 }
 0x4be   :  { %7655 = vrsqrt.f32 %v5865_v53 }
 0x4c8   :  { %v7656_v63 = vpop.eup %7655 }
 0x4c9   :  { %v5867_v8 = vmul.f32 %v7656_v63, %v5755_v33 }
 0x4cb   :  { %v5871_v25 = vrot.slane %v5867_v8, %v10081_v12  ;;  %v6743_v12 = vld [vmem:[%s10039_s9] ss:$0 sm:$0xff]  ;;  %s7684_s9 = smov [#allocation3]  }
 0x4cc   :  { %s6299_s26 = sshll.u32 %s7684_s9, 4  ;;  %s6300_s26 = int_to_ptr.vmem [resolvable:$true] %s6299_s26 }
 0x4cd   :  { %v5872_v35 = vmul.f32 %v5871_v25, %v9880_v47  ;;  %v5873_v11 = vmul.f32 %v5871_v25, %v9882_v50  ;;  %v5874_v23 = vmul.f32 %v5871_v25, %v9884_v34  ;;  %v5875_v4 = vmul.f32 %v5871_v25, %v9886_v31  ;;  %s7659_s27 = scalar_lea.vmem %s6300_s26, 2048  ;;  %p7664_p1 = scmp.lt.s32.totalorder %s6300_s26, %s6300_s26 }
 0x4ce   :  { %v5876_v7 = vmul.f32 %v5871_v25, %v9888_v61  ;;  %v5877_v59 = vmul.f32 %v5871_v25, %v9890_v6  ;;  %v5878_v20 = vmul.f32 %v5871_v25, %v9892_v36  ;;  %v5879_v45 = vmul.f32 %v5871_v25, %v9894_v42  ;;  %p7660_p0 = scmp.ne.s32.totalorder %s6300_s26, %s7659_s27  ;;  %p7665_p2 = scmp.lt.s32.totalorder %s7659_s27, %s7659_s27 }
 0x4cf   :  { %v5880_v1 = vmul.f32 %v5871_v25, %v9896_v56  ;;  %v5881_v47 = vmul.f32 %v5871_v25, %v9898_v55  ;;  %v5882_v50 = vmul.f32 %v5871_v25, %v9900_v41  ;;  %v5883_v34 = vmul.f32 %v5871_v25, %v9902_v43 }
 0x4d0   :  { %v5884_v31 = vmul.f32 %v5871_v25, %v9904_v2  ;;  %v5885_v13 = vmul.f32 %v5871_v25, %v9906_v5  ;;  %v5886_v61 = vmul.f32 %v5871_v25, %v9908_v22  ;;  %v5887_v6 = vmul.f32 %v5871_v25, %v9910_v9  ;;  %p7666_p3 = por %p7665_p2, %p7664_p1 }
 0x4d1   :  { %v5894_v30 = vadd.f32 %v6743_v12, %v5872_v35  ;;  %v5895_v36 = vadd.f32 %v6743_v12, %v5873_v11  ;;  %v5896_v0 = vadd.f32 %v6743_v12, %v5874_v23  ;;  %v5897_v42 = vadd.f32 %v6743_v12, %v5875_v4 }
 0x4d2   :  { %v5898_v26 = vadd.f32 %v6743_v12, %v5876_v7  ;;  %v5899_v56 = vadd.f32 %v6743_v12, %v5877_v59  ;;  %v5900_v48 = vadd.f32 %v6743_v12, %v5878_v20  ;;  %v5901_v55 = vadd.f32 %v6743_v12, %v5879_v45  ;;  %p7667_p4 = pnand %p7666_p3, %p7660_p0 }
 0x4d3   :  { %v5902_v44 = vadd.f32 %v6743_v12, %v5880_v1  ;;  %v5903_v41 = vadd.f32 %v6743_v12, %v5881_v47  ;;  %v5904_v57 = vadd.f32 %v6743_v12, %v5882_v50  ;;  %v5905_v43 = vadd.f32 %v6743_v12, %v5883_v34 }
 0x4d4   :  { %v5906_v51 = vadd.f32 %v6743_v12, %v5884_v31  ;;  %v5907_v2 = vadd.f32 %v6743_v12, %v5885_v13  ;;  %v5908_v60 = vadd.f32 %v6743_v12, %v5886_v61  ;;  %v5909_v5 = vadd.f32 %v6743_v12, %v5887_v6 }
 0x4d5   :  { %v6246_v40 = vadd.f32 %v6230_v16, %v5894_v30  ;;  %v6247_v22 = vadd.f32 %v6231_v54, %v5895_v36  ;;  %v6248_v62 = vadd.f32 %v6232_v19, %v5896_v0  ;;  %v6249_v9 = vadd.f32 %v6233_v15, %v5897_v42 }
 0x4d6   :  { %v6250_v58 = vadd.f32 %v6234_v10, %v5898_v26  ;;  %v6251_v27 = vadd.f32 %v6235_v17, %v5899_v56  ;;  %v6252_v46 = vadd.f32 %v6236_v37, %v5900_v48  ;;  %v6253_v29 = vadd.f32 %v6237_v18, %v5901_v55 }
 0x4d7   :  { %v6254_v52 = vadd.f32 %v6238_v38, %v5902_v44  ;;  %v6255_v53 = vadd.f32 %v6239_v24, %v5903_v41  ;;  %v6256_v21 = vadd.f32 %v6240_v39, %v5904_v57  ;;  %v6257_v33 = vadd.f32 %v6241_v28, %v5905_v43 }
 0x4d8   :  { %v6258_v63 = vadd.f32 %v6242_v32, %v5906_v51  ;;  %v6259_v8 = vadd.f32 %v6243_v3, %v5907_v2  ;;  %v6260_v25 = vadd.f32 %v6244_v49, %v5908_v60  ;;  %v6261_v35 = vadd.f32 %v6245_v14, %v5909_v5 }
 0x4d9   :  { %v6262_v11 = vmax.f32 %v6246_v40, 0.0  ;;  %v6263_v23 = vmax.f32 %v6247_v22, 0.0  ;;  %v6264_v4 = vmax.f32 %v6248_v62, 0.0  ;;  %v6265_v12 = vmax.f32 %v6249_v9, 0.0 }
 0x4da   :  { %v6266_v16 = vmax.f32 %v6250_v58, 0.0  ;;  %v6267_v54 = vmax.f32 %v6251_v27, 0.0  ;;  %v6268_v19 = vmax.f32 %v6252_v46, 0.0  ;;  %v6269_v15 = vmax.f32 %v6253_v29, 0.0 }
 0x4db   :  { %v6270_v10 = vmax.f32 %v6254_v52, 0.0  ;;  %v6271_v17 = vmax.f32 %v6255_v53, 0.0  ;;  %v6272_v37 = vmax.f32 %v6256_v21, 0.0  ;;  %v6273_v18 = vmax.f32 %v6257_v33, 0.0  ;;  %6278 = vst.msk [vmem:[#allocation3] sm:$0xff] %vm2476_vm5, %v6262_v11  ;;  %6279 = vst.msk [vmem:[#allocation3 + $0x8] sm:$0xff] %vm2476_vm5, %v6263_v23 }
 0x4dc   :  { %6280 = vst.msk [vmem:[#allocation3 + $0x10] sm:$0xff] %vm2476_vm5, %v6264_v4  ;;  %6281 = vst.msk [vmem:[#allocation3 + $0x18] sm:$0xff] %vm2476_vm5, %v6265_v12  ;;  %v6274_v38 = vmax.f32 %v6258_v63, 0.0  ;;  %v6275_v24 = vmax.f32 %v6259_v8, 0.0  ;;  %v6276_v39 = vmax.f32 %v6260_v25, 0.0  ;;  %v6277_v28 = vmax.f32 %v6261_v35, 0.0 }
 0x4dd   :  { %6282 = vst.msk [vmem:[#allocation3 + $0x20] sm:$0xff] %vm2476_vm5, %v6266_v16  ;;  %6283 = vst.msk [vmem:[#allocation3 + $0x28] sm:$0xff] %vm2476_vm5, %v6267_v54 }
 0x4de   :  { %6284 = vst.msk [vmem:[#allocation3 + $0x30] sm:$0xff] %vm2476_vm5, %v6268_v19  ;;  %6285 = vst.msk [vmem:[#allocation3 + $0x38] sm:$0xff] %vm2476_vm5, %v6269_v15 }
 0x4df   :  { %6286 = vst.msk [vmem:[#allocation3 + $0x40] sm:$0xff] %vm2476_vm5, %v6270_v10  ;;  %6287 = vst.msk [vmem:[#allocation3 + $0x48] sm:$0xff] %vm2476_vm5, %v6271_v17 }
 0x4e0   :  { %6288 = vst.msk [vmem:[#allocation3 + $0x50] sm:$0xff] %vm2476_vm5, %v6272_v37  ;;  %6289 = vst.msk [vmem:[#allocation3 + $0x58] sm:$0xff] %vm2476_vm5, %v6273_v18 }
 0x4e1   :  { %6290 = vst.msk [vmem:[#allocation3 + $0x60] sm:$0xff] %vm2476_vm5, %v6274_v38  ;;  %6291 = vst.msk [vmem:[#allocation3 + $0x68] sm:$0xff] %vm2476_vm5, %v6275_v24 }
 0x4e2   :  { %6292 = vst.msk [vmem:[#allocation3 + $0x70] sm:$0xff] %vm2476_vm5, %v6276_v39  ;;  %6293 = vst.msk [vmem:[#allocation3 + $0x78] sm:$0xff] %vm2476_vm5, %v6277_v28 }
 0x4e3   :  { %7670 = shalt.err (!%p7667_p4)
}
 0x4e4   :  { %s7671_s2 = scalar_lea.hbm %s10043_s13, 2048 }
 0x4e5   :  { %p7672_p5 = scmp.ne.s32.totalorder %s10043_s13, %s7671_s2  ;;  %p7675_p6 = scmp.lt.u32.totalorder %s7671_s2, %s10043_s13 }
 0x4e7   :  { %p7677_p7 = pnand %p7675_p6, %p7672_p5 }
 0x4e9   :  { %7680 = shalt.err (!%p7677_p7)
}
 0x4ea   :  { %s7685_s15 = smov 128   ;;  %s7686_s16 = smov 8  }
 0x4eb   :  { %6305 = dma.vmem_to_hbm [thread:$0]  %s6300_s26, 2048, %s10043_s13, [#allocation4], %s7685_s15, %s7685_s15, %s7686_s16  }
 0x4ec   :  { %7681 = dma.done.wait [#allocation4], 2048  }
 0x4ed   :  { %7682 = vsyncadd [#allocation4], 4294965248 }
 0x4ee   :  { %6309 = vsyncpa [#allocation4], 1 }

</bundles_post_ra>
